<compile_context>
chip_gen: v7x
topology: tpu7x:2x2x1
jax: 0.10.0
libtpu: 0.0.40
codegen_flags: <defaults>
</compile_context>

<pallas_src>
import functools
import numpy as np
import jax
import jax.numpy as jnp
from jax import lax
from jax.experimental import pallas as pl
from jax.experimental.pallas import tpu as pltpu


CONFIG = dict(
    vocab_size=64, hidden_size=32, mlp_size=64, attention_head_size=16,
    num_attention_heads=4, num_iaf_attention_heads=2, num_registers=2,
    num_layers=2, hidden_act='silu', norm_eps=1e-5, rope_fraction=2,
    rope_base=10000.0, z_size=8, max_sequence_length=8,
)


# ------------------------------ fused forward kernel ------------------------------
#
# pack_ref : (3+4L, rows, H) f32   [0]=initial state (hidden;markov), [1+l]=per-layer down z-bias,
#                                  [1+L+3l..3+L+3l]=enter gain / enter bias / exit alpha (per row),
#                                  [1+4L],[2+4L]=final LayerNorm gain / bias (per row).
# tabs_ref : (4, rows, Wtab) f32   [0]=cos, [1]=-sin (x2 partner), [2]=+sin (x1 partner), tiled over
#                                  the [q|k] lane block; [3]=additive attention mask (seq + regs).
# ubias_ref: (L, rows, Nup+2lz)    z-dependent bias of the fused up projection (zero on mu/sig cols).
# wup_ref  : (L, H, Nup+2lz) bf16  fused [q|k|v|gate|val|mu|log_sigma] weight (z_scale folded in).
# wdn_ref  : (L, qkv+mlp, H) bf16  down weight for the [attn|glu] block.
# kvreg_ref: (2L, R, qkv)    f32   [2l]=k registers, [2l+1]=v registers.
# head_ref : (H, V)          bf16  shared lm head.
# out_ref  : (rows, 128)     f32   [log-probs (V) | mu_l0..mu_lL-1, sig_l0..sig_lL-1 | zero pad].

def _zlm_fused_kernel(pack_ref, tabs_ref, ubias_ref, wup_ref, wdn_ref, kvreg_ref,
                      head_ref, out_ref, *, rows, L, lz, nh, hd, half, R, mlp, qkv, V, eps):
  f32 = jnp.float32
  bf16 = jnp.bfloat16
  Nup = 3 * qkv + 2 * mlp
  qk_w = 2 * qkv
  scale = 1.0 / float(np.sqrt(hd))
  sp_shift = float(np.log(np.e - 1.0))
  contract_last = (((1,), (1,)), ((), ()))      # 'qd,kd->qk' (no in-kernel transpose of K)

  def mxu(a, w):                                # bf16 operands, f32 accumulation on the MXU
    return jnp.dot(a.astype(bf16), w, preferred_element_type=f32)

  def layer_norm(x, g, b):
    m = jnp.mean(x, axis=-1, keepdims=True)
    c = x - m
    v = jnp.mean(c * c, axis=-1, keepdims=True)
    return c * lax.rsqrt(v + eps) * g + b

  def softplus(x):                              # stable, avoids log1p lowering dependency
    return jnp.maximum(x, 0.0) + jnp.log(1.0 + jnp.exp(-jnp.abs(x)))

  cos = tabs_ref[0][:, :qk_w]                   # (rows, 2*qkv) RoPE tables over the [q|k] block
  sina = tabs_ref[1][:, :qk_w]
  sinb = tabs_ref[2][:, :qk_w]
  mask = tabs_ref[3][:, :rows + R]              # (rows, rows+R) additive block mask (+0 on registers)

  state = pack_ref[0]                           # (rows, H): hidden rows then markov rows
  mus, sigs = [], []

  for i in range(L):                            # static unroll (L=2)
    gain = pack_ref[1 + L + 3 * i]
    bias = pack_ref[2 + L + 3 * i]
    alpha = pack_ref[3 + L + 3 * i]

    x = layer_norm(state, gain, bias)           # ReZeroIO.enter (reconstructed as LayerNorm)

    # one fused matmul per layer: [q|k|v|gate|val|mu|log_sigma]; z-dependent bias precomputed.
    act = mxu(x, wup_ref[i]) + ubias_ref[i]     # (rows, Nup + 2*lz)

    mus.append(act[:, Nup:Nup + lz])
    sigs.append(softplus(act[:, Nup + lz:Nup + 2 * lz] + sp_shift))

    # RoPE applied once to the lane-dense [q|k] block via lane rotations (XLU) + tables.
    qk = act[:, :qk_w]
    qk_rot = (qk * cos
              + pltpu.roll(qk, qk_w - half, axis=1) * sina     # partner x[l+half] for the x1 lanes
              + pltpu.roll(qk, half, axis=1) * sinb)           # partner x[l-half] for the x2 lanes

    # TODO(synk): RotaryAttention source not provided; registers reconstructed as learned k/v
    # rows appended after RoPE, always attendable.
    keys = jnp.concatenate([qk_rot[:, qkv:], kvreg_ref[2 * i]], axis=0)        # (rows+R, qkv)
    vals = jnp.concatenate([act[:, 2 * qkv:3 * qkv], kvreg_ref[2 * i + 1]], axis=0)

    heads = []
    for h in range(nh):                          # one score + one value matmul per head,
      sl = slice(h * hd, (h + 1) * hd)           # covering both paths and all examples at once
      s = lax.dot_general(qk_rot[:, sl], keys[:, sl], contract_last,
                          preferred_element_type=f32) * scale + mask
      s = s - jnp.max(s, axis=-1, keepdims=True)
      p = jnp.exp(s)
      p = p / jnp.sum(p, axis=-1, keepdims=True)
      heads.append(jnp.dot(p, vals[:, sl], preferred_element_type=f32))
    attn = jnp.concatenate(heads, axis=-1)       # (rows, qkv)

    gate = act[:, 3 * qkv:3 * qkv + mlp]
    val = act[:, 3 * qkv + mlp:Nup]
    glu = gate * (1.0 / (1.0 + jnp.exp(-gate))) * val          # SiLU(gate) * val

    # fused down projection (K = qkv + mlp = 128); z part is the precomputed pack_ref[1+i] bias.
    y = mxu(jnp.concatenate([attn, glu], axis=-1), wdn_ref[i]) + pack_ref[1 + i]

    # TODO(synk): ReZeroIO source not provided; exit reconstructed as x + alpha * y.
    state = state + alpha * y

  # final per-path LayerNorm + shared lm_head + exact log_softmax, one matmul for both paths.
  xn = layer_norm(state, pack_ref[1 + 4 * L], pack_ref[2 + 4 * L])
  logits = mxu(xn, head_ref[...])                               # (rows, V)
  mx = jnp.max(logits, axis=-1, keepdims=True)
  lse = mx + jnp.log(jnp.sum(jnp.exp(logits - mx), axis=-1, keepdims=True))
  logp = logits - lse

  pieces = [logp, jnp.concatenate(mus + sigs, axis=-1)]         # lane-dense output slab
  pad = out_ref.shape[1] - V - 2 * L * lz
  if pad:
    pieces.append(jnp.zeros((rows, pad), f32))
  out_ref[...] = jnp.concatenate(pieces, axis=-1)


# ----------------------------------- parameters -----------------------------------

def init_params(key, cfg):
  H = cfg['hidden_size']; V = cfg['vocab_size']; Z = cfg['z_size']
  L = cfg['num_layers']; lz = Z // L
  qkv = cfg['attention_head_size'] * cfg['num_attention_heads']
  mlp = cfg['mlp_size']; R = cfg['num_registers']
  keys = jax.random.split(key, 3 + 5 * L)
  s = 0.02
  params = {
      'embs': s * jax.random.normal(keys[0], (V, H), jnp.float32),
      'z_proj': s * jax.random.normal(keys[1], (Z, H), jnp.float32),
      'lm_head': s * jax.random.normal(keys[2], (H, V), jnp.float32),
      'norm_g': jnp.ones((H,), jnp.float32), 'norm_b': jnp.zeros((H,), jnp.float32),
      'mnorm_g': jnp.ones((H,), jnp.float32), 'mnorm_b': jnp.zeros((H,), jnp.float32),
      'layers': [],
  }
  k = 3
  for _ in range(L):
    lp = {
        'z_proj': s * jax.random.normal(keys[k], (H, 2 * lz), jnp.float32),
        'up': s * jax.random.normal(keys[k + 1], (H + lz, 3 * qkv + 2 * mlp), jnp.float32),
        'down': s * jax.random.normal(keys[k + 2], (lz + qkv + mlp, H), jnp.float32),
        'k_regs': s * jax.random.normal(keys[k + 3], (R, qkv), jnp.float32),
        'v_regs': s * jax.random.normal(keys[k + 4], (R, qkv), jnp.float32),
        # TODO(synk): ReZeroIO source not provided; reconstructed as enter=LayerNorm,
        # exit=x + alpha*y. alpha would be 0 at ReZero init; 0.1 exercises the residual.
        'io_g': jnp.ones((H,), jnp.float32), 'io_b': jnp.zeros((H,), jnp.float32),
        'io_alpha': jnp.full((H,), 0.1, jnp.float32),
        'mio_g': jnp.ones((H,), jnp.float32), 'mio_b': jnp.zeros((H,), jnp.float32),
        'mio_alpha': jnp.full((H,), 0.1, jnp.float32),
    }
    params['layers'].append(lp)
    k += 5
  return params


# ---------------------------------- forward wrapper ----------------------------------

def zlm_decoder_forward(params, input_ids, z, cfg):
  f32, bf16 = jnp.float32, jnp.bfloat16
  bs, seq = input_ids.shape
  H = cfg['hidden_size']; Z = cfg['z_size']; L = cfg['num_layers']; lz = Z // L
  nh = cfg['num_attention_heads']; hd = cfg['attention_head_size']; qkv = nh * hd
  R = cfg['num_registers']; mlp = cfg['mlp_size']; V = cfg['vocab_size']
  eps = cfg['norm_eps']
  rope_dim = hd // cfg['rope_fraction']; half = rope_dim // 2
  Nup = 3 * qkv + 2 * mlp
  rows_h = bs * seq
  rows = 2 * rows_h                                   # hidden rows then markov rows
  z_scale = float(np.sqrt(1.0 / Z))

  # ---- hoisted input-only compute (embedding gather, latent injection, z-dependent biases) ----
  emb = params['embs'][input_ids].astype(f32)                            # (bs, seq, H)
  zfull = z.reshape(bs, seq, Z).astype(f32)
  zp = zfull @ params['z_proj']                                          # (bs, seq, H)
  h0 = jnp.where(jnp.arange(seq)[None, :, None] >= 1,
                 (emb + zp) / np.sqrt(2.0), emb)
  x0 = h0.reshape(rows_h, H)
  x0_cat = jnp.concatenate([x0, x0], axis=0)                             # (rows, H)

  z4 = z.reshape(bs, seq, L, lz).astype(f32)
  z_shift = jnp.concatenate([z4[:, 1:], jnp.zeros_like(z4[:, :1])], axis=1)
  zc_half = jnp.moveaxis(z_shift, 2, 0).reshape(L, rows_h, lz)
  zc = jnp.concatenate([zc_half, zc_half], axis=1)                       # (L, rows, lz)

  up_w = jnp.stack([lp['up'] for lp in params['layers']])                # (L, H+lz, Nup)
  dn_w = jnp.stack([lp['down'] for lp in params['layers']])              # (L, lz+qkv+mlp, H)
  zp_w = jnp.stack([lp['z_proj'] for lp in params['layers']])            # (L, H, 2*lz)

  ub = jnp.einsum('lrk,lkn->lrn', zc, up_w[:, H:, :])                    # z part of "up"
  ubias = jnp.concatenate([ub, jnp.zeros((L, rows, 2 * lz), f32)], axis=-1)
  dnz_bias = jnp.einsum('lrk,lkn->lrn', zc, dn_w[:, :lz, :])             # z part of "down"

  # fused weights (layer z_proj folded into "up", z_scale folded into the weight)
  w_up = jnp.concatenate([up_w[:, :H, :], z_scale * zp_w], axis=-1).astype(bf16)  # (L, H, Nup+2lz)
  w_dn = dn_w[:, lz:, :].astype(bf16)                                    # (L, qkv+mlp, H)
  head_w = params['lm_head'].astype(bf16)                                # (H, V)
  kv_list = []
  for lp in params['layers']:
    kv_list += [lp['k_regs'], lp['v_regs']]
  kvreg = jnp.stack(kv_list).astype(f32)                                 # (2L, R, qkv)

  # per-row (path-dependent) norm params + initial state + down z-bias, packed into one array
  def per_path(a_h, a_m):
    return jnp.concatenate([jnp.broadcast_to(a_h, (rows_h, H)),
                            jnp.broadcast_to(a_m, (rows_h, H))], axis=0)
  pack_list = [x0_cat] + [dnz_bias[i] for i in range(L)]
  for lp in params['layers']:
    pack_list += [per_path(lp['io_g'], lp['mio_g']),
                  per_path(lp['io_b'], lp['mio_b']),
                  per_path(lp['io_alpha'], lp['mio_alpha'])]
  pack_list += [per_path(params['norm_g'], params['mnorm_g']),
                per_path(params['norm_b'], params['mnorm_b'])]
  pack = jnp.stack(pack_list, axis=0)                                    # (3+4L, rows, H)

  # ---- constant tables (RoPE over the [q|k] lane block + block attention mask), one array ----
  Wtab = max(2 * qkv, rows + R)
  posn = np.arange(seq, dtype=np.float64)
  inv_freq = cfg['rope_base'] ** (-np.arange(half, dtype=np.float64) / half)
  ang = posn[:, None] * inv_freq[None, :]                                # (seq, half)
  cos_h = np.zeros((seq, hd)); sina_h = np.zeros((seq, hd)); sinb_h = np.zeros((seq, hd))
  cos_h[:, :half] = np.cos(ang); cos_h[:, half:rope_dim] = np.cos(ang); cos_h[:, rope_dim:] = 1.0
  sina_h[:, :half] = -np.sin(ang)                # multiplies x[l+half] on the x1 lanes
  sinb_h[:, half:rope_dim] = np.sin(ang)         # multiplies x[l-half] on the x2 lanes

  def tile_tab(t):                               # (seq, hd) -> (rows, Wtab) over the [q|k] block
    t2 = np.tile(t, (1, 2 * nh))
    t2 = np.pad(t2, ((0, 0), (0, Wtab - 2 * qkv)))
    return np.tile(t2, (2 * bs, 1))

  grp = np.repeat(np.arange(2 * bs), seq)        # row -> (path*bs + example)
  posr = np.tile(np.arange(seq), 2 * bs)
  same = grp[:, None] == grp[None, :]
  causal = posr[None, :] <= posr[:, None]
  diag = posr[None, :] == posr[:, None]
  allowed = same & np.where((grp[:, None] // bs) == 0, causal, diag)
  mask_np = np.where(allowed, 0.0, -1e30).astype(np.float32)             # finite "-inf" (robust)
  mask_np = np.concatenate([mask_np, np.zeros((rows, R), np.float32)], axis=1)
  mask_np = np.pad(mask_np, ((0, 0), (0, Wtab - rows - R)))
  tabs = jnp.asarray(np.stack([tile_tab(cos_h), tile_tab(sina_h), tile_tab(sinb_h), mask_np]),
                     dtype=f32)                                          # (4, rows, Wtab)

  # ---- single pallas_call, no grid: whole batch resident in VMEM on one TensorCore ----
  out_w = V + 2 * L * lz
  out_w_pad = int(pl.cdiv(out_w, 128)) * 128                             # lane-dense output slab
  kernel = functools.partial(_zlm_fused_kernel, rows=rows, L=L, lz=lz, nh=nh, hd=hd,
                             half=half, R=R, mlp=mlp, qkv=qkv, V=V, eps=eps)
  vmem = pl.BlockSpec(memory_space=pltpu.MemorySpace.VMEM)
  out = pl.pallas_call(
      kernel,
      out_shape=jax.ShapeDtypeStruct((rows, out_w_pad), f32),
      in_specs=[vmem] * 7,
      out_specs=vmem,
  )(pack, tabs, ubias, w_up, w_dn, kvreg, head_w)

  # ---- unpack the single output slab ----
  logp = out[:, :V]
  lm_logits = logp[:rows_h].reshape(bs, seq, V)
  markov_logits = logp[rows_h:].reshape(bs, seq, V)
  stats = out[:, V:V + 2 * L * lz]                                       # [mu per layer | sigma per layer]
  st_h = stats[:rows_h].reshape(bs, seq, 2, L, lz)
  st_m = stats[rows_h:].reshape(bs, seq, 2, L, lz)
  mus, sigmas = st_h[:, :, 0], st_h[:, :, 1]
  markov_mus, markov_sigmas = st_m[:, :, 0], st_m[:, :, 1]
  return lm_logits, markov_logits, mus, sigmas, markov_mus, markov_sigmas


if __name__ == "__main__":
  cfg = CONFIG
  key = jax.random.PRNGKey(0)
  pkey, ikey, zkey = jax.random.split(key, 3)
  params = init_params(pkey, cfg)

  bs, seq = 2, cfg['max_sequence_length']
  L = cfg['num_layers']
  lz = cfg['z_size'] // L
  input_ids = jax.random.randint(ikey, (bs, seq), 0, cfg['vocab_size'])
  z = jax.random.normal(zkey, (bs, seq, L, lz), jnp.float32)

  fwd = jax.jit(lambda p, ids, zz: zlm_decoder_forward(p, ids, zz, cfg))
  outs = fwd(params, input_ids, z)
  outs = jax.block_until_ready(outs)

  lm_logits, markov_logits, mus, sigmas, mmus, msigmas = outs
  assert lm_logits.shape == (bs, seq, cfg['vocab_size'])
  assert markov_logits.shape == (bs, seq, cfg['vocab_size'])
  assert mus.shape == (bs, seq, L, lz)
  assert sigmas.shape == (bs, seq, L, lz)
  assert mmus.shape == (bs, seq, L, lz)
  assert msigmas.shape == (bs, seq, L, lz)
  assert bool(jnp.all(jnp.isfinite(lm_logits))) and bool(jnp.all(jnp.isfinite(markov_logits)))
  assert bool(jnp.all(sigmas > 0)) and bool(jnp.all(msigmas > 0))
  # log_softmax sanity: probabilities sum to 1 on both output heads
  assert bool(jnp.allclose(jnp.exp(lm_logits).sum(-1), 1.0, atol=1e-3))
  assert bool(jnp.allclose(jnp.exp(markov_logits).sum(-1), 1.0, atol=1e-3))
  print("KERNEL_OK")
</pallas_src>

<mosaic_0001>
module attributes {stable_mosaic.version = 11 : i64} {
  func.func @_zlm_fused_kernel(%arg0: memref<11x32x32xf32, #tpu.memory_space<vmem>>, %arg1: memref<4x32x128xf32, #tpu.memory_space<vmem>>, %arg2: memref<2x32x328xf32, #tpu.memory_space<vmem>>, %arg3: memref<2x32x328xbf16, #tpu.memory_space<vmem>>, %arg4: memref<2x128x32xbf16, #tpu.memory_space<vmem>>, %arg5: memref<4x2x64xf32, #tpu.memory_space<vmem>>, %arg6: memref<32x64xbf16, #tpu.memory_space<vmem>>, %arg7: memref<32x128xf32, #tpu.memory_space<vmem>>) attributes {dimension_semantics = [], scalar_prefetch = 0 : i64, scratch_operands = 0 : i64, tpu.core_type = #tpu.core_type<tc>} {
    %c0 = arith.constant 0 : index
    %c0_0 = arith.constant 0 : index
    %c0_1 = arith.constant 0 : index
    %0 = vector.load %arg1[%c0, %c0_0, %c0_1] : memref<4x32x128xf32, #tpu.memory_space<vmem>>, vector<1x32x128xf32>
    %1 = vector.shape_cast %0 : vector<1x32x128xf32> to vector<32x128xf32>
    %c1 = arith.constant 1 : index
    %c0_2 = arith.constant 0 : index
    %c0_3 = arith.constant 0 : index
    %2 = vector.load %arg1[%c1, %c0_2, %c0_3] : memref<4x32x128xf32, #tpu.memory_space<vmem>>, vector<1x32x128xf32>
    %3 = vector.shape_cast %2 : vector<1x32x128xf32> to vector<32x128xf32>
    %c2 = arith.constant 2 : index
    %c0_4 = arith.constant 0 : index
    %c0_5 = arith.constant 0 : index
    %4 = vector.load %arg1[%c2, %c0_4, %c0_5] : memref<4x32x128xf32, #tpu.memory_space<vmem>>, vector<1x32x128xf32>
    %5 = vector.shape_cast %4 : vector<1x32x128xf32> to vector<32x128xf32>
    %c3 = arith.constant 3 : index
    %c0_6 = arith.constant 0 : index
    %c0_7 = arith.constant 0 : index
    %6 = vector.load %arg1[%c3, %c0_6, %c0_7] : memref<4x32x128xf32, #tpu.memory_space<vmem>>, vector<1x32x128xf32>
    %7 = vector.shape_cast %6 : vector<1x32x128xf32> to vector<32x128xf32>
    %8 = vector.extract_strided_slice %7 {offsets = [0, 0], sizes = [32, 34], strides = [1, 1]} : vector<32x128xf32> to vector<32x34xf32>
    %c0_8 = arith.constant 0 : index
    %c0_9 = arith.constant 0 : index
    %c0_10 = arith.constant 0 : index
    %9 = vector.load %arg0[%c0_8, %c0_9, %c0_10] : memref<11x32x32xf32, #tpu.memory_space<vmem>>, vector<1x32x32xf32>
    %10 = vector.shape_cast %9 : vector<1x32x32xf32> to vector<32x32xf32>
    %c3_11 = arith.constant 3 : index
    %c0_12 = arith.constant 0 : index
    %c0_13 = arith.constant 0 : index
    %11 = vector.load %arg0[%c3_11, %c0_12, %c0_13] : memref<11x32x32xf32, #tpu.memory_space<vmem>>, vector<1x32x32xf32>
    %12 = vector.shape_cast %11 : vector<1x32x32xf32> to vector<32x32xf32>
    %c4 = arith.constant 4 : index
    %c0_14 = arith.constant 0 : index
    %c0_15 = arith.constant 0 : index
    %13 = vector.load %arg0[%c4, %c0_14, %c0_15] : memref<11x32x32xf32, #tpu.memory_space<vmem>>, vector<1x32x32xf32>
    %14 = vector.shape_cast %13 : vector<1x32x32xf32> to vector<32x32xf32>
    %c5 = arith.constant 5 : index
    %c0_16 = arith.constant 0 : index
    %c0_17 = arith.constant 0 : index
    %15 = vector.load %arg0[%c5, %c0_16, %c0_17] : memref<11x32x32xf32, #tpu.memory_space<vmem>>, vector<1x32x32xf32>
    %16 = vector.shape_cast %15 : vector<1x32x32xf32> to vector<32x32xf32>
    %cst = arith.constant dense<0.000000e+00> : vector<32xf32>
    %17 = vector.multi_reduction <add>, %10, %cst [1] : vector<32x32xf32> to vector<32xf32>
    %18 = vector.shape_cast %17 : vector<32xf32> to vector<32x1xf32>
    %cst_18 = arith.constant 3.200000e+01 : f32
    %19 = vector.broadcast %cst_18 : f32 to vector<32x1xf32>
    %20 = arith.divf %18, %19 : vector<32x1xf32>
    %21 = vector.broadcast %20 : vector<32x1xf32> to vector<32x32xf32>
    %22 = arith.subf %10, %21 : vector<32x32xf32>
    %23 = arith.mulf %22, %22 : vector<32x32xf32>
    %cst_19 = arith.constant dense<0.000000e+00> : vector<32xf32>
    %24 = vector.multi_reduction <add>, %23, %cst_19 [1] : vector<32x32xf32> to vector<32xf32>
    %25 = vector.shape_cast %24 : vector<32xf32> to vector<32x1xf32>
    %cst_20 = arith.constant 3.200000e+01 : f32
    %26 = vector.broadcast %cst_20 : f32 to vector<32x1xf32>
    %27 = arith.divf %25, %26 : vector<32x1xf32>
    %cst_21 = arith.constant 9.99999974E-6 : f32
    %28 = vector.broadcast %cst_21 : f32 to vector<32x1xf32>
    %29 = arith.addf %27, %28 : vector<32x1xf32>
    %30 = math.rsqrt %29 : vector<32x1xf32>
    %31 = vector.broadcast %30 : vector<32x1xf32> to vector<32x32xf32>
    %32 = arith.mulf %22, %31 : vector<32x32xf32>
    %33 = arith.mulf %32, %12 : vector<32x32xf32>
    %34 = arith.addf %33, %14 : vector<32x32xf32>
    %c0_22 = arith.constant 0 : index
    %c0_23 = arith.constant 0 : index
    %c0_24 = arith.constant 0 : index
    %35 = vector.load %arg3[%c0_22, %c0_23, %c0_24] : memref<2x32x328xbf16, #tpu.memory_space<vmem>>, vector<1x32x328xbf16>
    %36 = vector.shape_cast %35 : vector<1x32x328xbf16> to vector<32x328xbf16>
    %37 = arith.truncf %34 : vector<32x32xf32> to vector<32x32xbf16>
    %cst_25 = arith.constant dense<0.000000e+00> : vector<32x328xf32>
    %38 = tpu.matmul %37, %36, %cst_25 {dimension_numbers = #tpu.dot_dimension_numbers<[1], [0], [0], [1], [0, 0, 1, 1], [], []>} : vector<32x32xbf16>, vector<32x328xbf16>, vector<32x328xf32> -> vector<32x328xf32>
    %c0_26 = arith.constant 0 : index
    %c0_27 = arith.constant 0 : index
    %c0_28 = arith.constant 0 : index
    %39 = vector.load %arg2[%c0_26, %c0_27, %c0_28] : memref<2x32x328xf32, #tpu.memory_space<vmem>>, vector<1x32x328xf32>
    %40 = vector.shape_cast %39 : vector<1x32x328xf32> to vector<32x328xf32>
    %41 = arith.addf %38, %40 : vector<32x328xf32>
    %42 = vector.extract_strided_slice %41 {offsets = [0, 320], sizes = [32, 4], strides = [1, 1]} : vector<32x328xf32> to vector<32x4xf32>
    %43 = vector.extract_strided_slice %41 {offsets = [0, 324], sizes = [32, 4], strides = [1, 1]} : vector<32x328xf32> to vector<32x4xf32>
    %cst_29 = arith.constant 0.541324854 : f32
    %44 = vector.broadcast %cst_29 : f32 to vector<32x4xf32>
    %45 = arith.addf %43, %44 : vector<32x4xf32>
    %cst_30 = arith.constant 0.000000e+00 : f32
    %46 = vector.broadcast %cst_30 : f32 to vector<32x4xf32>
    %47 = arith.maximumf %45, %46 : vector<32x4xf32>
    %48 = math.absf %45 : vector<32x4xf32>
    %cst_31 = arith.constant 0.000000e+00 : f32
    %49 = vector.broadcast %cst_31 : f32 to vector<32x4xf32>
    %50 = arith.subf %49, %48 : vector<32x4xf32>
    %51 = math.exp %50 : vector<32x4xf32>
    %cst_32 = arith.constant 1.000000e+00 : f32
    %52 = vector.broadcast %cst_32 : f32 to vector<32x4xf32>
    %53 = arith.addf %52, %51 : vector<32x4xf32>
    %54 = math.log %53 : vector<32x4xf32>
    %55 = arith.addf %47, %54 : vector<32x4xf32>
    %56 = vector.extract_strided_slice %41 {offsets = [0, 0], sizes = [32, 128], strides = [1, 1]} : vector<32x328xf32> to vector<32x128xf32>
    %57 = arith.mulf %56, %1 : vector<32x128xf32>
    %c124_i32 = arith.constant 124 : i32
    %58 = tpu.dynamic_rotate %56 by %c124_i32 dim 1 : vector<32x128xf32>, i32 -> vector<32x128xf32>
    %59 = arith.mulf %58, %3 : vector<32x128xf32>
    %60 = arith.addf %57, %59 : vector<32x128xf32>
    %c4_i32 = arith.constant 4 : i32
    %61 = tpu.dynamic_rotate %56 by %c4_i32 dim 1 : vector<32x128xf32>, i32 -> vector<32x128xf32>
    %62 = arith.mulf %61, %5 : vector<32x128xf32>
    %63 = arith.addf %60, %62 : vector<32x128xf32>
    %64 = vector.extract_strided_slice %63 {offsets = [0, 64], sizes = [32, 64], strides = [1, 1]} : vector<32x128xf32> to vector<32x64xf32>
    %c0_33 = arith.constant 0 : index
    %c0_34 = arith.constant 0 : index
    %c0_35 = arith.constant 0 : index
    %65 = vector.load %arg5[%c0_33, %c0_34, %c0_35] : memref<4x2x64xf32, #tpu.memory_space<vmem>>, vector<1x2x64xf32>
    %66 = vector.shape_cast %65 : vector<1x2x64xf32> to vector<2x64xf32>
    %67 = tpu.concatenate %64, %66 in 0 : vector<32x64xf32>, vector<2x64xf32> -> vector<34x64xf32>
    %68 = vector.extract_strided_slice %41 {offsets = [0, 128], sizes = [32, 64], strides = [1, 1]} : vector<32x328xf32> to vector<32x64xf32>
    %c1_36 = arith.constant 1 : index
    %c0_37 = arith.constant 0 : index
    %c0_38 = arith.constant 0 : index
    %69 = vector.load %arg5[%c1_36, %c0_37, %c0_38] : memref<4x2x64xf32, #tpu.memory_space<vmem>>, vector<1x2x64xf32>
    %70 = vector.shape_cast %69 : vector<1x2x64xf32> to vector<2x64xf32>
    %71 = tpu.concatenate %68, %70 in 0 : vector<32x64xf32>, vector<2x64xf32> -> vector<34x64xf32>
    %72 = vector.extract_strided_slice %63 {offsets = [0, 0], sizes = [32, 16], strides = [1, 1]} : vector<32x128xf32> to vector<32x16xf32>
    %73 = vector.extract_strided_slice %67 {offsets = [0, 0], sizes = [34, 16], strides = [1, 1]} : vector<34x64xf32> to vector<34x16xf32>
    %cst_39 = arith.constant dense<0.000000e+00> : vector<32x34xf32>
    %74 = tpu.matmul %72, %73, %cst_39 {dimension_numbers = #tpu.dot_dimension_numbers<[1], [1], [0], [0], [0, 0, 1, 0], [], []>} : vector<32x16xf32>, vector<34x16xf32>, vector<32x34xf32> -> vector<32x34xf32>
    %cst_40 = arith.constant 2.500000e-01 : f32
    %75 = vector.broadcast %cst_40 : f32 to vector<32x34xf32>
    %76 = arith.mulf %74, %75 : vector<32x34xf32>
    %77 = arith.addf %76, %8 : vector<32x34xf32>
    %cst_41 = arith.constant dense<0xFF800000> : vector<32xf32>
    %78 = vector.multi_reduction <maximumf>, %77, %cst_41 [1] : vector<32x34xf32> to vector<32xf32>
    %79 = vector.shape_cast %78 : vector<32xf32> to vector<32x1xf32>
    %80 = vector.broadcast %79 : vector<32x1xf32> to vector<32x34xf32>
    %81 = arith.subf %77, %80 : vector<32x34xf32>
    %82 = math.exp %81 : vector<32x34xf32>
    %cst_42 = arith.constant dense<0.000000e+00> : vector<32xf32>
    %83 = vector.multi_reduction <add>, %82, %cst_42 [1] : vector<32x34xf32> to vector<32xf32>
    %84 = vector.shape_cast %83 : vector<32xf32> to vector<32x1xf32>
    %85 = vector.broadcast %84 : vector<32x1xf32> to vector<32x34xf32>
    %86 = arith.divf %82, %85 : vector<32x34xf32>
    %87 = vector.extract_strided_slice %71 {offsets = [0, 0], sizes = [34, 16], strides = [1, 1]} : vector<34x64xf32> to vector<34x16xf32>
    %cst_43 = arith.constant dense<0.000000e+00> : vector<32x16xf32>
    %88 = tpu.matmul %86, %87, %cst_43 {dimension_numbers = #tpu.dot_dimension_numbers<[1], [0], [0], [1], [0, 0, 1, 1], [], []>} : vector<32x34xf32>, vector<34x16xf32>, vector<32x16xf32> -> vector<32x16xf32>
    %89 = vector.extract_strided_slice %63 {offsets = [0, 16], sizes = [32, 16], strides = [1, 1]} : vector<32x128xf32> to vector<32x16xf32>
    %90 = vector.extract_strided_slice %67 {offsets = [0, 16], sizes = [34, 16], strides = [1, 1]} : vector<34x64xf32> to vector<34x16xf32>
    %cst_44 = arith.constant dense<0.000000e+00> : vector<32x34xf32>
    %91 = tpu.matmul %89, %90, %cst_44 {dimension_numbers = #tpu.dot_dimension_numbers<[1], [1], [0], [0], [0, 0, 1, 0], [], []>} : vector<32x16xf32>, vector<34x16xf32>, vector<32x34xf32> -> vector<32x34xf32>
    %cst_45 = arith.constant 2.500000e-01 : f32
    %92 = vector.broadcast %cst_45 : f32 to vector<32x34xf32>
    %93 = arith.mulf %91, %92 : vector<32x34xf32>
    %94 = arith.addf %93, %8 : vector<32x34xf32>
    %cst_46 = arith.constant dense<0xFF800000> : vector<32xf32>
    %95 = vector.multi_reduction <maximumf>, %94, %cst_46 [1] : vector<32x34xf32> to vector<32xf32>
    %96 = vector.shape_cast %95 : vector<32xf32> to vector<32x1xf32>
    %97 = vector.broadcast %96 : vector<32x1xf32> to vector<32x34xf32>
    %98 = arith.subf %94, %97 : vector<32x34xf32>
    %99 = math.exp %98 : vector<32x34xf32>
    %cst_47 = arith.constant dense<0.000000e+00> : vector<32xf32>
    %100 = vector.multi_reduction <add>, %99, %cst_47 [1] : vector<32x34xf32> to vector<32xf32>
    %101 = vector.shape_cast %100 : vector<32xf32> to vector<32x1xf32>
    %102 = vector.broadcast %101 : vector<32x1xf32> to vector<32x34xf32>
    %103 = arith.divf %99, %102 : vector<32x34xf32>
    %104 = vector.extract_strided_slice %71 {offsets = [0, 16], sizes = [34, 16], strides = [1, 1]} : vector<34x64xf32> to vector<34x16xf32>
    %cst_48 = arith.constant dense<0.000000e+00> : vector<32x16xf32>
    %105 = tpu.matmul %103, %104, %cst_48 {dimension_numbers = #tpu.dot_dimension_numbers<[1], [0], [0], [1], [0, 0, 1, 1], [], []>} : vector<32x34xf32>, vector<34x16xf32>, vector<32x16xf32> -> vector<32x16xf32>
    %106 = vector.extract_strided_slice %63 {offsets = [0, 32], sizes = [32, 16], strides = [1, 1]} : vector<32x128xf32> to vector<32x16xf32>
    %107 = vector.extract_strided_slice %67 {offsets = [0, 32], sizes = [34, 16], strides = [1, 1]} : vector<34x64xf32> to vector<34x16xf32>
    %cst_49 = arith.constant dense<0.000000e+00> : vector<32x34xf32>
    %108 = tpu.matmul %106, %107, %cst_49 {dimension_numbers = #tpu.dot_dimension_numbers<[1], [1], [0], [0], [0, 0, 1, 0], [], []>} : vector<32x16xf32>, vector<34x16xf32>, vector<32x34xf32> -> vector<32x34xf32>
    %cst_50 = arith.constant 2.500000e-01 : f32
    %109 = vector.broadcast %cst_50 : f32 to vector<32x34xf32>
    %110 = arith.mulf %108, %109 : vector<32x34xf32>
    %111 = arith.addf %110, %8 : vector<32x34xf32>
    %cst_51 = arith.constant dense<0xFF800000> : vector<32xf32>
    %112 = vector.multi_reduction <maximumf>, %111, %cst_51 [1] : vector<32x34xf32> to vector<32xf32>
    %113 = vector.shape_cast %112 : vector<32xf32> to vector<32x1xf32>
    %114 = vector.broadcast %113 : vector<32x1xf32> to vector<32x34xf32>
    %115 = arith.subf %111, %114 : vector<32x34xf32>
    %116 = math.exp %115 : vector<32x34xf32>
    %cst_52 = arith.constant dense<0.000000e+00> : vector<32xf32>
    %117 = vector.multi_reduction <add>, %116, %cst_52 [1] : vector<32x34xf32> to vector<32xf32>
    %118 = vector.shape_cast %117 : vector<32xf32> to vector<32x1xf32>
    %119 = vector.broadcast %118 : vector<32x1xf32> to vector<32x34xf32>
    %120 = arith.divf %116, %119 : vector<32x34xf32>
    %121 = vector.extract_strided_slice %71 {offsets = [0, 32], sizes = [34, 16], strides = [1, 1]} : vector<34x64xf32> to vector<34x16xf32>
    %cst_53 = arith.constant dense<0.000000e+00> : vector<32x16xf32>
    %122 = tpu.matmul %120, %121, %cst_53 {dimension_numbers = #tpu.dot_dimension_numbers<[1], [0], [0], [1], [0, 0, 1, 1], [], []>} : vector<32x34xf32>, vector<34x16xf32>, vector<32x16xf32> -> vector<32x16xf32>
    %123 = vector.extract_strided_slice %63 {offsets = [0, 48], sizes = [32, 16], strides = [1, 1]} : vector<32x128xf32> to vector<32x16xf32>
    %124 = vector.extract_strided_slice %67 {offsets = [0, 48], sizes = [34, 16], strides = [1, 1]} : vector<34x64xf32> to vector<34x16xf32>
    %cst_54 = arith.constant dense<0.000000e+00> : vector<32x34xf32>
    %125 = tpu.matmul %123, %124, %cst_54 {dimension_numbers = #tpu.dot_dimension_numbers<[1], [1], [0], [0], [0, 0, 1, 0], [], []>} : vector<32x16xf32>, vector<34x16xf32>, vector<32x34xf32> -> vector<32x34xf32>
    %cst_55 = arith.constant 2.500000e-01 : f32
    %126 = vector.broadcast %cst_55 : f32 to vector<32x34xf32>
    %127 = arith.mulf %125, %126 : vector<32x34xf32>
    %128 = arith.addf %127, %8 : vector<32x34xf32>
    %cst_56 = arith.constant dense<0xFF800000> : vector<32xf32>
    %129 = vector.multi_reduction <maximumf>, %128, %cst_56 [1] : vector<32x34xf32> to vector<32xf32>
    %130 = vector.shape_cast %129 : vector<32xf32> to vector<32x1xf32>
    %131 = vector.broadcast %130 : vector<32x1xf32> to vector<32x34xf32>
    %132 = arith.subf %128, %131 : vector<32x34xf32>
    %133 = math.exp %132 : vector<32x34xf32>
    %cst_57 = arith.constant dense<0.000000e+00> : vector<32xf32>
    %134 = vector.multi_reduction <add>, %133, %cst_57 [1] : vector<32x34xf32> to vector<32xf32>
    %135 = vector.shape_cast %134 : vector<32xf32> to vector<32x1xf32>
    %136 = vector.broadcast %135 : vector<32x1xf32> to vector<32x34xf32>
    %137 = arith.divf %133, %136 : vector<32x34xf32>
    %138 = vector.extract_strided_slice %71 {offsets = [0, 48], sizes = [34, 16], strides = [1, 1]} : vector<34x64xf32> to vector<34x16xf32>
    %cst_58 = arith.constant dense<0.000000e+00> : vector<32x16xf32>
    %139 = tpu.matmul %137, %138, %cst_58 {dimension_numbers = #tpu.dot_dimension_numbers<[1], [0], [0], [1], [0, 0, 1, 1], [], []>} : vector<32x34xf32>, vector<34x16xf32>, vector<32x16xf32> -> vector<32x16xf32>
    %140 = tpu.concatenate %88, %105, %122, %139 in 1 : vector<32x16xf32>, vector<32x16xf32>, vector<32x16xf32>, vector<32x16xf32> -> vector<32x64xf32>
    %141 = vector.extract_strided_slice %41 {offsets = [0, 192], sizes = [32, 64], strides = [1, 1]} : vector<32x328xf32> to vector<32x64xf32>
    %142 = vector.extract_strided_slice %41 {offsets = [0, 256], sizes = [32, 64], strides = [1, 1]} : vector<32x328xf32> to vector<32x64xf32>
    %cst_59 = arith.constant 0.000000e+00 : f32
    %143 = vector.broadcast %cst_59 : f32 to vector<32x64xf32>
    %144 = arith.subf %143, %141 : vector<32x64xf32>
    %145 = math.exp %144 : vector<32x64xf32>
    %cst_60 = arith.constant 1.000000e+00 : f32
    %146 = vector.broadcast %cst_60 : f32 to vector<32x64xf32>
    %147 = arith.addf %146, %145 : vector<32x64xf32>
    %cst_61 = arith.constant 1.000000e+00 : f32
    %148 = vector.broadcast %cst_61 : f32 to vector<32x64xf32>
    %149 = arith.divf %148, %147 : vector<32x64xf32>
    %150 = arith.mulf %141, %149 : vector<32x64xf32>
    %151 = arith.mulf %150, %142 : vector<32x64xf32>
    %152 = tpu.concatenate %140, %151 in 1 : vector<32x64xf32>, vector<32x64xf32> -> vector<32x128xf32>
    %c0_62 = arith.constant 0 : index
    %c0_63 = arith.constant 0 : index
    %c0_64 = arith.constant 0 : index
    %153 = vector.load %arg4[%c0_62, %c0_63, %c0_64] : memref<2x128x32xbf16, #tpu.memory_space<vmem>>, vector<1x128x32xbf16>
    %154 = vector.shape_cast %153 : vector<1x128x32xbf16> to vector<128x32xbf16>
    %155 = arith.truncf %152 : vector<32x128xf32> to vector<32x128xbf16>
    %cst_65 = arith.constant dense<0.000000e+00> : vector<32x32xf32>
    %156 = tpu.matmul %155, %154, %cst_65 {dimension_numbers = #tpu.dot_dimension_numbers<[1], [0], [0], [1], [0, 0, 1, 1], [], []>} : vector<32x128xbf16>, vector<128x32xbf16>, vector<32x32xf32> -> vector<32x32xf32>
    %c1_66 = arith.constant 1 : index
    %c0_67 = arith.constant 0 : index
    %c0_68 = arith.constant 0 : index
    %157 = vector.load %arg0[%c1_66, %c0_67, %c0_68] : memref<11x32x32xf32, #tpu.memory_space<vmem>>, vector<1x32x32xf32>
    %158 = vector.shape_cast %157 : vector<1x32x32xf32> to vector<32x32xf32>
    %159 = arith.addf %156, %158 : vector<32x32xf32>
    %160 = arith.mulf %16, %159 : vector<32x32xf32>
    %161 = arith.addf %10, %160 : vector<32x32xf32>
    %c6 = arith.constant 6 : index
    %c0_69 = arith.constant 0 : index
    %c0_70 = arith.constant 0 : index
    %162 = vector.load %arg0[%c6, %c0_69, %c0_70] : memref<11x32x32xf32, #tpu.memory_space<vmem>>, vector<1x32x32xf32>
    %163 = vector.shape_cast %162 : vector<1x32x32xf32> to vector<32x32xf32>
    %c7 = arith.constant 7 : index
    %c0_71 = arith.constant 0 : index
    %c0_72 = arith.constant 0 : index
    %164 = vector.load %arg0[%c7, %c0_71, %c0_72] : memref<11x32x32xf32, #tpu.memory_space<vmem>>, vector<1x32x32xf32>
    %165 = vector.shape_cast %164 : vector<1x32x32xf32> to vector<32x32xf32>
    %c8 = arith.constant 8 : index
    %c0_73 = arith.constant 0 : index
    %c0_74 = arith.constant 0 : index
    %166 = vector.load %arg0[%c8, %c0_73, %c0_74] : memref<11x32x32xf32, #tpu.memory_space<vmem>>, vector<1x32x32xf32>
    %167 = vector.shape_cast %166 : vector<1x32x32xf32> to vector<32x32xf32>
    %cst_75 = arith.constant dense<0.000000e+00> : vector<32xf32>
    %168 = vector.multi_reduction <add>, %161, %cst_75 [1] : vector<32x32xf32> to vector<32xf32>
    %169 = vector.shape_cast %168 : vector<32xf32> to vector<32x1xf32>
    %cst_76 = arith.constant 3.200000e+01 : f32
    %170 = vector.broadcast %cst_76 : f32 to vector<32x1xf32>
    %171 = arith.divf %169, %170 : vector<32x1xf32>
    %172 = vector.broadcast %171 : vector<32x1xf32> to vector<32x32xf32>
    %173 = arith.subf %161, %172 : vector<32x32xf32>
    %174 = arith.mulf %173, %173 : vector<32x32xf32>
    %cst_77 = arith.constant dense<0.000000e+00> : vector<32xf32>
    %175 = vector.multi_reduction <add>, %174, %cst_77 [1] : vector<32x32xf32> to vector<32xf32>
    %176 = vector.shape_cast %175 : vector<32xf32> to vector<32x1xf32>
    %cst_78 = arith.constant 3.200000e+01 : f32
    %177 = vector.broadcast %cst_78 : f32 to vector<32x1xf32>
    %178 = arith.divf %176, %177 : vector<32x1xf32>
    %cst_79 = arith.constant 9.99999974E-6 : f32
    %179 = vector.broadcast %cst_79 : f32 to vector<32x1xf32>
    %180 = arith.addf %178, %179 : vector<32x1xf32>
    %181 = math.rsqrt %180 : vector<32x1xf32>
    %182 = vector.broadcast %181 : vector<32x1xf32> to vector<32x32xf32>
    %183 = arith.mulf %173, %182 : vector<32x32xf32>
    %184 = arith.mulf %183, %163 : vector<32x32xf32>
    %185 = arith.addf %184, %165 : vector<32x32xf32>
    %c1_80 = arith.constant 1 : index
    %c0_81 = arith.constant 0 : index
    %c0_82 = arith.constant 0 : index
    %186 = vector.load %arg3[%c1_80, %c0_81, %c0_82] : memref<2x32x328xbf16, #tpu.memory_space<vmem>>, vector<1x32x328xbf16>
    %187 = vector.shape_cast %186 : vector<1x32x328xbf16> to vector<32x328xbf16>
    %188 = arith.truncf %185 : vector<32x32xf32> to vector<32x32xbf16>
    %cst_83 = arith.constant dense<0.000000e+00> : vector<32x328xf32>
    %189 = tpu.matmul %188, %187, %cst_83 {dimension_numbers = #tpu.dot_dimension_numbers<[1], [0], [0], [1], [0, 0, 1, 1], [], []>} : vector<32x32xbf16>, vector<32x328xbf16>, vector<32x328xf32> -> vector<32x328xf32>
    %c1_84 = arith.constant 1 : index
    %c0_85 = arith.constant 0 : index
    %c0_86 = arith.constant 0 : index
    %190 = vector.load %arg2[%c1_84, %c0_85, %c0_86] : memref<2x32x328xf32, #tpu.memory_space<vmem>>, vector<1x32x328xf32>
    %191 = vector.shape_cast %190 : vector<1x32x328xf32> to vector<32x328xf32>
    %192 = arith.addf %189, %191 : vector<32x328xf32>
    %193 = vector.extract_strided_slice %192 {offsets = [0, 320], sizes = [32, 4], strides = [1, 1]} : vector<32x328xf32> to vector<32x4xf32>
    %194 = vector.extract_strided_slice %192 {offsets = [0, 324], sizes = [32, 4], strides = [1, 1]} : vector<32x328xf32> to vector<32x4xf32>
    %cst_87 = arith.constant 0.541324854 : f32
    %195 = vector.broadcast %cst_87 : f32 to vector<32x4xf32>
    %196 = arith.addf %194, %195 : vector<32x4xf32>
    %cst_88 = arith.constant 0.000000e+00 : f32
    %197 = vector.broadcast %cst_88 : f32 to vector<32x4xf32>
    %198 = arith.maximumf %196, %197 : vector<32x4xf32>
    %199 = math.absf %196 : vector<32x4xf32>
    %cst_89 = arith.constant 0.000000e+00 : f32
    %200 = vector.broadcast %cst_89 : f32 to vector<32x4xf32>
    %201 = arith.subf %200, %199 : vector<32x4xf32>
    %202 = math.exp %201 : vector<32x4xf32>
    %cst_90 = arith.constant 1.000000e+00 : f32
    %203 = vector.broadcast %cst_90 : f32 to vector<32x4xf32>
    %204 = arith.addf %203, %202 : vector<32x4xf32>
    %205 = math.log %204 : vector<32x4xf32>
    %206 = arith.addf %198, %205 : vector<32x4xf32>
    %207 = vector.extract_strided_slice %192 {offsets = [0, 0], sizes = [32, 128], strides = [1, 1]} : vector<32x328xf32> to vector<32x128xf32>
    %208 = arith.mulf %207, %1 : vector<32x128xf32>
    %c124_i32_91 = arith.constant 124 : i32
    %209 = tpu.dynamic_rotate %207 by %c124_i32_91 dim 1 : vector<32x128xf32>, i32 -> vector<32x128xf32>
    %210 = arith.mulf %209, %3 : vector<32x128xf32>
    %211 = arith.addf %208, %210 : vector<32x128xf32>
    %c4_i32_92 = arith.constant 4 : i32
    %212 = tpu.dynamic_rotate %207 by %c4_i32_92 dim 1 : vector<32x128xf32>, i32 -> vector<32x128xf32>
    %213 = arith.mulf %212, %5 : vector<32x128xf32>
    %214 = arith.addf %211, %213 : vector<32x128xf32>
    %215 = vector.extract_strided_slice %214 {offsets = [0, 64], sizes = [32, 64], strides = [1, 1]} : vector<32x128xf32> to vector<32x64xf32>
    %c2_93 = arith.constant 2 : index
    %c0_94 = arith.constant 0 : index
    %c0_95 = arith.constant 0 : index
    %216 = vector.load %arg5[%c2_93, %c0_94, %c0_95] : memref<4x2x64xf32, #tpu.memory_space<vmem>>, vector<1x2x64xf32>
    %217 = vector.shape_cast %216 : vector<1x2x64xf32> to vector<2x64xf32>
    %218 = tpu.concatenate %215, %217 in 0 : vector<32x64xf32>, vector<2x64xf32> -> vector<34x64xf32>
    %219 = vector.extract_strided_slice %192 {offsets = [0, 128], sizes = [32, 64], strides = [1, 1]} : vector<32x328xf32> to vector<32x64xf32>
    %c3_96 = arith.constant 3 : index
    %c0_97 = arith.constant 0 : index
    %c0_98 = arith.constant 0 : index
    %220 = vector.load %arg5[%c3_96, %c0_97, %c0_98] : memref<4x2x64xf32, #tpu.memory_space<vmem>>, vector<1x2x64xf32>
    %221 = vector.shape_cast %220 : vector<1x2x64xf32> to vector<2x64xf32>
    %222 = tpu.concatenate %219, %221 in 0 : vector<32x64xf32>, vector<2x64xf32> -> vector<34x64xf32>
    %223 = vector.extract_strided_slice %214 {offsets = [0, 0], sizes = [32, 16], strides = [1, 1]} : vector<32x128xf32> to vector<32x16xf32>
    %224 = vector.extract_strided_slice %218 {offsets = [0, 0], sizes = [34, 16], strides = [1, 1]} : vector<34x64xf32> to vector<34x16xf32>
    %cst_99 = arith.constant dense<0.000000e+00> : vector<32x34xf32>
    %225 = tpu.matmul %223, %224, %cst_99 {dimension_numbers = #tpu.dot_dimension_numbers<[1], [1], [0], [0], [0, 0, 1, 0], [], []>} : vector<32x16xf32>, vector<34x16xf32>, vector<32x34xf32> -> vector<32x34xf32>
    %cst_100 = arith.constant 2.500000e-01 : f32
    %226 = vector.broadcast %cst_100 : f32 to vector<32x34xf32>
    %227 = arith.mulf %225, %226 : vector<32x34xf32>
    %228 = arith.addf %227, %8 : vector<32x34xf32>
    %cst_101 = arith.constant dense<0xFF800000> : vector<32xf32>
    %229 = vector.multi_reduction <maximumf>, %228, %cst_101 [1] : vector<32x34xf32> to vector<32xf32>
    %230 = vector.shape_cast %229 : vector<32xf32> to vector<32x1xf32>
    %231 = vector.broadcast %230 : vector<32x1xf32> to vector<32x34xf32>
    %232 = arith.subf %228, %231 : vector<32x34xf32>
    %233 = math.exp %232 : vector<32x34xf32>
    %cst_102 = arith.constant dense<0.000000e+00> : vector<32xf32>
    %234 = vector.multi_reduction <add>, %233, %cst_102 [1] : vector<32x34xf32> to vector<32xf32>
    %235 = vector.shape_cast %234 : vector<32xf32> to vector<32x1xf32>
    %236 = vector.broadcast %235 : vector<32x1xf32> to vector<32x34xf32>
    %237 = arith.divf %233, %236 : vector<32x34xf32>
    %238 = vector.extract_strided_slice %222 {offsets = [0, 0], sizes = [34, 16], strides = [1, 1]} : vector<34x64xf32> to vector<34x16xf32>
    %cst_103 = arith.constant dense<0.000000e+00> : vector<32x16xf32>
    %239 = tpu.matmul %237, %238, %cst_103 {dimension_numbers = #tpu.dot_dimension_numbers<[1], [0], [0], [1], [0, 0, 1, 1], [], []>} : vector<32x34xf32>, vector<34x16xf32>, vector<32x16xf32> -> vector<32x16xf32>
    %240 = vector.extract_strided_slice %214 {offsets = [0, 16], sizes = [32, 16], strides = [1, 1]} : vector<32x128xf32> to vector<32x16xf32>
    %241 = vector.extract_strided_slice %218 {offsets = [0, 16], sizes = [34, 16], strides = [1, 1]} : vector<34x64xf32> to vector<34x16xf32>
    %cst_104 = arith.constant dense<0.000000e+00> : vector<32x34xf32>
    %242 = tpu.matmul %240, %241, %cst_104 {dimension_numbers = #tpu.dot_dimension_numbers<[1], [1], [0], [0], [0, 0, 1, 0], [], []>} : vector<32x16xf32>, vector<34x16xf32>, vector<32x34xf32> -> vector<32x34xf32>
    %cst_105 = arith.constant 2.500000e-01 : f32
    %243 = vector.broadcast %cst_105 : f32 to vector<32x34xf32>
    %244 = arith.mulf %242, %243 : vector<32x34xf32>
    %245 = arith.addf %244, %8 : vector<32x34xf32>
    %cst_106 = arith.constant dense<0xFF800000> : vector<32xf32>
    %246 = vector.multi_reduction <maximumf>, %245, %cst_106 [1] : vector<32x34xf32> to vector<32xf32>
    %247 = vector.shape_cast %246 : vector<32xf32> to vector<32x1xf32>
    %248 = vector.broadcast %247 : vector<32x1xf32> to vector<32x34xf32>
    %249 = arith.subf %245, %248 : vector<32x34xf32>
    %250 = math.exp %249 : vector<32x34xf32>
    %cst_107 = arith.constant dense<0.000000e+00> : vector<32xf32>
    %251 = vector.multi_reduction <add>, %250, %cst_107 [1] : vector<32x34xf32> to vector<32xf32>
    %252 = vector.shape_cast %251 : vector<32xf32> to vector<32x1xf32>
    %253 = vector.broadcast %252 : vector<32x1xf32> to vector<32x34xf32>
    %254 = arith.divf %250, %253 : vector<32x34xf32>
    %255 = vector.extract_strided_slice %222 {offsets = [0, 16], sizes = [34, 16], strides = [1, 1]} : vector<34x64xf32> to vector<34x16xf32>
    %cst_108 = arith.constant dense<0.000000e+00> : vector<32x16xf32>
    %256 = tpu.matmul %254, %255, %cst_108 {dimension_numbers = #tpu.dot_dimension_numbers<[1], [0], [0], [1], [0, 0, 1, 1], [], []>} : vector<32x34xf32>, vector<34x16xf32>, vector<32x16xf32> -> vector<32x16xf32>
    %257 = vector.extract_strided_slice %214 {offsets = [0, 32], sizes = [32, 16], strides = [1, 1]} : vector<32x128xf32> to vector<32x16xf32>
    %258 = vector.extract_strided_slice %218 {offsets = [0, 32], sizes = [34, 16], strides = [1, 1]} : vector<34x64xf32> to vector<34x16xf32>
    %cst_109 = arith.constant dense<0.000000e+00> : vector<32x34xf32>
    %259 = tpu.matmul %257, %258, %cst_109 {dimension_numbers = #tpu.dot_dimension_numbers<[1], [1], [0], [0], [0, 0, 1, 0], [], []>} : vector<32x16xf32>, vector<34x16xf32>, vector<32x34xf32> -> vector<32x34xf32>
    %cst_110 = arith.constant 2.500000e-01 : f32
    %260 = vector.broadcast %cst_110 : f32 to vector<32x34xf32>
    %261 = arith.mulf %259, %260 : vector<32x34xf32>
    %262 = arith.addf %261, %8 : vector<32x34xf32>
    %cst_111 = arith.constant dense<0xFF800000> : vector<32xf32>
    %263 = vector.multi_reduction <maximumf>, %262, %cst_111 [1] : vector<32x34xf32> to vector<32xf32>
    %264 = vector.shape_cast %263 : vector<32xf32> to vector<32x1xf32>
    %265 = vector.broadcast %264 : vector<32x1xf32> to vector<32x34xf32>
    %266 = arith.subf %262, %265 : vector<32x34xf32>
    %267 = math.exp %266 : vector<32x34xf32>
    %cst_112 = arith.constant dense<0.000000e+00> : vector<32xf32>
    %268 = vector.multi_reduction <add>, %267, %cst_112 [1] : vector<32x34xf32> to vector<32xf32>
    %269 = vector.shape_cast %268 : vector<32xf32> to vector<32x1xf32>
    %270 = vector.broadcast %269 : vector<32x1xf32> to vector<32x34xf32>
    %271 = arith.divf %267, %270 : vector<32x34xf32>
    %272 = vector.extract_strided_slice %222 {offsets = [0, 32], sizes = [34, 16], strides = [1, 1]} : vector<34x64xf32> to vector<34x16xf32>
    %cst_113 = arith.constant dense<0.000000e+00> : vector<32x16xf32>
    %273 = tpu.matmul %271, %272, %cst_113 {dimension_numbers = #tpu.dot_dimension_numbers<[1], [0], [0], [1], [0, 0, 1, 1], [], []>} : vector<32x34xf32>, vector<34x16xf32>, vector<32x16xf32> -> vector<32x16xf32>
    %274 = vector.extract_strided_slice %214 {offsets = [0, 48], sizes = [32, 16], strides = [1, 1]} : vector<32x128xf32> to vector<32x16xf32>
    %275 = vector.extract_strided_slice %218 {offsets = [0, 48], sizes = [34, 16], strides = [1, 1]} : vector<34x64xf32> to vector<34x16xf32>
    %cst_114 = arith.constant dense<0.000000e+00> : vector<32x34xf32>
    %276 = tpu.matmul %274, %275, %cst_114 {dimension_numbers = #tpu.dot_dimension_numbers<[1], [1], [0], [0], [0, 0, 1, 0], [], []>} : vector<32x16xf32>, vector<34x16xf32>, vector<32x34xf32> -> vector<32x34xf32>
    %cst_115 = arith.constant 2.500000e-01 : f32
    %277 = vector.broadcast %cst_115 : f32 to vector<32x34xf32>
    %278 = arith.mulf %276, %277 : vector<32x34xf32>
    %279 = arith.addf %278, %8 : vector<32x34xf32>
    %cst_116 = arith.constant dense<0xFF800000> : vector<32xf32>
    %280 = vector.multi_reduction <maximumf>, %279, %cst_116 [1] : vector<32x34xf32> to vector<32xf32>
    %281 = vector.shape_cast %280 : vector<32xf32> to vector<32x1xf32>
    %282 = vector.broadcast %281 : vector<32x1xf32> to vector<32x34xf32>
    %283 = arith.subf %279, %282 : vector<32x34xf32>
    %284 = math.exp %283 : vector<32x34xf32>
    %cst_117 = arith.constant dense<0.000000e+00> : vector<32xf32>
    %285 = vector.multi_reduction <add>, %284, %cst_117 [1] : vector<32x34xf32> to vector<32xf32>
    %286 = vector.shape_cast %285 : vector<32xf32> to vector<32x1xf32>
    %287 = vector.broadcast %286 : vector<32x1xf32> to vector<32x34xf32>
    %288 = arith.divf %284, %287 : vector<32x34xf32>
    %289 = vector.extract_strided_slice %222 {offsets = [0, 48], sizes = [34, 16], strides = [1, 1]} : vector<34x64xf32> to vector<34x16xf32>
    %cst_118 = arith.constant dense<0.000000e+00> : vector<32x16xf32>
    %290 = tpu.matmul %288, %289, %cst_118 {dimension_numbers = #tpu.dot_dimension_numbers<[1], [0], [0], [1], [0, 0, 1, 1], [], []>} : vector<32x34xf32>, vector<34x16xf32>, vector<32x16xf32> -> vector<32x16xf32>
    %291 = tpu.concatenate %239, %256, %273, %290 in 1 : vector<32x16xf32>, vector<32x16xf32>, vector<32x16xf32>, vector<32x16xf32> -> vector<32x64xf32>
    %292 = vector.extract_strided_slice %192 {offsets = [0, 192], sizes = [32, 64], strides = [1, 1]} : vector<32x328xf32> to vector<32x64xf32>
    %293 = vector.extract_strided_slice %192 {offsets = [0, 256], sizes = [32, 64], strides = [1, 1]} : vector<32x328xf32> to vector<32x64xf32>
    %cst_119 = arith.constant 0.000000e+00 : f32
    %294 = vector.broadcast %cst_119 : f32 to vector<32x64xf32>
    %295 = arith.subf %294, %292 : vector<32x64xf32>
    %296 = math.exp %295 : vector<32x64xf32>
    %cst_120 = arith.constant 1.000000e+00 : f32
    %297 = vector.broadcast %cst_120 : f32 to vector<32x64xf32>
    %298 = arith.addf %297, %296 : vector<32x64xf32>
    %cst_121 = arith.constant 1.000000e+00 : f32
    %299 = vector.broadcast %cst_121 : f32 to vector<32x64xf32>
    %300 = arith.divf %299, %298 : vector<32x64xf32>
    %301 = arith.mulf %292, %300 : vector<32x64xf32>
    %302 = arith.mulf %301, %293 : vector<32x64xf32>
    %303 = tpu.concatenate %291, %302 in 1 : vector<32x64xf32>, vector<32x64xf32> -> vector<32x128xf32>
    %c1_122 = arith.constant 1 : index
    %c0_123 = arith.constant 0 : index
    %c0_124 = arith.constant 0 : index
    %304 = vector.load %arg4[%c1_122, %c0_123, %c0_124] : memref<2x128x32xbf16, #tpu.memory_space<vmem>>, vector<1x128x32xbf16>
    %305 = vector.shape_cast %304 : vector<1x128x32xbf16> to vector<128x32xbf16>
    %306 = arith.truncf %303 : vector<32x128xf32> to vector<32x128xbf16>
    %cst_125 = arith.constant dense<0.000000e+00> : vector<32x32xf32>
    %307 = tpu.matmul %306, %305, %cst_125 {dimension_numbers = #tpu.dot_dimension_numbers<[1], [0], [0], [1], [0, 0, 1, 1], [], []>} : vector<32x128xbf16>, vector<128x32xbf16>, vector<32x32xf32> -> vector<32x32xf32>
    %c2_126 = arith.constant 2 : index
    %c0_127 = arith.constant 0 : index
    %c0_128 = arith.constant 0 : index
    %308 = vector.load %arg0[%c2_126, %c0_127, %c0_128] : memref<11x32x32xf32, #tpu.memory_space<vmem>>, vector<1x32x32xf32>
    %309 = vector.shape_cast %308 : vector<1x32x32xf32> to vector<32x32xf32>
    %310 = arith.addf %307, %309 : vector<32x32xf32>
    %311 = arith.mulf %167, %310 : vector<32x32xf32>
    %312 = arith.addf %161, %311 : vector<32x32xf32>
    %c9 = arith.constant 9 : index
    %c0_129 = arith.constant 0 : index
    %c0_130 = arith.constant 0 : index
    %313 = vector.load %arg0[%c9, %c0_129, %c0_130] : memref<11x32x32xf32, #tpu.memory_space<vmem>>, vector<1x32x32xf32>
    %314 = vector.shape_cast %313 : vector<1x32x32xf32> to vector<32x32xf32>
    %c10 = arith.constant 10 : index
    %c0_131 = arith.constant 0 : index
    %c0_132 = arith.constant 0 : index
    %315 = vector.load %arg0[%c10, %c0_131, %c0_132] : memref<11x32x32xf32, #tpu.memory_space<vmem>>, vector<1x32x32xf32>
    %316 = vector.shape_cast %315 : vector<1x32x32xf32> to vector<32x32xf32>
    %cst_133 = arith.constant dense<0.000000e+00> : vector<32xf32>
    %317 = vector.multi_reduction <add>, %312, %cst_133 [1] : vector<32x32xf32> to vector<32xf32>
    %318 = vector.shape_cast %317 : vector<32xf32> to vector<32x1xf32>
    %cst_134 = arith.constant 3.200000e+01 : f32
    %319 = vector.broadcast %cst_134 : f32 to vector<32x1xf32>
    %320 = arith.divf %318, %319 : vector<32x1xf32>
    %321 = vector.broadcast %320 : vector<32x1xf32> to vector<32x32xf32>
    %322 = arith.subf %312, %321 : vector<32x32xf32>
    %323 = arith.mulf %322, %322 : vector<32x32xf32>
    %cst_135 = arith.constant dense<0.000000e+00> : vector<32xf32>
    %324 = vector.multi_reduction <add>, %323, %cst_135 [1] : vector<32x32xf32> to vector<32xf32>
    %325 = vector.shape_cast %324 : vector<32xf32> to vector<32x1xf32>
    %cst_136 = arith.constant 3.200000e+01 : f32
    %326 = vector.broadcast %cst_136 : f32 to vector<32x1xf32>
    %327 = arith.divf %325, %326 : vector<32x1xf32>
    %cst_137 = arith.constant 9.99999974E-6 : f32
    %328 = vector.broadcast %cst_137 : f32 to vector<32x1xf32>
    %329 = arith.addf %327, %328 : vector<32x1xf32>
    %330 = math.rsqrt %329 : vector<32x1xf32>
    %331 = vector.broadcast %330 : vector<32x1xf32> to vector<32x32xf32>
    %332 = arith.mulf %322, %331 : vector<32x32xf32>
    %333 = arith.mulf %332, %314 : vector<32x32xf32>
    %334 = arith.addf %333, %316 : vector<32x32xf32>
    %c0_138 = arith.constant 0 : index
    %c0_139 = arith.constant 0 : index
    %335 = vector.load %arg6[%c0_138, %c0_139] : memref<32x64xbf16, #tpu.memory_space<vmem>>, vector<32x64xbf16>
    %336 = arith.truncf %334 : vector<32x32xf32> to vector<32x32xbf16>
    %cst_140 = arith.constant dense<0.000000e+00> : vector<32x64xf32>
    %337 = tpu.matmul %336, %335, %cst_140 {dimension_numbers = #tpu.dot_dimension_numbers<[1], [0], [0], [1], [0, 0, 1, 1], [], []>} : vector<32x32xbf16>, vector<32x64xbf16>, vector<32x64xf32> -> vector<32x64xf32>
    %cst_141 = arith.constant dense<0xFF800000> : vector<32xf32>
    %338 = vector.multi_reduction <maximumf>, %337, %cst_141 [1] : vector<32x64xf32> to vector<32xf32>
    %339 = vector.shape_cast %338 : vector<32xf32> to vector<32x1xf32>
    %340 = vector.broadcast %339 : vector<32x1xf32> to vector<32x64xf32>
    %341 = arith.subf %337, %340 : vector<32x64xf32>
    %342 = math.exp %341 : vector<32x64xf32>
    %cst_142 = arith.constant dense<0.000000e+00> : vector<32xf32>
    %343 = vector.multi_reduction <add>, %342, %cst_142 [1] : vector<32x64xf32> to vector<32xf32>
    %344 = vector.shape_cast %343 : vector<32xf32> to vector<32x1xf32>
    %345 = math.log %344 : vector<32x1xf32>
    %346 = arith.addf %339, %345 : vector<32x1xf32>
    %347 = vector.broadcast %346 : vector<32x1xf32> to vector<32x64xf32>
    %348 = arith.subf %337, %347 : vector<32x64xf32>
    %349 = tpu.concatenate %42, %193, %55, %206 in 1 : vector<32x4xf32>, vector<32x4xf32>, vector<32x4xf32>, vector<32x4xf32> -> vector<32x16xf32>
    %cst_143 = arith.constant 0.000000e+00 : f32
    %350 = vector.broadcast %cst_143 : f32 to vector<32x48xf32>
    %351 = tpu.concatenate %348, %349, %350 in 1 : vector<32x64xf32>, vector<32x16xf32>, vector<32x48xf32> -> vector<32x128xf32>
    %c0_144 = arith.constant 0 : index
    %c0_145 = arith.constant 0 : index
    %352 = vector.load %arg7[%c0_144, %c0_145] : memref<32x128xf32, #tpu.memory_space<vmem>>, vector<32x128xf32>
    tpu.vector_store %arg7[%c0_144, %c0_145], %351 {strides = array<i32>} : memref<32x128xf32, #tpu.memory_space<vmem>>, vector<32x128xf32>,
    return
  }
}

</mosaic_0001>

<bundles_post_ra>
// kernel: _lambda_.1
= control target key start
LH: loop header
LB: loop body
LE: loop exit
PB: predicated region body
PF: predicated region fallthrough
CT: control target
= control target key end

     0   :  { %vm65_vm0 = vcmask 261120   ;;  %v5129_v29 = vmov 0   ;;  %s5130_s22 = smov 4   ;;  %s5131_s23 = smov 124   ;;  %vm385_vm1 = vcmask 130048   ;;  %vm497_vm3 = vcmask 277504   ;;  %s6538_s0 = inlined_call_operand.vmem [shape: f32[11,32,32], index: 0, kind: input, shape index: {}]   ;;  %s6539_s3 = inlined_call_operand.vmem [shape: bf16[2,32,328], index: 3, kind: input, shape index: {}]   ;;  %s6540_s2 = inlined_call_operand.vmem [shape: f32[2,32,328], index: 2, kind: input, shape index: {}]   ;;  %s6541_s5 = inlined_call_operand.vmem [shape: f32[4,2,64], index: 5, kind: input, shape index: {}]   ;;  %s6542_s1 = inlined_call_operand.vmem [shape: f32[4,32,128], index: 1, kind: input, shape index: {}]   ;;  %s6543_s4 = inlined_call_operand.vmem [shape: bf16[2,128,32], index: 4, kind: input, shape index: {}]   ;;  %s6544_s6 = inlined_call_operand.vmem [shape: bf16[32,64], index: 6, kind: input, shape index: {}]   ;;  %s6545_s7 = inlined_call_operand.vmem [shape: f32[32,128], index: 7, kind: output, shape index: {}]  }
   0x1   :  { %v46_v0 = vld [vmem:[%s6538_s0] sm:$0xff]  ;;  %v48_v1 = vld [vmem:[%s6538_s0 + $0x10] sm:$0xff]  ;;  %v47_v2 = vld [vmem:[%s6538_s0 + $0x8] sm:$0xff]  ;;  %219 = vmatprep.mubr.bf16.mxu0 %v5129_v29  ;;  %s5132_s11 = smov 64   ;;  %vm554_vm4 = vcmask 1041408   ;;  %s5133_s28 = smov 48  }
   0x2   :  { %v66_v3 = vsel %vm65_vm0, %v46_v0, 0.0  ;;  %v72_v4 = vsel %vm65_vm0, %v48_v1, 0.0  ;;  %v49_v5 = vld [vmem:[%s6538_s0 + $0x18] sm:$0xff]  ;;  %v69_v6 = vsel %vm65_vm0, %v47_v2, 0.0  ;;  %v4843_v28 = vld [vmem:[%s6539_s3 + $0x4] ss:$12 sps:$4 sm:$0xff]   ;;  %vm5382_vm2 = vmpackc.low %vm385_vm1, %vm385_vm1 }
   0x3   :  { %67 = vadd.xlane.f32.xlu0 %v66_v3  ;;  %73 = vadd.xlane.f32.xlu1 %v72_v4  ;;  %v75_v7 = vsel %vm65_vm0, %v49_v5, 0.0  ;;  %v4845_v30 = vld [vmem:[%s6539_s3] ss:$12 sps:$4 sm:$0xff]   ;;  %v4846_v31 = vld [vmem:[%s6539_s3 + $0x1c] ss:$12 sps:$4 sm:$0xff]   ;;  %v3742_v57 = vld [vmem:[%s6538_s0 + $0x70] sm:$0xff] }
   0x4   :  { %187 = vmatprep.subr.bf16.mxu0 %v4843_v28  ;;  %v4848_v32 = vld [vmem:[%s6539_s3 + $0x8] ss:$12 sps:$4 sm:$0xff]   ;;  %v4849_v33 = vld [vmem:[%s6539_s3 + $0x18] ss:$12 sps:$4 sm:$0xff]   ;;  %v4850_v34 = vld [vmem:[%s6539_s3 + $0x20] ss:$12 sps:$4 sm:$0xff]  }
   0x5   :  { %188 = vmatpush1.bf16.msra.mxu0 %v4845_v30  ;;  %4147 = vmatprep.subr.bf16.mxu1 %v4848_v32  ;;  %v3740_v49 = vld [vmem:[%s6538_s0 + $0x60] sm:$0xff]  ;;  %v3741_v51 = vld [vmem:[%s6538_s0 + $0x68] sm:$0xff]  ;;  %v3743_v61 = vld [vmem:[%s6538_s0 + $0x78] sm:$0xff]  ;;  %s5134_s29 = smov 112   ;;  %s5135_s30 = smov 32   ;;  %vm1561_vm5 = vcmask 392192  }
   0x6   :  { %189 = vmatprep.subr.bf16.mxu0 %v4846_v31  ;;  %4148 = vmatpush3.bf16.msra.mxu1 %v4848_v32  ;;  %v3744_v55 = vld [vmem:[%s6538_s0 + $0x80] sm:$0xff]  ;;  %v3745_v56 = vld [vmem:[%s6538_s0 + $0x88] sm:$0xff]  ;;  %v3747_v3 = vld [vmem:[%s6538_s0 + $0x98] sm:$0xff]  ;;  %s5136_s8 = smov 96   ;;  %s5137_s9 = smov 16   ;;  %vm1614_vm6 = vcmask 523264  }
   0x7   :  { %70 = vadd.xlane.f32.xlu0 %v69_v6  ;;  %76 = vadd.xlane.f32.xlu1 %v75_v7  ;;  %v146_v32 = vld [vmem:[%s6540_s2 + $0x48] sm:$0xff]  ;;  %s5138_s10 = smov 80   ;;  %vm3680_vm7 = vcmask 31744   ;;  %vm3685_vm8 = vcmask 64512   ;;  %vm3690_vm9 = vcmask 97280   ;;  %vm3715_vm10 = vcmask 654336  }
   0x8   :  { %4149 = vmatprep.subr.bf16.mxu1 %v4850_v34 }
   0x9   :  { %190 = vmatpush1.bf16.msra.mxu0 %v4849_v33 }
   0xa   :  { %4150 = vmatpush3.bf16.msra.mxu1 %v4850_v34  ;;  %v147_v34 = vld [vmem:[%s6540_s2 + $0x50] sm:$0xff] }
  0x90   :  { %v68_v8 = vpop.xlane.xlu0 %67  ;;  %v74_v9 = vpop.xlane.xlu1 %73 }
  0x91   :  { %v79_v10 = vmul.f32 0.03125, %v68_v8  ;;  %v81_v11 = vmul.f32 0.03125, %v74_v9  ;;  %v137_v9 = vld [vmem:[%s6540_s2] sm:$0xff] }
  0x93   :  { %v83_v12 = vsub.f32 %v46_v0, %v79_v10  ;;  %v5197_v13 = vsub.f32 %v48_v1, %v81_v11 }
  0x94   :  { %v71_v14 = vpop.xlane.xlu0 %70  ;;  %v77_v15 = vpop.xlane.xlu1 %76 }
  0x95   :  { %v80_v16 = vmul.f32 0.03125, %v71_v14  ;;  %v82_v17 = vmul.f32 0.03125, %v77_v15  ;;  %v87_v18 = vmul.f32 %v83_v12, %v83_v12  ;;  %v89_v19 = vmul.f32 %v5197_v13, %v5197_v13  ;;  %v141_v14 = vld [vmem:[%s6540_s2 + $0x20] sm:$0xff]  ;;  %v140_v15 = vld [vmem:[%s6540_s2 + $0x18] sm:$0xff] }
  0x97   :  { %v84_v20 = vsub.f32 %v47_v2, %v80_v16  ;;  %v86_v21 = vsub.f32 %v49_v5, %v82_v17  ;;  %v91_v22 = vsel %vm65_vm0, %v87_v18, 0.0  ;;  %v97_v23 = vsel %vm65_vm0, %v89_v19, 0.0  ;;  %v3746_v2 = vld [vmem:[%s6538_s0 + $0x90] sm:$0xff] }
  0x98   :  { %92 = vadd.xlane.f32.xlu0 %v91_v22 }
  0x99   :  { %v88_v24 = vmul.f32 %v84_v20, %v84_v20  ;;  %v90_v25 = vmul.f32 %v86_v21, %v86_v21 }
  0x9b   :  { %v94_v26 = vsel %vm65_vm0, %v88_v24, 0.0  ;;  %v100_v27 = vsel %vm65_vm0, %v90_v25, 0.0  ;;  %v143_v24 = vld [vmem:[%s6540_s2 + $0x30] sm:$0xff] }
  0x9c   :  { %98 = vadd.xlane.f32.xlu0 %v97_v23  ;;  %95 = vadd.xlane.f32.xlu1 %v94_v26 }
  0xa0   :  { %101 = vadd.xlane.f32.xlu1 %v100_v27 }
 0x125   :  { %v93_v35 = vpop.xlane.xlu0 %92 }
 0x126   :  { %v103_v36 = vmul.f32 0.03125, %v93_v35  ;;  %v144_v35 = vld [vmem:[%s6540_s2 + $0x38] sm:$0xff] }
 0x128   :  { %v107_v37 = vadd.f32 1e-05, %v103_v36 }
 0x129   :  { %v96_v38 = vpop.xlane.xlu1 %95  ;;  %v99_v39 = vpop.xlane.xlu0 %98 }
 0x12a   :  { %4877 = vrsqrt.f32 %v107_v37  ;;  %v104_v40 = vmul.f32 0.03125, %v96_v38  ;;  %v105_v41 = vmul.f32 0.03125, %v99_v39 }
 0x12c   :  { %v108_v42 = vadd.f32 1e-05, %v104_v40  ;;  %v109_v43 = vadd.f32 1e-05, %v105_v41  ;;  %v365_v41 = vld [vmem:[%s6541_s5] sm:$0x3] }
 0x12d   :  { %v102_v44 = vpop.xlane.xlu1 %101 }
 0x12e   :  { %4879 = vrsqrt.f32 %v108_v42  ;;  %v106_v45 = vmul.f32 0.03125, %v102_v44  ;;  %v3728_v44 = vld [vmem:[%s6542_s1 + $0x20] sm:$0xff] }
 0x12f   :  { %4881 = vrsqrt.f32 %v109_v43  ;;  %v27_v43 = vld [vmem:[%s6542_s1] sm:$0xff] }
 0x130   :  { %v110_v46 = vadd.f32 1e-05, %v106_v45  ;;  %v3732_v45 = vld [vmem:[%s6542_s1 + $0x40] sm:$0xff] }
 0x132   :  { %4883 = vrsqrt.f32 %v110_v46 }
 0x134   :  { %v4878_v47 = vpop.eup %4877 }
 0x135   :  { %v115_v48 = vmul.f32 %v4878_v47, %v83_v12  ;;  %v138_v12 = vld [vmem:[%s6540_s2 + $0x8] sm:$0xff] }
 0x137   :  { %v119_v54 = vmul.f32 %v3740_v49, %v115_v48 }
 0x138   :  { %v4880_v50 = vpop.eup %4879 }
 0x139   :  { %v4882_v52 = vpop.eup %4881  ;;  %v116_v53 = vmul.f32 %v4880_v50, %v84_v20  ;;  %v123_v62 = vadd.f32 %v3744_v55, %v119_v54  ;;  %v3729_v50 = vld [vmem:[%s6542_s1 + $0x28] sm:$0xff] }
 0x13a   :  { %v117_v58 = vmul.f32 %v4882_v52, %v5197_v13 }
 0x13b   :  { %v120_v59 = vmul.f32 %v3741_v51, %v116_v53  ;;  %v28_v53 = vld [vmem:[%s6542_s1 + $0x8] sm:$0xff] }
 0x13c   :  { %v4884_v60 = vpop.eup %4883  ;;  %v121_v1 = vmul.f32 %v3742_v57, %v117_v58  ;;  %v3733_v57 = vld [vmem:[%s6542_s1 + $0x48] sm:$0xff] }
 0x13d   :  { %v124_v63 = vadd.f32 %v3745_v56, %v120_v59  ;;  %v118_v0 = vmul.f32 %v4884_v60, %v86_v21 }
 0x13e   :  { %v125_v6 = vadd.f32 %v3746_v2, %v121_v1  ;;  %v29_v2 = vld [vmem:[%s6542_s1 + $0x10] sm:$0xff] }
 0x13f   :  { %v135_v4 = vpack.c.bf16 %v124_v63, %v123_v62  ;;  %v122_v5 = vmul.f32 %v3743_v61, %v118_v0  ;;  %v3730_v63 = vld [vmem:[%s6542_s1 + $0x30] sm:$0xff]  ;;  %v3731_v0 = vld [vmem:[%s6542_s1 + $0x38] sm:$0xff] }
 0x141   :  { %3758 = vmatmul.mubr.msk.bf16.vlgmr.msra.gmra.mrb[0].mxu0 %vm65_vm0, %v135_v4  ;;  %4151 = vmatprep.mubr.msk.bf16.mxu1 %vm65_vm0, %v135_v4  ;;  %v126_v7 = vadd.f32 %v3747_v3, %v122_v5  ;;  %v30_v3 = vld [vmem:[%s6542_s1 + $0x18] sm:$0xff]  ;;  %v3734_v5 = vld [vmem:[%s6542_s1 + $0x50] sm:$0xff] }
 0x142   :  { %229 = vmatprep.mubr.bf16.mxu0 %v5129_v29 }
 0x143   :  { %v136_v8 = vpack.c.bf16 %v126_v7, %v125_v6 }
 0x145   :  { %4152 = vmatmul.mubr.msk.bf16.vlgmr.msra.gmra.mrb[0].mxu1 %vm65_vm0, %v136_v8 }
 0x149   :  { %3759 = vmatmul.mubr.msk.bf16.gmra.mrb[4].mxu0 %vm65_vm0, %v136_v8 }
 0x214   :  { %v221_v10 = vpop.f32.mrb[0].mxu0 }
 0x215   :  { %v222_v11 = vadd.f32 %v221_v10, %v137_v9  ;;  %v223_v13 = vpop.f32.mrb[1].mxu0  ;;  %v3735_v10 = vld [vmem:[%s6542_s1 + $0x58] sm:$0xff] }
 0x216   :  { %v225_v16 = vpop.f32.mrb[2].mxu0  ;;  %v5268_v18 = vadd.f32 %v223_v13, %v138_v12 }
 0x217   :  { %v227_v17 = vpop.f32.mrb[3].mxu0  ;;  %349 = vrot.lane.b32.xlu1 %v222_v11, %s5130_s22  ;;  %333 = vrot.lane.b32.xlu0 %v222_v11, %s5131_s23  ;;  %v226_v21 = vadd.f32 %v225_v16, %v140_v15  ;;  %v329_v48 = vmul.f32 %v222_v11, %v27_v43 }
 0x218   :  { %v5270_v19 = vadd.f32 %v227_v17, %v141_v14  ;;  %v5272_v20 = vpop.f32.mrb[0].mxu1 }
 0x219   :  { %v5274_v22 = vpop.f32.mrb[1].mxu1  ;;  %v330_v58 = vmul.f32 %v226_v21, %v28_v53 }
 0x21a   :  { %v5276_v23 = vpop.f32.mrb[2].mxu1  ;;  %v4479_v25 = vpack.c.bf16 %v5270_v19, %v5268_v18  ;;  %v5288_v27 = vpack.i.bf16 %v5270_v19, %v5268_v18 }
 0x21b   :  { %335 = vrot.lane.b32.xlu1 %v226_v21, %s5131_s23  ;;  %v5284_v26 = vpop.f32.mrb[3].mxu1 }
 0x21c   :  { %v231_v28 = vpop.f32.mrb[4].mxu0  ;;  %4480 = vmatprep.subr.bf16.mxu1 %v4479_v25 }
 0x21d   :  { %v232_v30 = vadd.f32 %v231_v28, %v143_v24  ;;  %v233_v31 = vpop.f32.mrb[5].mxu0  ;;  %4482 = vmatpush3.bf16.msra.mxu1 %v4479_v25 }
 0x21e   :  { %v235_v33 = vpop.f32.mrb[6].mxu0  ;;  %v5303_v39 = vadd.f32 %v233_v31, %v144_v35 }
 0x21f   :  { %351 = vrot.lane.b32.xlu1 %v226_v21, %s5130_s22  ;;  %v237_v36 = vpop.f32.mrb[7].mxu0  ;;  %337 = vrot.lane.b32.xlu0 %v232_v30, %s5131_s23  ;;  %v236_v37 = vadd.f32 %v235_v33, %v146_v32  ;;  %v331_v11 = vmul.f32 %v232_v30, %v29_v2 }
 0x220   :  { %v5301_v38 = vadd.f32 %v237_v36, %v147_v34 }
 0x221   :  { %v332_v12 = vmul.f32 %v236_v37, %v30_v3 }
 0x222   :  { %v4483_v40 = vpack.c.bf16 %v5301_v38, %v5303_v39  ;;  %v5314_v42 = vpack.i.bf16 %v5301_v38, %v5303_v39 }
 0x223   :  { %339 = vrot.lane.b32.xlu1 %v236_v37, %s5131_s23  ;;  %353 = vrot.lane.b32.xlu0 %v232_v30, %s5130_s22 }
 0x224   :  { %4484 = vmatprep.subr.bf16.mxu1 %v4483_v40 }
 0x225   :  { %4486 = vmatpush3.bf16.msra.mxu1 %v4483_v40 }
 0x227   :  { %355 = vrot.lane.b32.xlu1 %v236_v37, %s5130_s22  ;;  %367 = vrot.lane.b32.xlu0 %v365_v41, %s5132_s11 }
 0x289   :  { %v350_v46 = vpop.permute.xlu1 %349  ;;  %v334_v47 = vpop.permute.xlu0 %333 }
 0x28a   :  { %v341_v49 = vmul.f32 %v3728_v44, %v334_v47  ;;  %v357_v51 = vmul.f32 %v3732_v45, %v350_v46  ;;  %v5405_v44 = vld [vmem:[%s6542_s1 + $0x68] sm:$0xff]  ;;  %v5410_v47 = vld [vmem:[%s6542_s1 + $0x60] sm:$0xff] }
 0x28c   :  { %v345_v52 = vadd.f32 %v341_v49, %v329_v48 }
 0x28d   :  { %v336_v54 = vpop.permute.xlu1 %335 }
 0x28e   :  { %v5333_v55 = vadd.f32 %v357_v51, %v345_v52  ;;  %v342_v56 = vmul.f32 %v3729_v50, %v336_v54  ;;  %v5418_v54 = vld [vmem:[%s6542_s1 + $0x70] sm:$0xff] }
 0x290   :  { %4165 = vmatprep.mubr.msk.f32.mxu0 %vm385_vm1, %v5333_v55  ;;  %v346_v61 = vadd.f32 %v342_v56, %v330_v58 }
 0x291   :  { %v352_v59 = vpop.permute.xlu1 %351  ;;  %v338_v60 = vpop.permute.xlu0 %337 }
 0x292   :  { %v358_v62 = vmul.f32 %v3733_v57, %v352_v59  ;;  %v343_v7 = vmul.f32 %v3730_v63, %v338_v60  ;;  %v5424_v59 = vld [vmem:[%s6542_s1 + $0x78] sm:$0xff] }
 0x294   :  { %v5346_v1 = vadd.f32 %v358_v62, %v346_v61  ;;  %v347_v15 = vadd.f32 %v343_v7, %v331_v11 }
 0x295   :  { %v340_v4 = vpop.permute.xlu1 %339  ;;  %v354_v6 = vpop.permute.xlu0 %353 }
 0x296   :  { %v344_v8 = vmul.f32 %v3731_v0, %v340_v4  ;;  %v5359_v9 = vpack.i.bf16 %v5346_v1, %v5333_v55  ;;  %v359_v13 = vmul.f32 %v3734_v5, %v354_v6 }
 0x298   :  { %4644 = vrot.lane.b32.xlu1 %v5359_v9, %s5132_s11  ;;  %v348_v16 = vadd.f32 %v344_v8, %v332_v12  ;;  %v5368_v24 = vadd.f32 %v359_v13, %v347_v15 }
 0x299   :  { %v356_v14 = vpop.permute.xlu1 %355  ;;  %v5366_v21 = vpop.permute.xlu0 %367 }
 0x29a   :  { %v360_v17 = vmul.f32 %v3735_v10, %v356_v14 }
 0x29c   :  { %v5370_v25 = vadd.f32 %v360_v17, %v348_v16  ;;  %383 = vrot.lane.b32.xlu1 %v5366_v21, %s5132_s11 }
 0x29e   :  { %v5376_v28 = vpack.i.bf16 %v5370_v25, %v5368_v24 }
 0x2a0   :  { %4649 = vrot.lane.b32.xlu0 %v5376_v28, %s5132_s11 }
 0x30a   :  { %v4645_v30 = vpop.permute.xlu1 %4644 }
 0x30b   :  { %v4647_v31 = vunpack.i.h.bf16 %v4645_v30  ;;  %v4646_v32 = vunpack.i.l.bf16 %v4645_v30 }
 0x30d   :  { %v4467_v34 = vpack.c.bf16 %v4647_v31, %v4646_v32 }
 0x30e   :  { %v384_v41 = vpop.permute.xlu1 %383 }
 0x30f   :  { %4469 = vmatprep.subr.msk.bf16.mxu0 %vm5382_vm2, %v4467_v34 }
 0x310   :  { %4472 = vmatpush3.bf16.xpose.msk.msra.mxu0 %vm5382_vm2, %v4467_v34 }
 0x312   :  { %v4650_v35 = vpop.permute.xlu0 %4649 }
 0x313   :  { %v4652_v36 = vunpack.i.h.bf16 %v4650_v35  ;;  %v4651_v37 = vunpack.i.l.bf16 %v4650_v35  ;;  %v5437_v35 = vld [vmem:[%s6541_s5 + $0x2] sm:$0x3] }
 0x314   :  { %4179 = vmatprep.subr.msk.mxu1 %vm554_vm4, %v5437_v35 }
 0x315   :  { %v4473_v40 = vpack.c.bf16 %v4652_v36, %v4651_v37  ;;  %4180 = vmatpush3.msk.msra.mxu1 %vm554_vm4, %v5437_v35 }
 0x317   :  { %4475 = vmatprep.subr.msk.bf16.mxu0 %vm5382_vm2, %v4473_v40 }
 0x318   :  { %4478 = vmatpush3.bf16.xpose.msk.msra.mxu0 %vm5382_vm2, %v4473_v40 }
 0x319   :  { %4163 = vmatprep.subr.msk.mxu0 %vm385_vm1, %v384_v41 }
 0x320   :  { %4164 = vmatpush3.xpose.msk.msra.mxu0 %vm385_vm1, %v384_v41 }
 0x323   :  { %4166 = vmatmul.mubr.msk.f32.vlgmr.msra.gmra.mrb[8].mxu0 %vm385_vm1, %v5346_v1 }
 0x324   :  { %4168 = vmatprep.mubr.msk.f32.mxu0 %vm385_vm1, %v5368_v24 }
 0x327   :  { %4169 = vmatmul.mubr.msk.f32.gmra.mrb[10].mxu0 %vm385_vm1, %v5370_v25 }
 0x3f6   :  { %v4167_v43 = vpop.f32.mrb[8].mxu0 }
 0x3f7   :  { %v490_v45 = vmul.f32 0.25, %v4167_v43  ;;  %v470_v46 = vpop.f32.mrb[9].mxu0 }
 0x3f8   :  { %v489_v48 = vmul.f32 0.25, %v470_v46 }
 0x3f9   :  { %v494_v49 = vadd.f32 %v5405_v44, %v490_v45 }
 0x3fa   :  { %v4170_v50 = vpop.f32.mrb[10].mxu0  ;;  %v493_v51 = vadd.f32 %v5410_v47, %v489_v48 }
 0x3fb   :  { %v480_v52 = vpop.f32.mrb[11].mxu0  ;;  %v501_v53 = vsel %vm497_vm3, %v494_v49, -inf  ;;  %v492_v56 = vmul.f32 0.25, %v4170_v50 }
 0x3fc   :  { %v491_v57 = vmul.f32 0.25, %v480_v52  ;;  %502 = vmax.xlane.f32.xlu1 %v501_v53  ;;  %v498_v58 = vsel %vm497_vm3, %v493_v51, -inf }
 0x3fd   :  { %499 = vmax.xlane.f32.xlu0 %v498_v58  ;;  %v496_v62 = vadd.f32 %v5424_v59, %v492_v56 }
 0x3fe   :  { %v495_v60 = vadd.f32 %v5418_v54, %v491_v57 }
 0x3ff   :  { %v507_v63 = vsel %vm497_vm3, %v496_v62, -inf }
 0x400   :  { %v504_v61 = vsel %vm497_vm3, %v495_v60, -inf }
 0x401   :  { %505 = vmax.xlane.f32.xlu0 %v504_v61 }
 0x405   :  { %508 = vmax.xlane.f32.xlu0 %v507_v63 }
 0x489   :  { %v503_v0 = vpop.xlane.xlu1 %502 }
 0x48a   :  { %v511_v2 = vsub.f32 %v494_v49, %v503_v0  ;;  %v500_v3 = vpop.xlane.xlu0 %499 }
 0x48b   :  { %v510_v4 = vsub.f32 %v493_v51, %v500_v3 }
 0x48c   :  { %v516_v5 = vmul.f32 1.442695, %v511_v2 }
 0x48d   :  { %v514_v6 = vmul.f32 1.442695, %v510_v4 }
 0x48e   :  { %4885 = vpow2.f32 %v516_v5  ;;  %v506_v7 = vpop.xlane.xlu0 %505 }
 0x48f   :  { %4887 = vpow2.f32 %v514_v6  ;;  %v512_v8 = vsub.f32 %v495_v60, %v506_v7 }
 0x491   :  { %v518_v10 = vmul.f32 1.442695, %v512_v8 }
 0x492   :  { %v509_v11 = vpop.xlane.xlu0 %508 }
 0x493   :  { %4889 = vpow2.f32 %v518_v10  ;;  %v513_v12 = vsub.f32 %v496_v62, %v509_v11 }
 0x495   :  { %v520_v13 = vmul.f32 1.442695, %v513_v12 }
 0x497   :  { %4891 = vpow2.f32 %v520_v13 }
 0x498   :  { %v4886_v14 = vpop.eup %4885 }
 0x499   :  { %v4888_v15 = vpop.eup %4887  ;;  %v525_v16 = vsel %vm497_vm3, %v4886_v14, 0.0 }
 0x49a   :  { %526 = vadd.xlane.f32.xlu1 %v525_v16  ;;  %v522_v17 = vsel %vm497_vm3, %v4888_v15, 0.0 }
 0x49b   :  { %523 = vadd.xlane.f32.xlu0 %v522_v17 }
 0x49d   :  { %v4890_v30 = vpop.eup %4889 }
 0x49e   :  { %v528_v31 = vsel %vm497_vm3, %v4890_v30, 0.0 }
 0x49f   :  { %529 = vadd.xlane.f32.xlu0 %v528_v31 }
 0x4a1   :  { %v4892_v32 = vpop.eup %4891 }
 0x4a2   :  { %v531_v34 = vsel %vm497_vm3, %v4892_v32, 0.0 }
 0x4a3   :  { %532 = vadd.xlane.f32.xlu1 %v531_v34 }
 0x4b4   :  { %4659 = vrot.lane.b32.xlu1 %v5376_v28, %s5133_s28 }
 0x4b5   :  { %4654 = vrot.lane.b32.xlu0 %v5359_v9, %s5133_s28 }
 0x4b8   :  { %659 = vrot.lane.b32.xlu1 %v5366_v21, %s5133_s28 }
 0x4b9   :  { %645 = vrot.lane.b32.xlu0 %v5346_v1, %s5134_s29 }
 0x4bc   :  { %643 = vrot.lane.b32.xlu1 %v5333_v55, %s5134_s29 }
 0x4bd   :  { %649 = vrot.lane.b32.xlu0 %v5370_v25, %s5134_s29 }
 0x4c0   :  { %647 = vrot.lane.b32.xlu1 %v5368_v24, %s5134_s29 }
 0x4c4   :  { %4664 = vrot.lane.b32.xlu1 %v5288_v27, %s5134_s29 }
 0x527   :  { %v527_v36 = vpop.xlane.xlu1 %526 }
 0x528   :  { %4893 = vrcp.f32 %v527_v36  ;;  %v524_v37 = vpop.xlane.xlu0 %523 }
 0x529   :  { %4895 = vrcp.f32 %v524_v37 }
 0x52c   :  { %v530_v40 = vpop.xlane.xlu0 %529 }
 0x52d   :  { %4897 = vrcp.f32 %v530_v40 }
 0x530   :  { %v533_v41 = vpop.xlane.xlu1 %532  ;;  %v4655_v43 = vpop.permute.xlu0 %4654 }
 0x531   :  { %4899 = vrcp.f32 %v533_v41  ;;  %v4657_v45 = vunpack.i.h.bf16 %v4655_v43  ;;  %v4656_v46 = vunpack.i.l.bf16 %v4655_v43 }
 0x532   :  { %v4894_v48 = vpop.eup %4893 }
 0x533   :  { %v4896_v49 = vpop.eup %4895  ;;  %v4487_v50 = vpack.c.bf16 %v4657_v45, %v4656_v46  ;;  %v537_v57 = vmul.f32 %v4894_v48, %v4886_v14 }
 0x534   :  { %v4660_v51 = vpop.permute.xlu1 %4659  ;;  %v535_v52 = vmul.f32 %v4896_v49, %v4888_v15  ;;  %v646_v8 = vpop.permute.xlu0 %645 }
 0x535   :  { %v4662_v53 = vunpack.i.h.bf16 %v4660_v51  ;;  %v4661_v56 = vunpack.i.l.bf16 %v4660_v51  ;;  %4489 = vmatprep.subr.msk.bf16.mxu1 %vm5382_vm2, %v4487_v50 }
 0x536   :  { %4181 = vmatprep.mubr.msk.f32.mxu1 %vm497_vm3, %v535_v52 }
 0x537   :  { %v4898_v58 = vpop.eup %4897  ;;  %v4493_v60 = vpack.c.bf16 %v4662_v53, %v4661_v56  ;;  %4182 = vmatmul.mubr.msk.f32.vlgmr.msra.gmra.mrb[4].mxu1 %vm497_vm3, %v537_v57 }
 0x538   :  { %4492 = vmatpush3.bf16.xpose.msk.msra.mxu1 %vm5382_vm2, %v4487_v50  ;;  %v660_v61 = vpop.permute.xlu1 %659  ;;  %v539_v62 = vmul.f32 %v4898_v58, %v4890_v30  ;;  %v650_v10 = vpop.permute.xlu0 %649 }
 0x539   :  { %4495 = vmatprep.subr.msk.bf16.mxu1 %vm5382_vm2, %v4493_v60 }
 0x53a   :  { %4184 = vmatprep.mubr.msk.f32.mxu1 %vm497_vm3, %v539_v62 }
 0x53b   :  { %v4900_v63 = vpop.eup %4899 }
 0x53c   :  { %v644_v0 = vpop.permute.xlu1 %643  ;;  %v541_v2 = vmul.f32 %v4900_v63, %v4892_v32 }
 0x53e   :  { %4185 = vmatmul.mubr.msk.f32.gmra.mrb[6].mxu1 %vm497_vm3, %v541_v2 }
 0x53f   :  { %4197 = vmatprep.mubr.msk.f32.mxu1 %vm385_vm1, %v644_v0 }
 0x540   :  { %4498 = vmatpush3.bf16.xpose.msk.msra.mxu1 %vm5382_vm2, %v4493_v60  ;;  %v648_v3 = vpop.permute.xlu1 %647 }
 0x541   :  { %4195 = vmatprep.subr.msk.mxu1 %vm385_vm1, %v660_v61 }
 0x544   :  { %v4665_v4 = vpop.permute.xlu1 %4664 }
 0x545   :  { %v4667_v5 = vunpack.i.h.bf16 %v4665_v4  ;;  %v4666_v6 = vunpack.i.l.bf16 %v4665_v4 }
 0x547   :  { %v4499_v7 = vpack.c.bf16 %v4667_v5, %v4666_v6 }
 0x548   :  { %4196 = vmatpush3.xpose.msk.msra.mxu1 %vm385_vm1, %v660_v61 }
 0x549   :  { %4500 = vmatprep.subr.bf16.mxu0 %v4499_v7 }
 0x54a   :  { %4502 = vmatpush3.bf16.msra.mxu0 %v4499_v7 }
 0x54b   :  { %4198 = vmatmul.mubr.msk.f32.vlgmr.msra.gmra.mrb[8].mxu1 %vm385_vm1, %v646_v8 }
 0x54c   :  { %4200 = vmatprep.mubr.msk.f32.mxu1 %vm385_vm1, %v648_v3 }
 0x54f   :  { %4201 = vmatmul.mubr.msk.f32.gmra.mrb[10].mxu1 %vm385_vm1, %v650_v10 }
 0x60a   :  { %v5477_v11 = vpop.f32.mrb[4].mxu1 }
 0x60b   :  { %v5479_v12 = vpop.f32.mrb[5].mxu1 }
 0x611   :  { %v5481_v13 = vpop.f32.mrb[6].mxu1 }
 0x612   :  { %v5483_v14 = vpop.f32.mrb[7].mxu1 }
 0x61e   :  { %v4199_v15 = vpop.f32.mrb[8].mxu1 }
 0x61f   :  { %v765_v16 = vmul.f32 0.25, %v4199_v15  ;;  %v745_v17 = vpop.f32.mrb[9].mxu1 }
 0x620   :  { %v764_v30 = vmul.f32 0.25, %v745_v17 }
 0x621   :  { %v769_v31 = vadd.f32 %v5405_v44, %v765_v16 }
 0x622   :  { %v4202_v32 = vpop.f32.mrb[10].mxu1  ;;  %v768_v34 = vadd.f32 %v5410_v47, %v764_v30 }
 0x623   :  { %v767_v36 = vmul.f32 0.25, %v4202_v32  ;;  %v755_v37 = vpop.f32.mrb[11].mxu1  ;;  %v775_v40 = vsel %vm497_vm3, %v769_v31, -inf }
 0x624   :  { %v766_v41 = vmul.f32 0.25, %v755_v37  ;;  %776 = vmax.xlane.f32.xlu0 %v775_v40  ;;  %v772_v43 = vsel %vm497_vm3, %v768_v34, -inf }
 0x625   :  { %773 = vmax.xlane.f32.xlu1 %v772_v43  ;;  %v771_v45 = vadd.f32 %v5424_v59, %v767_v36 }
 0x626   :  { %v770_v48 = vadd.f32 %v5418_v54, %v766_v41 }
 0x627   :  { %v781_v46 = vsel %vm497_vm3, %v771_v45, -inf }
 0x628   :  { %782 = vmax.xlane.f32.xlu0 %v781_v46  ;;  %v778_v49 = vsel %vm497_vm3, %v770_v48, -inf }
 0x62c   :  { %779 = vmax.xlane.f32.xlu0 %v778_v49 }
 0x636   :  { %828 = vrot.lane.b32.xlu1 %v5437_v35, %s5134_s29 }
 0x63a   :  { %4679 = vrot.lane.b32.xlu1 %v5376_v28, %s5135_s30 }
 0x642   :  { %4669 = vrot.lane.b32.xlu0 %v5314_v42, %s5134_s29 }
 0x6b1   :  { %v777_v50 = vpop.xlane.xlu0 %776 }
 0x6b2   :  { %v785_v51 = vsub.f32 %v769_v31, %v777_v50  ;;  %v774_v52 = vpop.xlane.xlu1 %773 }
 0x6b3   :  { %v784_v53 = vsub.f32 %v768_v34, %v774_v52 }
 0x6b4   :  { %v790_v56 = vmul.f32 1.442695, %v785_v51 }
 0x6b5   :  { %v788_v57 = vmul.f32 1.442695, %v784_v53  ;;  %v783_v58 = vpop.xlane.xlu0 %782 }
 0x6b6   :  { %4901 = vpow2.f32 %v790_v56  ;;  %v829_v6 = vpop.permute.xlu1 %828  ;;  %v787_v7 = vsub.f32 %v771_v45, %v783_v58 }
 0x6b7   :  { %4903 = vpow2.f32 %v788_v57 }
 0x6b8   :  { %v794_v10 = vmul.f32 1.442695, %v787_v7 }
 0x6b9   :  { %v780_v60 = vpop.xlane.xlu0 %779 }
 0x6ba   :  { %v786_v8 = vsub.f32 %v770_v48, %v780_v60  ;;  %4905 = vpow2.f32 %v794_v10  ;;  %v4680_v32 = vpop.permute.xlu1 %4679 }
 0x6bb   :  { %v4682_v48 = vunpack.i.h.bf16 %v4680_v32  ;;  %v4681_v49 = vunpack.i.l.bf16 %v4680_v32 }
 0x6bc   :  { %v792_v15 = vmul.f32 1.442695, %v786_v8 }
 0x6bd   :  { %v4670_v61 = vpop.permute.xlu0 %4669  ;;  %v4513_v52 = vpack.c.bf16 %v4682_v48, %v4681_v49 }
 0x6be   :  { %v4672_v62 = vunpack.i.h.bf16 %v4670_v61  ;;  %v4671_v63 = vunpack.i.l.bf16 %v4670_v61  ;;  %4907 = vpow2.f32 %v792_v15 }
 0x6c0   :  { %v4902_v0 = vpop.eup %4901  ;;  %v4503_v2 = vpack.c.bf16 %v4672_v62, %v4671_v63 }
 0x6c1   :  { %v4904_v3 = vpop.eup %4903  ;;  %v799_v4 = vsel %vm497_vm3, %v4902_v0, 0.0 }
 0x6c2   :  { %800 = vadd.xlane.f32.xlu0 %v799_v4  ;;  %4504 = vmatprep.subr.bf16.mxu0 %v4503_v2  ;;  %v796_v5 = vsel %vm497_vm3, %v4904_v3, 0.0 }
 0x6c3   :  { %797 = vadd.xlane.f32.xlu1 %v796_v5  ;;  %4506 = vmatpush3.bf16.msra.mxu0 %v4503_v2 }
 0x6c4   :  { %4211 = vmatprep.subr.msk.mxu0 %vm554_vm4, %v829_v6  ;;  %v4906_v16 = vpop.eup %4905 }
 0x6c5   :  { %v805_v30 = vsel %vm497_vm3, %v4906_v16, 0.0 }
 0x6c7   :  { %4212 = vmatpush3.msk.msra.mxu0 %vm554_vm4, %v829_v6 }
 0x6c8   :  { %v4908_v17 = vpop.eup %4907 }
 0x6c9   :  { %v802_v31 = vsel %vm497_vm3, %v4908_v17, 0.0 }
 0x6d4   :  { %949 = vrot.lane.b32.xlu1 %v5366_v21, %s5135_s30 }
 0x6d8   :  { %4674 = vrot.lane.b32.xlu0 %v5359_v9, %s5135_s30 }
 0x6f7   :  { %806 = vadd.xlane.f32.xlu0 %v805_v30 }
 0x6f8   :  { %803 = vadd.xlane.f32.xlu1 %v802_v31 }
 0x709   :  { %933 = vrot.lane.b32.xlu1 %v5333_v55, %s5136_s8 }
 0x70d   :  { %935 = vrot.lane.b32.xlu0 %v5346_v1, %s5136_s8  ;;  %937 = vrot.lane.b32.xlu1 %v5368_v24, %s5136_s8 }
 0x711   :  { %939 = vrot.lane.b32.xlu0 %v5370_v25, %s5136_s8  ;;  %4684 = vrot.lane.b32.xlu1 %v5288_v27, %s5136_s8 }
 0x74f   :  { %v801_v34 = vpop.xlane.xlu0 %800 }
 0x750   :  { %4909 = vrcp.f32 %v801_v34  ;;  %v798_v36 = vpop.xlane.xlu1 %797 }
 0x751   :  { %4911 = vrcp.f32 %v798_v36 }
 0x753   :  { %v4675_v37 = vpop.permute.xlu0 %4674 }
 0x754   :  { %v4677_v40 = vunpack.i.h.bf16 %v4675_v37  ;;  %v4676_v41 = vunpack.i.l.bf16 %v4675_v37  ;;  %v950_v53 = vpop.permute.xlu1 %949 }
 0x756   :  { %v4507_v43 = vpack.c.bf16 %v4677_v40, %v4676_v41 }
 0x758   :  { %4509 = vmatprep.subr.msk.bf16.mxu0 %vm5382_vm2, %v4507_v43 }
 0x75a   :  { %v4910_v45 = vpop.eup %4909 }
 0x75b   :  { %v4912_v46 = vpop.eup %4911  ;;  %v811_v51 = vmul.f32 %v4910_v45, %v4902_v0 }
 0x75c   :  { %v809_v50 = vmul.f32 %v4912_v46, %v4904_v3 }
 0x75e   :  { %4213 = vmatprep.mubr.msk.f32.mxu0 %vm497_vm3, %v809_v50 }
 0x75f   :  { %4214 = vmatmul.mubr.msk.f32.vlgmr.msra.gmra.mrb[12].mxu0 %vm497_vm3, %v811_v51 }
 0x760   :  { %4512 = vmatpush3.bf16.xpose.msk.msra.mxu0 %vm5382_vm2, %v4507_v43 }
 0x761   :  { %4515 = vmatprep.subr.msk.bf16.mxu0 %vm5382_vm2, %v4513_v52 }
 0x768   :  { %4518 = vmatpush3.bf16.xpose.msk.msra.mxu0 %vm5382_vm2, %v4513_v52 }
 0x769   :  { %4227 = vmatprep.subr.msk.mxu0 %vm385_vm1, %v950_v53 }
 0x770   :  { %4228 = vmatpush3.xpose.msk.msra.mxu0 %vm385_vm1, %v950_v53 }
 0x784   :  { %v807_v56 = vpop.xlane.xlu0 %806 }
 0x785   :  { %4913 = vrcp.f32 %v807_v56  ;;  %v804_v57 = vpop.xlane.xlu1 %803 }
 0x786   :  { %4915 = vrcp.f32 %v804_v57 }
 0x788   :  { %v936_v6 = vpop.permute.xlu0 %935 }
 0x789   :  { %v934_v58 = vpop.permute.xlu1 %933 }
 0x78c   :  { %v940_v7 = vpop.permute.xlu0 %939 }
 0x78d   :  { %v938_v60 = vpop.permute.xlu1 %937 }
 0x78f   :  { %v4914_v61 = vpop.eup %4913 }
 0x790   :  { %v4916_v62 = vpop.eup %4915  ;;  %v815_v4 = vmul.f32 %v4914_v61, %v4906_v16 }
 0x791   :  { %v4685_v63 = vpop.permute.xlu1 %4684  ;;  %v813_v0 = vmul.f32 %v4916_v62, %v4908_v17 }
 0x792   :  { %v4687_v2 = vunpack.i.h.bf16 %v4685_v63  ;;  %v4686_v3 = vunpack.i.l.bf16 %v4685_v63 }
 0x793   :  { %4216 = vmatprep.mubr.msk.f32.mxu0 %vm497_vm3, %v813_v0 }
 0x794   :  { %4217 = vmatmul.mubr.msk.f32.gmra.mrb[14].mxu0 %vm497_vm3, %v815_v4  ;;  %v4519_v5 = vpack.c.bf16 %v4687_v2, %v4686_v3 }
 0x795   :  { %4229 = vmatprep.mubr.msk.f32.mxu0 %vm385_vm1, %v934_v58 }
 0x796   :  { %4520 = vmatprep.subr.bf16.mxu1 %v4519_v5 }
 0x797   :  { %4522 = vmatpush3.bf16.msra.mxu1 %v4519_v5 }
 0x798   :  { %4230 = vmatmul.mubr.msk.f32.vlgmr.msra.gmra.mrb[16].mxu0 %vm385_vm1, %v936_v6 }
 0x799   :  { %4232 = vmatprep.mubr.msk.f32.mxu0 %vm385_vm1, %v938_v60 }
 0x79c   :  { %4233 = vmatmul.mubr.msk.f32.gmra.mrb[18].mxu0 %vm385_vm1, %v940_v7 }
 0x832   :  { %v5537_v8 = vpop.f32.mrb[12].mxu0 }
 0x833   :  { %v5539_v10 = vpop.f32.mrb[13].mxu0 }
 0x834   :  { %v4713_v15 = vpack.i.bf16 %v5537_v8, %v5539_v10  ;;  %v145_v8 = vld [vmem:[%s6540_s2 + $0x40] sm:$0xff] }
 0x867   :  { %v5543_v16 = vpop.f32.mrb[14].mxu0 }
 0x868   :  { %v5545_v17 = vpop.f32.mrb[15].mxu0 }
 0x869   :  { %v4718_v30 = vpack.i.bf16 %v5543_v16, %v5545_v17 }
 0x86b   :  { %v4231_v31 = vpop.f32.mrb[16].mxu0 }
 0x86c   :  { %v1055_v32 = vmul.f32 0.25, %v4231_v31  ;;  %v1035_v34 = vpop.f32.mrb[17].mxu0 }
 0x86d   :  { %v1054_v36 = vmul.f32 0.25, %v1035_v34 }
 0x86e   :  { %v1059_v37 = vadd.f32 %v5405_v44, %v1055_v32 }
 0x86f   :  { %v4234_v40 = vpop.f32.mrb[18].mxu0  ;;  %v1058_v41 = vadd.f32 %v5410_v47, %v1054_v36 }
 0x870   :  { %v1057_v43 = vmul.f32 0.25, %v4234_v40  ;;  %v1045_v45 = vpop.f32.mrb[19].mxu0  ;;  %v1065_v46 = vsel %vm497_vm3, %v1059_v37, -inf }
 0x871   :  { %v1056_v48 = vmul.f32 0.25, %v1045_v45  ;;  %1066 = vmax.xlane.f32.xlu0 %v1065_v46  ;;  %v1062_v49 = vsel %vm497_vm3, %v1058_v41, -inf }
 0x872   :  { %1063 = vmax.xlane.f32.xlu1 %v1062_v49  ;;  %v1061_v50 = vadd.f32 %v5424_v59, %v1057_v43 }
 0x873   :  { %v1060_v52 = vadd.f32 %v5418_v54, %v1056_v48 }
 0x874   :  { %v1071_v51 = vsel %vm497_vm3, %v1061_v50, -inf }
 0x875   :  { %1072 = vmax.xlane.f32.xlu0 %v1071_v51  ;;  %v1068_v53 = vsel %vm497_vm3, %v1060_v52, -inf }
 0x879   :  { %1069 = vmax.xlane.f32.xlu0 %v1068_v53 }
 0x883   :  { %1114 = vrot.lane.b32.xlu1 %v5437_v35, %s5136_s8 }
 0x887   :  { %4699 = vrot.lane.b32.xlu1 %v5376_v28, %s5137_s9 }
 0x88b   :  { %1235 = vrot.lane.b32.xlu1 %v5366_v21, %s5137_s9 }
 0x88f   :  { %4689 = vrot.lane.b32.xlu0 %v5314_v42, %s5136_s8 }
 0x8fe   :  { %v1067_v56 = vpop.xlane.xlu0 %1066 }
 0x8ff   :  { %v1075_v57 = vsub.f32 %v1059_v37, %v1067_v56  ;;  %v1064_v58 = vpop.xlane.xlu1 %1063 }
 0x900   :  { %v1074_v60 = vsub.f32 %v1058_v41, %v1064_v58 }
 0x901   :  { %v1080_v61 = vmul.f32 1.442695, %v1075_v57 }
 0x902   :  { %v1078_v62 = vmul.f32 1.442695, %v1074_v60  ;;  %v1073_v63 = vpop.xlane.xlu0 %1072 }
 0x903   :  { %4917 = vpow2.f32 %v1080_v61  ;;  %v1115_v31 = vpop.permute.xlu1 %1114  ;;  %v1077_v32 = vsub.f32 %v1061_v50, %v1073_v63 }
 0x904   :  { %4919 = vpow2.f32 %v1078_v62 }
 0x905   :  { %v1084_v36 = vmul.f32 1.442695, %v1077_v32 }
 0x906   :  { %v1070_v0 = vpop.xlane.xlu0 %1069 }
 0x907   :  { %v1076_v34 = vsub.f32 %v1060_v52, %v1070_v0  ;;  %4921 = vpow2.f32 %v1084_v36 }
 0x909   :  { %v1082_v37 = vmul.f32 1.442695, %v1076_v34 }
 0x90a   :  { %v4690_v2 = vpop.permute.xlu0 %4689 }
 0x90b   :  { %v4692_v3 = vunpack.i.h.bf16 %v4690_v2  ;;  %v4691_v4 = vunpack.i.l.bf16 %v4690_v2  ;;  %4923 = vpow2.f32 %v1082_v37 }
 0x90d   :  { %v4918_v28 = vpop.eup %4917  ;;  %v4523_v5 = vpack.c.bf16 %v4692_v3, %v4691_v4 }
 0x90e   :  { %v4920_v6 = vpop.eup %4919  ;;  %v1089_v21 = vsel %vm497_vm3, %v4918_v28, 0.0 }
 0x90f   :  { %1090 = vadd.xlane.f32.xlu0 %v1089_v21  ;;  %4524 = vmatprep.subr.bf16.mxu1 %v4523_v5  ;;  %v1086_v7 = vsel %vm497_vm3, %v4920_v6, 0.0 }
 0x910   :  { %1087 = vadd.xlane.f32.xlu1 %v1086_v7  ;;  %4526 = vmatpush3.bf16.msra.mxu1 %v4523_v5 }
 0x911   :  { %4243 = vmatprep.subr.msk.mxu1 %vm554_vm4, %v1115_v31  ;;  %v4922_v40 = vpop.eup %4921 }
 0x912   :  { %v1095_v43 = vsel %vm497_vm3, %v4922_v40, 0.0 }
 0x914   :  { %4244 = vmatpush3.msk.msra.mxu1 %vm554_vm4, %v1115_v31 }
 0x915   :  { %v4924_v41 = vpop.eup %4923 }
 0x916   :  { %v1092_v45 = vsel %vm497_vm3, %v4924_v41, 0.0 }
 0x921   :  { %1219 = vrot.lane.b32.xlu1 %v5333_v55, %s5138_s10  ;;  %v4700_v55 = vpop.permute.xlu1 %4699 }
 0x922   :  { %v4702_v56 = vunpack.i.h.bf16 %v4700_v55 }
 0x925   :  { %4694 = vrot.lane.b32.xlu0 %v5359_v9, %s5137_s9  ;;  %v1236_v9 = vpop.permute.xlu1 %1235 }
 0x944   :  { %1096 = vadd.xlane.f32.xlu0 %v1095_v43 }
 0x945   :  { %1093 = vadd.xlane.f32.xlu1 %v1092_v45 }
 0x956   :  { %1223 = vrot.lane.b32.xlu1 %v5368_v24, %s5138_s10 }
 0x95a   :  { %1221 = vrot.lane.b32.xlu0 %v5346_v1, %s5138_s10  ;;  %v4701_v1 = vunpack.i.l.bf16 %v4700_v55 }
 0x95e   :  { %1225 = vrot.lane.b32.xlu0 %v5370_v25, %s5138_s10  ;;  %v4533_v25 = vpack.c.bf16 %v4702_v56, %v4701_v1 }
 0x99c   :  { %v1091_v46 = vpop.xlane.xlu0 %1090 }
 0x99d   :  { %4925 = vrcp.f32 %v1091_v46  ;;  %v1088_v48 = vpop.xlane.xlu1 %1087 }
 0x99e   :  { %4927 = vrcp.f32 %v1088_v48 }
 0x9a0   :  { %v4695_v49 = vpop.permute.xlu0 %4694 }
 0x9a1   :  { %v4697_v50 = vunpack.i.h.bf16 %v4695_v49  ;;  %v4696_v51 = vunpack.i.l.bf16 %v4695_v49  ;;  %v1220_v60 = vpop.permute.xlu1 %1219 }
 0x9a3   :  { %v4527_v52 = vpack.c.bf16 %v4697_v50, %v4696_v51 }
 0x9a5   :  { %4529 = vmatprep.subr.msk.bf16.mxu1 %vm5382_vm2, %v4527_v52 }
 0x9a7   :  { %v4926_v24 = vpop.eup %4925 }
 0x9a8   :  { %v4928_v53 = vpop.eup %4927  ;;  %v1101_v58 = vmul.f32 %v4926_v24, %v4918_v28 }
 0x9a9   :  { %v1099_v57 = vmul.f32 %v4928_v53, %v4920_v6 }
 0x9ab   :  { %4245 = vmatprep.mubr.msk.f32.mxu1 %vm497_vm3, %v1099_v57 }
 0x9ac   :  { %4246 = vmatmul.mubr.msk.f32.vlgmr.msra.gmra.mrb[12].mxu1 %vm497_vm3, %v1101_v58 }
 0x9ad   :  { %4532 = vmatpush3.bf16.xpose.msk.msra.mxu1 %vm5382_vm2, %v4527_v52 }
 0x9ae   :  { %4535 = vmatprep.subr.msk.bf16.mxu1 %vm5382_vm2, %v4533_v25 }
 0x9b5   :  { %4538 = vmatpush3.bf16.xpose.msk.msra.mxu1 %vm5382_vm2, %v4533_v25 }
 0x9b6   :  { %4259 = vmatprep.subr.msk.mxu1 %vm385_vm1, %v1236_v9 }
 0x9bd   :  { %4260 = vmatpush3.xpose.msk.msra.mxu1 %vm385_vm1, %v1236_v9 }
 0x9d1   :  { %v1097_v61 = vpop.xlane.xlu0 %1096 }
 0x9d2   :  { %4929 = vrcp.f32 %v1097_v61  ;;  %v1094_v62 = vpop.xlane.xlu1 %1093 }
 0x9d3   :  { %4931 = vrcp.f32 %v1094_v62 }
 0x9d5   :  { %v1222_v4 = vpop.permute.xlu0 %1221 }
 0x9d6   :  { %v1224_v28 = vpop.permute.xlu1 %1223 }
 0x9d9   :  { %v1226_v5 = vpop.permute.xlu0 %1225 }
 0x9dc   :  { %v4930_v63 = vpop.eup %4929 }
 0x9dd   :  { %v4932_v0 = vpop.eup %4931  ;;  %v1105_v3 = vmul.f32 %v4930_v63, %v4922_v40 }
 0x9de   :  { %v1103_v2 = vmul.f32 %v4932_v0, %v4924_v41 }
 0x9e0   :  { %4248 = vmatprep.mubr.msk.f32.mxu1 %vm497_vm3, %v1103_v2 }
 0x9e1   :  { %4249 = vmatmul.mubr.msk.f32.gmra.mrb[14].mxu1 %vm497_vm3, %v1105_v3 }
 0x9e2   :  { %4261 = vmatprep.mubr.msk.f32.mxu1 %vm385_vm1, %v1220_v60 }
 0x9e5   :  { %4262 = vmatmul.mubr.msk.f32.vlgmr.msra.gmra.mrb[16].mxu1 %vm385_vm1, %v1222_v4 }
 0x9e6   :  { %4264 = vmatprep.mubr.msk.f32.mxu1 %vm385_vm1, %v1224_v28 }
 0x9e9   :  { %4265 = vmatmul.mubr.msk.f32.gmra.mrb[18].mxu1 %vm385_vm1, %v1226_v5 }
 0x9ea   :  { %1926 = vmatprep.mubr.bf16.mxu1 %v5129_v29 }
 0xa7f   :  { %v5600_v6 = vpop.f32.mrb[12].mxu1 }
 0xa80   :  { %v5602_v21 = vpop.f32.mrb[13].mxu1 }
 0xa81   :  { %v4723_v7 = vpack.i.bf16 %v5600_v6, %v5602_v21 }
 0xab4   :  { %v5606_v31 = vpop.f32.mrb[14].mxu1 }
 0xab5   :  { %v5608_v32 = vpop.f32.mrb[15].mxu1 }
 0xab6   :  { %v4728_v34 = vpack.i.bf16 %v5606_v31, %v5608_v32 }
 0xab8   :  { %v4263_v36 = vpop.f32.mrb[16].mxu1 }
 0xab9   :  { %v1341_v37 = vmul.f32 0.25, %v4263_v36  ;;  %v1321_v40 = vpop.f32.mrb[17].mxu1 }
 0xaba   :  { %v1340_v41 = vmul.f32 0.25, %v1321_v40 }
 0xabb   :  { %v1345_v43 = vadd.f32 %v5405_v44, %v1341_v37 }
 0xabc   :  { %v4266_v45 = vpop.f32.mrb[18].mxu1  ;;  %v1344_v55 = vadd.f32 %v5410_v47, %v1340_v41 }
 0xabd   :  { %v1331_v9 = vpop.f32.mrb[19].mxu1  ;;  %v1351_v46 = vsel %vm497_vm3, %v1345_v43, -inf  ;;  %v1343_v48 = vmul.f32 0.25, %v4266_v45 }
 0xabe   :  { %v1342_v49 = vmul.f32 0.25, %v1331_v9  ;;  %1352 = vmax.xlane.f32.xlu0 %v1351_v46  ;;  %v1348_v50 = vsel %vm497_vm3, %v1344_v55, -inf }
 0xabf   :  { %1349 = vmax.xlane.f32.xlu1 %v1348_v50  ;;  %v1347_v24 = vadd.f32 %v5424_v59, %v1343_v48  ;;  %v4852_v50 = vld [vmem:[%s6543_s4 + $0x8] sm:$0xff]  }
 0xac0   :  { %v1346_v51 = vadd.f32 %v5418_v54, %v1342_v49  ;;  %v4851_v49 = vld [vmem:[%s6543_s4] sm:$0xff]  }
 0xac1   :  { %v1357_v44 = vsel %vm497_vm3, %v1347_v24, -inf }
 0xac2   :  { %v1354_v52 = vsel %vm497_vm3, %v1346_v51, -inf }
 0xac3   :  { %1355 = vmax.xlane.f32.xlu0 %v1354_v52  ;;  %v4854_v52 = vld [vmem:[%s6543_s4 + $0x18] sm:$0xff]  }
 0xac7   :  { %1358 = vmax.xlane.f32.xlu0 %v1357_v44  ;;  %v4856_v44 = vld [vmem:[%s6543_s4 + $0x28] sm:$0xff]  }
 0xad0   :  { %4704 = vrot.lane.b32.xlu1 %v5288_v27, %s5138_s10 }
 0xb4b   :  { %v1353_v47 = vpop.xlane.xlu0 %1352 }
 0xb4c   :  { %v1361_v53 = vsub.f32 %v1345_v43, %v1353_v47  ;;  %v1350_v56 = vpop.xlane.xlu1 %1349  ;;  %v139_v43 = vld [vmem:[%s6540_s2 + $0x10] sm:$0xff] }
 0xb4d   :  { %v1360_v1 = vsub.f32 %v1344_v55, %v1350_v56  ;;  %v5642_v45 = vadd.f32 %v5274_v22, %v139_v43  ;;  %v5666_v22 = vadd.f32 %v5272_v20, %v145_v8  ;;  %v4857_v47 = vld [vmem:[%s6543_s4 + $0x30] sm:$0xff]  }
 0xb4e   :  { %v1366_v57 = vmul.f32 1.442695, %v1361_v53  ;;  %v4858_v53 = vld [vmem:[%s6543_s4 + $0x38] sm:$0xff]  }
 0xb4f   :  { %v1364_v58 = vmul.f32 1.442695, %v1360_v1 }
 0xb50   :  { %4933 = vpow2.f32 %v1366_v57  ;;  %v4705_v25 = vpop.permute.xlu1 %4704  ;;  %v1356_v54 = vpop.xlane.xlu0 %1355 }
 0xb51   :  { %4935 = vpow2.f32 %v1364_v58  ;;  %v4707_v60 = vunpack.i.h.bf16 %v4705_v25  ;;  %v4706_v61 = vunpack.i.l.bf16 %v4705_v25  ;;  %v1362_v59 = vsub.f32 %v1346_v51, %v1356_v54  ;;  %v4853_v51 = vld [vmem:[%s6543_s4 + $0x10] sm:$0xff]   ;;  %v148_v58 = vld [vmem:[%s6540_s2 + $0x58] sm:$0xff] }
 0xb53   :  { %v1368_v62 = vmul.f32 1.442695, %v1362_v59  ;;  %v4539_v63 = vpack.c.bf16 %v4707_v60, %v4706_v61  ;;  %v5705_v60 = vadd.f32 %v5276_v23, %v148_v58  ;;  %v1566_v59 = vsub.f32 0.0, %v5268_v18 }
 0xb54   :  { %v1359_v0 = vpop.xlane.xlu0 %1358 }
 0xb55   :  { %4937 = vpow2.f32 %v1368_v62  ;;  %v1363_v2 = vsub.f32 %v1347_v24, %v1359_v0  ;;  %4540 = vmatprep.subr.bf16.mxu0 %v4539_v63  ;;  %v4855_v24 = vld [vmem:[%s6543_s4 + $0x20] sm:$0xff]   ;;  %v1567_v62 = vsub.f32 0.0, %v5270_v19  ;;  %v1568_v0 = vsub.f32 0.0, %v5303_v39 }
 0xb56   :  { %4542 = vmatpush3.bf16.msra.mxu0 %v4539_v63  ;;  %v1570_v63 = vmul.f32 1.442695, %v1566_v59 }
 0xb57   :  { %v1370_v27 = vmul.f32 1.442695, %v1363_v2  ;;  %v1572_v2 = vmul.f32 1.442695, %v1567_v62 }
 0xb59   :  { %4939 = vpow2.f32 %v1370_v27  ;;  %v1569_v27 = vsub.f32 0.0, %v5301_v38 }
 0xb5a   :  { %v4934_v3 = vpop.eup %4933 }
 0xb5b   :  { %v4936_v4 = vpop.eup %4935  ;;  %v1375_v28 = vsel %vm497_vm3, %v4934_v3, 0.0  ;;  %v1576_v23 = vmul.f32 1.442695, %v1569_v27 }
 0xb5c   :  { %1376 = vadd.xlane.f32.xlu0 %v1375_v28  ;;  %v1372_v5 = vsel %vm497_vm3, %v4936_v4, 0.0 }
 0xb5d   :  { %1373 = vadd.xlane.f32.xlu1 %v1372_v5 }
 0xb5f   :  { %v4938_v36 = vpop.eup %4937 }
 0xb60   :  { %v1378_v37 = vsel %vm497_vm3, %v4938_v36, 0.0 }
 0xb61   :  { %1379 = vadd.xlane.f32.xlu1 %v1378_v37 }
 0xb63   :  { %v4940_v40 = vpop.eup %4939 }
 0xb64   :  { %v1381_v41 = vsel %vm497_vm3, %v4940_v40, 0.0 }
 0xb65   :  { %1382 = vadd.xlane.f32.xlu0 %v1381_v41 }
 0xb72   :  { %1400 = vrot.lane.b32.xlu1 %v5437_v35, %s5138_s10  ;;  %v142_v35 = vld [vmem:[%s6540_s2 + $0x28] sm:$0xff] }
 0xb76   :  { %4714 = vrot.lane.b32.xlu1 %v4713_v15, %s5137_s9 }
 0xb7a   :  { %4719 = vrot.lane.b32.xlu1 %v4718_v30, %s5137_s9 }
 0xb7b   :  { %4709 = vrot.lane.b32.xlu0 %v5314_v42, %s5138_s10  ;;  %v5657_v42 = vadd.f32 %v5284_v26, %v142_v35 }
 0xb7e   :  { %1598 = vrot.lane.b32.xlu1 %v5642_v45, %s5132_s11 }
 0xb7f   :  { %4724 = vrot.lane.b32.xlu0 %v4723_v7, %s5135_s30 }
 0xb82   :  { %4729 = vrot.lane.b32.xlu1 %v4728_v34, %s5135_s30 }
 0xb83   :  { %1600 = vrot.lane.b32.xlu0 %v5657_v42, %s5132_s11 }
 0xb86   :  { %1602 = vrot.lane.b32.xlu1 %v5666_v22, %s5132_s11 }
 0xbe9   :  { %v1377_v15 = vpop.xlane.xlu0 %1376 }
 0xbea   :  { %v1374_v10 = vpop.xlane.xlu1 %1373 }
 0xbeb   :  { %4941 = vrcp.f32 %v1374_v10 }
 0xbec   :  { %4943 = vrcp.f32 %v1377_v15 }
 0xbee   :  { %v1380_v16 = vpop.xlane.xlu1 %1379 }
 0xbef   :  { %4945 = vrcp.f32 %v1380_v16 }
 0xbf2   :  { %v1383_v26 = vpop.xlane.xlu0 %1382  ;;  %v1401_v32 = vpop.permute.xlu1 %1400 }
 0xbf3   :  { %4947 = vrcp.f32 %v1383_v26 }
 0xbf4   :  { %4949 = vpow2.f32 %v1570_v63 }
 0xbf5   :  { %v4942_v17 = vpop.eup %4941  ;;  %4951 = vpow2.f32 %v1572_v2 }
 0xbf6   :  { %v4710_v30 = vpop.permute.xlu0 %4709  ;;  %v1385_v6 = vmul.f32 %v4942_v17, %v4936_v4  ;;  %v4944_v31 = vpop.eup %4943 }
 0xbf7   :  { %v4712_v21 = vunpack.i.h.bf16 %v4710_v30  ;;  %v4711_v7 = vunpack.i.l.bf16 %v4710_v30  ;;  %v1387_v55 = vmul.f32 %v4944_v31, %v4934_v3  ;;  %v1574_v3 = vmul.f32 1.442695, %v1568_v0  ;;  %v4715_v4 = vpop.permute.xlu1 %4714 }
 0xbf8   :  { %4277 = vmatprep.mubr.msk.f32.mxu0 %vm497_vm3, %v1385_v6  ;;  %v4717_v17 = vunpack.i.h.bf16 %v4715_v4  ;;  %v4716_v30 = vunpack.i.l.bf16 %v4715_v4 }
 0xbf9   :  { %v4543_v20 = vpack.c.bf16 %v4712_v21, %v4711_v7  ;;  %v4946_v34 = vpop.eup %4945  ;;  %4953 = vpow2.f32 %v1574_v3 }
 0xbfa   :  { %v1389_v46 = vmul.f32 %v4946_v34, %v4938_v36  ;;  %4955 = vpow2.f32 %v1576_v23  ;;  %v4725_v15 = vpop.permute.xlu0 %4724  ;;  %v1553_v34 = vsel %vm385_vm1, %v5479_v12, %v4716_v30 }
 0xbfb   :  { %4544 = vmatprep.subr.bf16.mxu0 %v4543_v20  ;;  %v4727_v21 = vunpack.i.h.bf16 %v4725_v15 }
 0xbfc   :  { %4546 = vmatpush3.bf16.msra.mxu0 %v4543_v20  ;;  %v4726_v20 = vunpack.i.l.bf16 %v4725_v15 }
 0xbfd   :  { %4275 = vmatprep.subr.msk.mxu0 %vm554_vm4, %v1401_v32  ;;  %v4948_v9 = vpop.eup %4947 }
 0xbfe   :  { %v1391_v48 = vmul.f32 %v4948_v9, %v4940_v40  ;;  %v4950_v28 = vpop.eup %4949  ;;  %v4720_v40 = vpop.permute.xlu1 %4719 }
 0xbff   :  { %v4952_v5 = vpop.eup %4951  ;;  %v1578_v36 = vadd.f32 1.0, %v4950_v28  ;;  %v5716_v7 = vpop.permute.xlu0 %1600 }
 0xc00   :  { %4276 = vmatpush3.msk.msra.mxu0 %vm554_vm4, %v1401_v32  ;;  %v1579_v41 = vadd.f32 1.0, %v4952_v5  ;;  %v1554_v32 = vsel %vm385_vm1, %v5477_v11, %v4717_v17  ;;  %v3821_v5 = vld [vmem:[%s6538_s0 + $0x30] sm:$0xff] }
 0xc01   :  { %4278 = vmatmul.mubr.msk.f32.vlgmr.msra.gmra.mrb[20].mxu0 %vm497_vm3, %v1387_v55  ;;  %4283 = vmatprep.subr.bf16.mxu0 %v4851_v49  ;;  %4957 = vrcp.f32 %v1578_v36  ;;  %v3819_v36 = vld [vmem:[%s6538_s0 + $0x20] sm:$0xff] }
 0xc02   :  { %4280 = vmatprep.mubr.msk.f32.mxu0 %vm497_vm3, %v1389_v46  ;;  %4284 = vmatpush3.bf16.msra.mxu0 %v4851_v49  ;;  %4959 = vrcp.f32 %v1579_v41  ;;  %v5714_v10 = vpop.permute.xlu1 %1598  ;;  %v4721_v49 = vunpack.i.l.bf16 %v4720_v40 }
 0xc03   :  { %4285 = vmatprep.subr.bf16.mxu0 %v4852_v50  ;;  %v4954_v37 = vpop.eup %4953 }
 0xc04   :  { %v4956_v43 = vpop.eup %4955  ;;  %v1580_v35 = vadd.f32 1.0, %v4954_v37  ;;  %v3750_v37 = vld [vmem:[%s6538_s0 + $0xb0] sm:$0xff] }
 0xc05   :  { %4281 = vmatmul.mubr.msk.f32.gmra.mrb[22].mxu0 %vm497_vm3, %v1391_v48  ;;  %v1581_v8 = vadd.f32 1.0, %v4956_v43  ;;  %v4722_v48 = vunpack.i.h.bf16 %v4720_v40  ;;  %v3748_v43 = vld [vmem:[%s6538_s0 + $0xa0] sm:$0xff] }
 0xc06   :  { %4286 = vmatpush3.bf16.msra.mxu0 %v4852_v50  ;;  %4961 = vrcp.f32 %v1580_v35  ;;  %v4730_v16 = vpop.permute.xlu1 %4729  ;;  %v1558_v50 = vsel %vm65_vm0, %v1554_v32, %v4727_v21  ;;  %v5109_v32 = vld [vmem:[%s6538_s0] sm:$0xff] }
 0xc07   :  { %4287 = vmatprep.subr.bf16.mxu0 %v4853_v51  ;;  %4963 = vrcp.f32 %v1581_v8  ;;  %v1556_v58 = vsel %vm385_vm1, %v5481_v13, %v4722_v48  ;;  %v3820_v8 = vld [vmem:[%s6538_s0 + $0x28] sm:$0xff] }
 0xc0a   :  { %4288 = vmatpush3.bf16.msra.mxu0 %v4853_v51  ;;  %v5725_v51 = vpop.permute.xlu1 %1602 }
 0xc0b   :  { %4289 = vmatprep.subr.bf16.mxu0 %v4854_v52  ;;  %v4958_v26 = vpop.eup %4957 }
 0xc0c   :  { %v4960_v6 = vpop.eup %4959  ;;  %v1590_v55 = vmul.f32 %v4958_v26, %v5268_v18  ;;  %v3749_v26 = vld [vmem:[%s6538_s0 + $0xa8] sm:$0xff] }
 0xc0d   :  { %v1591_v9 = vmul.f32 %v4960_v6, %v5270_v19  ;;  %v4731_v19 = vunpack.i.l.bf16 %v4730_v16 }
 0xc0e   :  { %4290 = vmatpush3.bf16.msra.mxu0 %v4854_v52  ;;  %v1610_v12 = vmul.f32 %v5714_v10, %v1590_v55 }
 0xc0f   :  { %4291 = vmatprep.subr.bf16.mxu0 %v4855_v24  ;;  %v1611_v18 = vmul.f32 %v5716_v7, %v1591_v9  ;;  %v5110_v9 = vld [vmem:[%s6538_s0 + $0x10] sm:$0xff] }
 0xc10   :  { %v4962_v31 = vpop.eup %4961 }
 0xc11   :  { %v4964_v46 = vpop.eup %4963 }
 0xc12   :  { %4292 = vmatpush3.bf16.msra.mxu0 %v4855_v24  ;;  %v1557_v24 = vsel %vm65_vm0, %v1553_v34, %v4726_v20 }
 0xc13   :  { %4293 = vmatprep.subr.bf16.mxu0 %v4856_v44 }
 0xc16   :  { %4294 = vmatpush3.bf16.msra.mxu0 %v4856_v44 }
 0xc17   :  { %4295 = vmatprep.subr.bf16.mxu0 %v4857_v47 }
 0xc1a   :  { %4296 = vmatpush3.bf16.msra.mxu0 %v4857_v47  ;;  %v4732_v47 = vunpack.i.h.bf16 %v4730_v16 }
 0xc1b   :  { %4297 = vmatprep.subr.bf16.mxu0 %v4858_v53 }
 0xc1c   :  { %v1560_v27 = vsel %vm65_vm0, %v1556_v58, %v4732_v47 }
 0xc1e   :  { %4298 = vmatpush3.bf16.msra.mxu0 %v4858_v53  ;;  %v1592_v53 = vmul.f32 %v4962_v31, %v5303_v39  ;;  %v3751_v31 = vld [vmem:[%s6538_s0 + $0xb8] sm:$0xff] }
 0xc20   :  { %v1612_v13 = vmul.f32 %v5725_v51, %v1592_v53 }
 0xcd4   :  { %v4279_v56 = vpop.f32.mrb[20].mxu0 }
 0xcd5   :  { %v1486_v1 = vpop.f32.mrb[21].mxu0 }
 0xcd6   :  { %v4733_v57 = vpack.i.bf16 %v4279_v56, %v1486_v1  ;;  %v1593_v56 = vmul.f32 %v4964_v46, %v5301_v38 }
 0xcd8   :  { %4734 = vrot.lane.b32.xlu0 %v4733_v57, %s5133_s28  ;;  %v4282_v25 = vpop.f32.mrb[22].mxu0 }
 0xcd9   :  { %v1496_v54 = vpop.f32.mrb[23].mxu0 }
 0xcda   :  { %v4738_v61 = vpack.i.bf16 %v4282_v25, %v1496_v54  ;;  %v1555_v25 = vsel %vm385_vm1, %v5483_v14, %v4721_v49  ;;  %v5111_v49 = vld [vmem:[%s6538_s0 + $0x8] sm:$0xff] }
 0xcdb   :  { %v1559_v2 = vsel %vm65_vm0, %v1555_v25, %v4731_v19 }
 0xcdc   :  { %1604 = vrot.lane.b32.xlu0 %v5705_v60, %s5132_s11  ;;  %4739 = vrot.lane.b32.xlu1 %v4738_v61, %s5133_s28 }
 0xd4a   :  { %v4735_v52 = vpop.permute.xlu0 %4734 }
 0xd4b   :  { %v4737_v44 = vunpack.i.h.bf16 %v4735_v52  ;;  %v4736_v11 = vunpack.i.l.bf16 %v4735_v52 }
 0xd4d   :  { %v1562_v1 = vsel %vm1561_vm5, %v1557_v24, %v4736_v11  ;;  %v1563_v57 = vsel %vm1561_vm5, %v1558_v50, %v4737_v44  ;;  %v5112_v44 = vld [vmem:[%s6538_s0 + $0x18] sm:$0xff] }
 0xd4e   :  { %v5738_v54 = vpop.permute.xlu0 %1604  ;;  %v4740_v61 = vpop.permute.xlu1 %4739  ;;  %v1615_v59 = vsel %vm1614_vm6, %v1562_v1, %v1610_v12  ;;  %v1616_v62 = vsel %vm1614_vm6, %v1563_v57, %v1611_v18 }
 0xd4f   :  { %v1613_v39 = vmul.f32 %v5738_v54, %v1593_v56  ;;  %v4742_v38 = vunpack.i.h.bf16 %v4740_v61  ;;  %v4741_v63 = vunpack.i.l.bf16 %v4740_v61  ;;  %v1635_v0 = vpack.c.bf16 %v1616_v62, %v1615_v59 }
 0xd51   :  { %v1565_v14 = vsel %vm1561_vm5, %v1560_v27, %v4742_v38  ;;  %v1564_v3 = vsel %vm1561_vm5, %v1559_v2, %v4741_v63  ;;  %4299 = vmatprep.mubr.bf16.mxu0 %v1635_v0 }
 0xd52   :  { %v1618_v23 = vsel %vm1614_vm6, %v1565_v14, %v1613_v39  ;;  %v1617_v4 = vsel %vm1614_vm6, %v1564_v3, %v1612_v13 }
 0xd53   :  { %v1636_v28 = vpack.c.bf16 %v1618_v23, %v1617_v4  ;;  %v4861_v23 = vld [vmem:[%s6539_s3 + $0x34] ss:$12 sps:$4 sm:$0xff]   ;;  %v4859_v4 = vld [vmem:[%s6539_s3 + $0x30] ss:$12 sps:$4 sm:$0xff]  }
 0xd54   :  { %1884 = vmatprep.subr.bf16.mxu0 %v4861_v23  ;;  %4627 = vmatprep.subr.bf16.mxu1 %v4861_v23 }
 0xd55   :  { %4300 = vmatmul.mubr.bf16.vlgmr.msra.gmra.mrb[24].mxu0 %v1636_v28  ;;  %4629 = vmatpush1.bf16.msra.mxu1 %v4859_v4  ;;  %v4864_v28 = vld [vmem:[%s6539_s3 + $0x4c] ss:$12 sps:$4 sm:$0xff]  }
 0xd56   :  { %1916 = vmatprep.mubr.bf16.mxu0 %v5129_v29  ;;  %v3822_v29 = vld [vmem:[%s6538_s0 + $0x38] sm:$0xff]  ;;  %1885 = vmatpush1.bf16.msra.mxu0 %v4859_v4 }
 0xd57   :  { %1886 = vmatprep.subr.bf16.mxu0 %v4864_v28  ;;  %4628 = vmatprep.subr.bf16.mxu1 %v4864_v28 }
 0xe28   :  { %v4301_v40 = vpop.f32.mrb[24].mxu0 }
 0xe29   :  { %v1733_v41 = vadd.f32 %v4301_v40, %v3821_v5  ;;  %v1724_v35 = vpop.f32.mrb[25].mxu0  ;;  %v4862_v5 = vld [vmem:[%s6539_s3 + $0x48] ss:$12 sps:$4 sm:$0xff]  }
 0xe2a   :  { %v1725_v15 = vadd.f32 %v3819_v36, %v1724_v35  ;;  %v4302_v16 = vpop.f32.mrb[26].mxu0  ;;  %1887 = vmatpush1.bf16.msra.mxu0 %v4862_v5  ;;  %4630 = vmatpush1.bf16.msra.mxu1 %v4862_v5  ;;  %v4865_v36 = vld [vmem:[%s6539_s3 + $0x38] ss:$12 sps:$4 sm:$0xff]  }
 0xe2b   :  { %v1727_v17 = vpop.f32.mrb[27].mxu0  ;;  %v1741_v30 = vmul.f32 %v3750_v37, %v1733_v41  ;;  %v1736_v21 = vadd.f32 %v4302_v16, %v3822_v29  ;;  %4303 = vmatprep.subr.bf16.mxu1 %v4865_v36 }
 0xe2c   :  { %v1739_v6 = vmul.f32 %v3748_v43, %v1725_v15  ;;  %v1728_v20 = vadd.f32 %v3820_v8, %v1727_v17 }
 0xe2d   :  { %v5783_v46 = vadd.f32 %v5110_v9, %v1741_v30  ;;  %v1742_v48 = vmul.f32 %v3751_v31, %v1736_v21  ;;  %v3831_v21 = vld [vmem:[%s6538_s0 + $0xc0] sm:$0xff] }
 0xe2e   :  { %v5778_v34 = vadd.f32 %v5109_v32, %v1739_v6  ;;  %v1740_v55 = vmul.f32 %v3749_v26, %v1728_v20  ;;  %v3832_v32 = vld [vmem:[%s6538_s0 + $0xc8] sm:$0xff] }
 0xe2f   :  { %v5797_v11 = vadd.f32 %v5112_v44, %v1742_v48  ;;  %v1768_v12 = vsel %vm65_vm0, %v5783_v46, 0.0 }
 0xe30   :  { %v5788_v50 = vadd.f32 %v5111_v49, %v1740_v55  ;;  %v1762_v52 = vsel %vm65_vm0, %v5778_v34, 0.0  ;;  %v3835_v49 = vld [vmem:[%s6538_s0 + $0xe0] sm:$0xff] }
 0xe31   :  { %1763 = vadd.xlane.f32.xlu0 %v1762_v52  ;;  %v1771_v18 = vsel %vm65_vm0, %v5797_v11, 0.0  ;;  %v3836_v52 = vld [vmem:[%s6538_s0 + $0xe8] sm:$0xff] }
 0xe32   :  { %v1765_v24 = vsel %vm65_vm0, %v5788_v50, 0.0 }
 0xe33   :  { %1766 = vadd.xlane.f32.xlu1 %v1765_v24 }
 0xe35   :  { %1769 = vadd.xlane.f32.xlu0 %v1768_v12  ;;  %v3833_v12 = vld [vmem:[%s6538_s0 + $0xd0] sm:$0xff] }
 0xe39   :  { %1772 = vadd.xlane.f32.xlu0 %v1771_v18 }
 0xebe   :  { %v1764_v47 = vpop.xlane.xlu0 %1763 }
 0xebf   :  { %v1774_v19 = vmul.f32 0.03125, %v1764_v47 }
 0xec0   :  { %v1767_v53 = vpop.xlane.xlu1 %1766 }
 0xec1   :  { %v1778_v56 = vsub.f32 %v5778_v34, %v1774_v19  ;;  %v1775_v1 = vmul.f32 0.03125, %v1767_v53  ;;  %v3834_v53 = vld [vmem:[%s6538_s0 + $0xd8] sm:$0xff] }
 0xec2   :  { %v1770_v57 = vpop.xlane.xlu0 %1769 }
 0xec3   :  { %v1779_v58 = vsub.f32 %v5788_v50, %v1775_v1  ;;  %v1776_v25 = vmul.f32 0.03125, %v1770_v57  ;;  %v1782_v61 = vmul.f32 %v1778_v56, %v1778_v56 }
 0xec5   :  { %v1780_v59 = vsub.f32 %v5783_v46, %v1776_v25  ;;  %v1786_v62 = vsel %vm65_vm0, %v1782_v61, 0.0  ;;  %v1783_v39 = vmul.f32 %v1779_v58, %v1779_v58  ;;  %v3838_v25 = vld [vmem:[%s6538_s0 + $0xf8] sm:$0xff] }
 0xec6   :  { %1787 = vadd.xlane.f32.xlu0 %v1786_v62  ;;  %v1773_v38 = vpop.xlane.xlu0 %1772 }
 0xec7   :  { %v1777_v63 = vmul.f32 0.03125, %v1773_v38  ;;  %v1789_v0 = vsel %vm65_vm0, %v1783_v39, 0.0  ;;  %v1784_v2 = vmul.f32 %v1780_v59, %v1780_v59  ;;  %v4866_v38 = vld [vmem:[%s6539_s3 + $0x50] ss:$12 sps:$4 sm:$0xff]  }
 0xec8   :  { %1790 = vadd.xlane.f32.xlu1 %v1789_v0 }
 0xec9   :  { %v1781_v27 = vsub.f32 %v5797_v11, %v1777_v63  ;;  %v1792_v13 = vsel %vm65_vm0, %v1784_v2, 0.0  ;;  %v3851_v63 = vld [vmem:[%s6540_s2 + $0x60] sm:$0xff] }
 0xeca   :  { %1793 = vadd.xlane.f32.xlu0 %v1792_v13 }
 0xecb   :  { %v1785_v14 = vmul.f32 %v1781_v27, %v1781_v27 }
 0xecd   :  { %v1795_v3 = vsel %vm65_vm0, %v1785_v14, 0.0  ;;  %v3855_v14 = vld [vmem:[%s6540_s2 + $0x80] sm:$0xff] }
 0xece   :  { %1796 = vadd.xlane.f32.xlu1 %v1795_v3  ;;  %v3854_v3 = vld [vmem:[%s6540_s2 + $0x78] sm:$0xff] }
 0xf53   :  { %v1788_v37 = vpop.xlane.xlu0 %1787 }
 0xf54   :  { %v1798_v40 = vmul.f32 0.03125, %v1788_v37 }
 0xf55   :  { %v1791_v41 = vpop.xlane.xlu1 %1790 }
 0xf56   :  { %v1802_v43 = vadd.f32 1e-05, %v1798_v40  ;;  %v1799_v35 = vmul.f32 0.03125, %v1791_v41 }
 0xf57   :  { %v1794_v29 = vpop.xlane.xlu0 %1793 }
 0xf58   :  { %4965 = vrsqrt.f32 %v1802_v43  ;;  %v1803_v8 = vadd.f32 1e-05, %v1799_v35  ;;  %v1800_v15 = vmul.f32 0.03125, %v1794_v29  ;;  %v3858_v29 = vld [vmem:[%s6540_s2 + $0x98] sm:$0xff] }
 0xf5a   :  { %4967 = vrsqrt.f32 %v1803_v8  ;;  %v1804_v16 = vadd.f32 1e-05, %v1800_v15  ;;  %v3861_v15 = vld [vmem:[%s6540_s2 + $0xb0] sm:$0xff] }
 0xf5b   :  { %v1797_v26 = vpop.xlane.xlu1 %1796 }
 0xf5c   :  { %4969 = vrsqrt.f32 %v1804_v16  ;;  %v1801_v17 = vmul.f32 0.03125, %v1797_v26 }
 0xf5e   :  { %v1805_v30 = vadd.f32 1e-05, %v1801_v17 }
 0xf60   :  { %4971 = vrsqrt.f32 %v1805_v30  ;;  %v3860_v30 = vld [vmem:[%s6540_s2 + $0xa8] sm:$0xff] }
 0xf62   :  { %v4966_v6 = vpop.eup %4965 }
 0xf63   :  { %v1810_v20 = vmul.f32 %v4966_v6, %v1778_v56 }
 0xf64   :  { %v4968_v31 = vpop.eup %4967 }
 0xf65   :  { %v1814_v55 = vmul.f32 %v3831_v21, %v1810_v20  ;;  %v1811_v9 = vmul.f32 %v4968_v31, %v1779_v58  ;;  %v3837_v58 = vld [vmem:[%s6538_s0 + $0xf0] sm:$0xff] }
 0xf66   :  { %v4970_v48 = vpop.eup %4969 }
 0xf67   :  { %v1815_v24 = vmul.f32 %v3832_v32, %v1811_v9  ;;  %v1812_v44 = vmul.f32 %v4970_v48, %v1780_v59  ;;  %v1818_v18 = vadd.f32 %v3835_v49, %v1814_v55  ;;  %v3873_v55 = vld [vmem:[%s6541_s5 + $0x4] sm:$0x3] }
 0xf69   :  { %v1819_v47 = vadd.f32 %v3836_v52, %v1815_v24  ;;  %v1816_v56 = vmul.f32 %v3833_v12, %v1812_v44  ;;  %v5113_v44 = vld [vmem:[%s6542_s1] sm:$0xff] }
 0xf6a   :  { %v4972_v19 = vpop.eup %4971 }
 0xf6b   :  { %v1813_v1 = vmul.f32 %v4972_v19, %v1781_v27  ;;  %v1831_v57 = vpack.c.bf16 %v1819_v47, %v1818_v18  ;;  %v1820_v59 = vadd.f32 %v3837_v58, %v1816_v56  ;;  %v3852_v27 = vld [vmem:[%s6540_s2 + $0x68] sm:$0xff]  ;;  %v5114_v18 = vld [vmem:[%s6542_s1 + $0x20] sm:$0xff] }
 0xf6c   :  { %v5115_v19 = vld [vmem:[%s6542_s1 + $0x40] sm:$0xff]  ;;  %v5116_v58 = vld [vmem:[%s6542_s1 + $0x28] sm:$0xff] }
 0xf6d   :  { %v1817_v61 = vmul.f32 %v3834_v53, %v1813_v1  ;;  %3869 = vmatmul.mubr.msk.bf16.vlgmr.msra.gmra.mrb[28].mxu0 %vm65_vm0, %v1831_v57 }
 0xf6f   :  { %v1821_v62 = vadd.f32 %v3838_v25, %v1817_v61 }
 0xf71   :  { %v1832_v39 = vpack.c.bf16 %v1821_v62, %v1820_v59  ;;  %v5117_v59 = vld [vmem:[%s6542_s1 + $0x8] sm:$0xff] }
 0xf73   :  { %3870 = vmatmul.mubr.msk.bf16.vlgmr.msra.gmra.mrb[20].mxu1 %vm65_vm0, %v1832_v39 }
 0xf74   :  { %4304 = vmatpush3.bf16.msra.mxu1 %v4865_v36  ;;  %4307 = vmatprep.mubr.msk.bf16.mxu1 %vm65_vm0, %v1831_v57  ;;  %v3857_v36 = vld [vmem:[%s6540_s2 + $0x90] sm:$0xff] }
 0xf75   :  { %4305 = vmatprep.subr.bf16.mxu1 %v4866_v38 }
 0xf78   :  { %4306 = vmatpush3.bf16.msra.mxu1 %v4866_v38 }
 0xf7b   :  { %4308 = vmatmul.mubr.msk.bf16.vlgmr.msra.gmra.mrb[24].mxu1 %vm65_vm0, %v1832_v39 }
0x1040   :  { %v1918_v0 = vpop.f32.mrb[28].mxu0 }
0x1041   :  { %v1919_v2 = vadd.f32 %v3851_v63, %v1918_v0  ;;  %v1920_v13 = vpop.f32.mrb[29].mxu0  ;;  %v5118_v63 = vld [vmem:[%s6542_s1 + $0x48] sm:$0xff] }
0x1042   :  { %v1922_v23 = vpop.f32.mrb[30].mxu0  ;;  %v5871_v28 = vadd.f32 %v3852_v27, %v1920_v13 }
0x1043   :  { %v1924_v4 = vpop.f32.mrb[31].mxu0  ;;  %2046 = vrot.lane.b32.xlu1 %v1919_v2, %s5130_s22  ;;  %2030 = vrot.lane.b32.xlu0 %v1919_v2, %s5131_s23  ;;  %v1923_v37 = vadd.f32 %v3854_v3, %v1922_v23  ;;  %v2026_v12 = vmul.f32 %v5113_v44, %v1919_v2  ;;  %v5120_v23 = vld [vmem:[%s6542_s1 + $0x38] sm:$0xff] }
0x1044   :  { %v5873_v5 = vadd.f32 %v3855_v14, %v1924_v4  ;;  %v5119_v14 = vld [vmem:[%s6542_s1 + $0x30] sm:$0xff] }
0x1045   :  { %v2027_v62 = vmul.f32 %v5117_v59, %v1923_v37 }
0x1046   :  { %v1928_v40 = vpop.f32.mrb[20].mxu1  ;;  %v4559_v41 = vpack.c.bf16 %v5873_v5, %v5871_v28  ;;  %v5882_v43 = vpack.i.bf16 %v5873_v5, %v5871_v28 }
0x1047   :  { %v1929_v35 = vadd.f32 %v3857_v36, %v1928_v40  ;;  %2032 = vrot.lane.b32.xlu1 %v1923_v37, %s5131_s23  ;;  %v1930_v8 = vpop.f32.mrb[21].mxu1 }
0x1048   :  { %v1932_v16 = vpop.f32.mrb[22].mxu1  ;;  %4560 = vmatprep.subr.bf16.mxu0 %v4559_v41  ;;  %v5892_v17 = vadd.f32 %v3858_v29, %v1930_v8  ;;  %v5123_v8 = vld [vmem:[%s6542_s1 + $0x50] sm:$0xff] }
0x1049   :  { %v1934_v26 = vpop.f32.mrb[23].mxu1  ;;  %4562 = vmatpush3.bf16.msra.mxu0 %v4559_v41  ;;  %2034 = vrot.lane.b32.xlu0 %v1929_v35, %s5131_s23  ;;  %v1933_v31 = vadd.f32 %v3860_v30, %v1932_v16  ;;  %v5122_v41 = vld [vmem:[%s6542_s1 + $0x18] sm:$0xff] }
0x104a   :  { %v5897_v6 = vadd.f32 %v3861_v15, %v1934_v26 }
0x104b   :  { %2048 = vrot.lane.b32.xlu1 %v1923_v37, %s5130_s22  ;;  %v5121_v37 = vld [vmem:[%s6542_s1 + $0x10] sm:$0xff]  ;;  %v2029_v29 = vmul.f32 %v5122_v41, %v1933_v31  ;;  %v6022_v41 = vld [vmem:[%s6542_s1 + $0x78] sm:$0xff] }
0x104c   :  { %v4563_v21 = vpack.c.bf16 %v5897_v6, %v5892_v17  ;;  %v5904_v20 = vpack.i.bf16 %v5897_v6, %v5892_v17  ;;  %v2028_v40 = vmul.f32 %v5121_v37, %v1929_v35  ;;  %v6016_v37 = vld [vmem:[%s6542_s1 + $0x70] sm:$0xff] }
0x104d   :  { %2050 = vrot.lane.b32.xlu0 %v1929_v35, %s5130_s22  ;;  %v5124_v35 = vld [vmem:[%s6542_s1 + $0x58] sm:$0xff] }
0x104e   :  { %v5907_v32 = vpop.f32.mrb[24].mxu1  ;;  %4564 = vmatprep.subr.bf16.mxu0 %v4563_v21 }
0x104f   :  { %v5912_v9 = vpop.f32.mrb[25].mxu1  ;;  %2036 = vrot.lane.b32.xlu1 %v1933_v31, %s5131_s23  ;;  %4566 = vmatpush3.bf16.msra.mxu0 %v4563_v21 }
0x1050   :  { %v5915_v48 = vpop.f32.mrb[26].mxu1 }
0x1051   :  { %v5917_v49 = vpop.f32.mrb[27].mxu1  ;;  %2065 = vrot.lane.b32.xlu0 %v3873_v55, %s5132_s11 }
0x1053   :  { %2052 = vrot.lane.b32.xlu1 %v1933_v31, %s5130_s22 }
0x10b5   :  { %v2047_v52 = vpop.permute.xlu1 %2046  ;;  %v2031_v24 = vpop.permute.xlu0 %2030 }
0x10b6   :  { %v2038_v47 = vmul.f32 %v5114_v18, %v2031_v24  ;;  %v2054_v53 = vmul.f32 %v5115_v19, %v2047_v52 }
0x10b8   :  { %v2042_v56 = vadd.f32 %v2038_v47, %v2026_v12 }
0x10b9   :  { %v2033_v1 = vpop.permute.xlu1 %2032 }
0x10ba   :  { %v5930_v57 = vadd.f32 %v2054_v53, %v2042_v56  ;;  %v2039_v25 = vmul.f32 %v5116_v58, %v2033_v1 }
0x10bb   :  { %v2035_v61 = vpop.permute.xlu0 %2034 }
0x10bc   :  { %4321 = vmatprep.mubr.msk.f32.mxu1 %vm385_vm1, %v5930_v57  ;;  %v2043_v38 = vadd.f32 %v2039_v25, %v2027_v62  ;;  %v2040_v3 = vmul.f32 %v5119_v14, %v2035_v61 }
0x10bd   :  { %v2049_v39 = vpop.permute.xlu1 %2048 }
0x10be   :  { %v2055_v0 = vmul.f32 %v5118_v63, %v2049_v39  ;;  %v2044_v30 = vadd.f32 %v2040_v3, %v2028_v40  ;;  %v6002_v39 = vld [vmem:[%s6542_s1 + $0x68] sm:$0xff]  ;;  %v6008_v63 = vld [vmem:[%s6542_s1 + $0x60] sm:$0xff] }
0x10bf   :  { %v2051_v27 = vpop.permute.xlu0 %2050 }
0x10c0   :  { %v5943_v2 = vadd.f32 %v2055_v0, %v2043_v38  ;;  %v2056_v15 = vmul.f32 %v5123_v8, %v2051_v27 }
0x10c1   :  { %v2037_v13 = vpop.permute.xlu1 %2036 }
0x10c2   :  { %v2041_v4 = vmul.f32 %v5120_v23, %v2037_v13  ;;  %v5953_v36 = vpack.i.bf16 %v5943_v2, %v5930_v57  ;;  %v5971_v52 = vadd.f32 %v2056_v15, %v2044_v30 }
0x10c3   :  { %v5966_v26 = vpop.permute.xlu0 %2065 }
0x10c4   :  { %4744 = vrot.lane.b32.xlu1 %v5953_v36, %s5132_s11  ;;  %v2045_v21 = vadd.f32 %v2041_v4, %v2029_v29 }
0x10c5   :  { %v2053_v16 = vpop.permute.xlu1 %2052 }
0x10c6   :  { %v2057_v55 = vmul.f32 %v5124_v35, %v2053_v16 }
0x10c8   :  { %v5973_v31 = vadd.f32 %v2057_v55, %v2045_v21  ;;  %2081 = vrot.lane.b32.xlu1 %v5966_v26, %s5132_s11 }
0x10ca   :  { %v5979_v24 = vpack.i.bf16 %v5973_v31, %v5971_v52 }
0x10cc   :  { %4749 = vrot.lane.b32.xlu0 %v5979_v24, %s5132_s11 }
0x1136   :  { %v4745_v44 = vpop.permute.xlu1 %4744 }
0x1137   :  { %v4747_v12 = vunpack.i.h.bf16 %v4745_v44  ;;  %v4746_v18 = vunpack.i.l.bf16 %v4745_v44 }
0x1139   :  { %v4547_v47 = vpack.c.bf16 %v4747_v12, %v4746_v18 }
0x113a   :  { %v2082_v58 = vpop.permute.xlu1 %2081 }
0x113b   :  { %4549 = vmatprep.subr.msk.bf16.mxu1 %vm5382_vm2, %v4547_v47 }
0x113c   :  { %4552 = vmatpush3.bf16.xpose.msk.msra.mxu1 %vm5382_vm2, %v4547_v47 }
0x113e   :  { %v4750_v19 = vpop.permute.xlu0 %4749 }
0x113f   :  { %v4752_v53 = vunpack.i.h.bf16 %v4750_v19  ;;  %v4751_v56 = vunpack.i.l.bf16 %v4750_v19 }
0x1141   :  { %v4553_v1 = vpack.c.bf16 %v4752_v53, %v4751_v56 }
0x1143   :  { %4555 = vmatprep.subr.msk.bf16.mxu1 %vm5382_vm2, %v4553_v1 }
0x1144   :  { %4558 = vmatpush3.bf16.xpose.msk.msra.mxu1 %vm5382_vm2, %v4553_v1 }
0x1145   :  { %4319 = vmatprep.subr.msk.mxu1 %vm385_vm1, %v2082_v58 }
0x114c   :  { %4320 = vmatpush3.xpose.msk.msra.mxu1 %vm385_vm1, %v2082_v58 }
0x114f   :  { %4322 = vmatmul.mubr.msk.f32.vlgmr.msra.gmra.mrb[28].mxu1 %vm385_vm1, %v5943_v2 }
0x1150   :  { %4324 = vmatprep.mubr.msk.f32.mxu1 %vm385_vm1, %v5971_v52 }
0x1153   :  { %4325 = vmatmul.mubr.msk.f32.gmra.mrb[30].mxu1 %vm385_vm1, %v5973_v31 }
0x1222   :  { %v4323_v25 = vpop.f32.mrb[28].mxu1 }
0x1223   :  { %v2187_v61 = vmul.f32 0.25, %v4323_v25  ;;  %v2167_v59 = vpop.f32.mrb[29].mxu1 }
0x1224   :  { %v2186_v62 = vmul.f32 0.25, %v2167_v59 }
0x1225   :  { %v2191_v38 = vadd.f32 %v6002_v39, %v2187_v61 }
0x1226   :  { %v2190_v0 = vadd.f32 %v6008_v63, %v2186_v62  ;;  %v4326_v27 = vpop.f32.mrb[30].mxu1 }
0x1227   :  { %v2177_v13 = vpop.f32.mrb[31].mxu1  ;;  %v2197_v14 = vsel %vm497_vm3, %v2191_v38, -inf  ;;  %v2189_v3 = vmul.f32 0.25, %v4326_v27  ;;  %v6034_v27 = vld [vmem:[%s6541_s5 + $0x6] sm:$0x3] }
0x1228   :  { %v2188_v23 = vmul.f32 0.25, %v2177_v13  ;;  %2198 = vmax.xlane.f32.xlu1 %v2197_v14  ;;  %v2194_v4 = vsel %vm497_vm3, %v2190_v0, -inf  ;;  %4335 = vmatprep.subr.msk.mxu0 %vm554_vm4, %v6034_v27 }
0x1229   :  { %2195 = vmax.xlane.f32.xlu0 %v2194_v4  ;;  %v2193_v29 = vadd.f32 %v6022_v41, %v2189_v3  ;;  %4336 = vmatpush3.msk.msra.mxu0 %vm554_vm4, %v6034_v27 }
0x122a   :  { %v2192_v40 = vadd.f32 %v6016_v37, %v2188_v23 }
0x122b   :  { %v2203_v15 = vsel %vm497_vm3, %v2193_v29, -inf }
0x122c   :  { %v2200_v8 = vsel %vm497_vm3, %v2192_v40, -inf }
0x122d   :  { %2201 = vmax.xlane.f32.xlu0 %v2200_v8 }
0x1231   :  { %2204 = vmax.xlane.f32.xlu0 %v2203_v15 }
0x12b5   :  { %v2199_v16 = vpop.xlane.xlu1 %2198 }
0x12b6   :  { %v2207_v30 = vsub.f32 %v2191_v38, %v2199_v16  ;;  %v2196_v21 = vpop.xlane.xlu0 %2195 }
0x12b7   :  { %v2206_v35 = vsub.f32 %v2190_v0, %v2196_v21 }
0x12b8   :  { %v2212_v55 = vmul.f32 1.442695, %v2207_v30 }
0x12b9   :  { %v2210_v44 = vmul.f32 1.442695, %v2206_v35 }
0x12ba   :  { %4973 = vpow2.f32 %v2212_v55  ;;  %v2202_v12 = vpop.xlane.xlu0 %2201 }
0x12bb   :  { %4975 = vpow2.f32 %v2210_v44  ;;  %v2208_v18 = vsub.f32 %v2192_v40, %v2202_v12 }
0x12bd   :  { %v2214_v47 = vmul.f32 1.442695, %v2208_v18 }
0x12be   :  { %v2205_v19 = vpop.xlane.xlu0 %2204 }
0x12bf   :  { %4977 = vpow2.f32 %v2214_v47  ;;  %v2209_v53 = vsub.f32 %v2193_v29, %v2205_v19 }
0x12c1   :  { %v2216_v56 = vmul.f32 1.442695, %v2209_v53 }
0x12c3   :  { %4979 = vpow2.f32 %v2216_v56 }
0x12c4   :  { %v4974_v1 = vpop.eup %4973 }
0x12c5   :  { %v4976_v58 = vpop.eup %4975  ;;  %v2221_v25 = vsel %vm497_vm3, %v4974_v1, 0.0 }
0x12c6   :  { %2222 = vadd.xlane.f32.xlu1 %v2221_v25  ;;  %v2218_v61 = vsel %vm497_vm3, %v4976_v58, 0.0 }
0x12c7   :  { %2219 = vadd.xlane.f32.xlu0 %v2218_v61 }
0x12c9   :  { %v4978_v59 = vpop.eup %4977 }
0x12ca   :  { %v2224_v62 = vsel %vm497_vm3, %v4978_v59, 0.0 }
0x12cb   :  { %2225 = vadd.xlane.f32.xlu0 %v2224_v62 }
0x12cd   :  { %v4980_v38 = vpop.eup %4979 }
0x12ce   :  { %v2227_v0 = vsel %vm497_vm3, %v4980_v38, 0.0 }
0x12cf   :  { %2228 = vadd.xlane.f32.xlu1 %v2227_v0 }
0x12e0   :  { %4759 = vrot.lane.b32.xlu1 %v5979_v24, %s5133_s28 }
0x12e1   :  { %4754 = vrot.lane.b32.xlu0 %v5953_v36, %s5133_s28 }
0x12e4   :  { %2354 = vrot.lane.b32.xlu1 %v5966_v26, %s5133_s28 }
0x12e5   :  { %2340 = vrot.lane.b32.xlu0 %v5943_v2, %s5134_s29 }
0x12e8   :  { %2338 = vrot.lane.b32.xlu1 %v5930_v57, %s5134_s29 }
0x12e9   :  { %2344 = vrot.lane.b32.xlu0 %v5973_v31, %s5134_s29 }
0x12ec   :  { %2342 = vrot.lane.b32.xlu1 %v5971_v52, %s5134_s29 }
0x12f0   :  { %4764 = vrot.lane.b32.xlu1 %v5882_v43, %s5134_s29 }
0x1353   :  { %v2223_v13 = vpop.xlane.xlu1 %2222 }
0x1354   :  { %4981 = vrcp.f32 %v2223_v13  ;;  %v2220_v14 = vpop.xlane.xlu0 %2219 }
0x1355   :  { %4983 = vrcp.f32 %v2220_v14 }
0x1358   :  { %v2226_v3 = vpop.xlane.xlu0 %2225 }
0x1359   :  { %4985 = vrcp.f32 %v2226_v3 }
0x135c   :  { %v2229_v23 = vpop.xlane.xlu1 %2228  ;;  %v4755_v4 = vpop.permute.xlu0 %4754 }
0x135d   :  { %4987 = vrcp.f32 %v2229_v23  ;;  %v4757_v40 = vunpack.i.h.bf16 %v4755_v4  ;;  %v4756_v29 = vunpack.i.l.bf16 %v4755_v4 }
0x135e   :  { %v4982_v8 = vpop.eup %4981 }
0x135f   :  { %v4984_v15 = vpop.eup %4983  ;;  %v4567_v16 = vpack.c.bf16 %v4757_v40, %v4756_v29  ;;  %v2233_v44 = vmul.f32 %v4982_v8, %v4974_v1 }
0x1360   :  { %v4760_v30 = vpop.permute.xlu1 %4759  ;;  %v2231_v21 = vmul.f32 %v4984_v15, %v4976_v58  ;;  %v2341_v0 = vpop.permute.xlu0 %2340 }
0x1361   :  { %v4762_v35 = vunpack.i.h.bf16 %v4760_v30  ;;  %v4761_v55 = vunpack.i.l.bf16 %v4760_v30  ;;  %4569 = vmatprep.subr.msk.bf16.mxu0 %vm5382_vm2, %v4567_v16 }
0x1362   :  { %4337 = vmatprep.mubr.msk.f32.mxu0 %vm497_vm3, %v2231_v21 }
0x1363   :  { %v4986_v12 = vpop.eup %4985  ;;  %v4573_v18 = vpack.c.bf16 %v4762_v35, %v4761_v55  ;;  %4338 = vmatmul.mubr.msk.f32.vlgmr.msra.gmra.mrb[32].mxu0 %vm497_vm3, %v2233_v44 }
0x1364   :  { %4572 = vmatpush3.bf16.xpose.msk.msra.mxu0 %vm5382_vm2, %v4567_v16  ;;  %v2355_v47 = vpop.permute.xlu1 %2354  ;;  %v2235_v19 = vmul.f32 %v4986_v12, %v4978_v59 }
0x1365   :  { %4575 = vmatprep.subr.msk.bf16.mxu0 %vm5382_vm2, %v4573_v18 }
0x1366   :  { %4340 = vmatprep.mubr.msk.f32.mxu0 %vm497_vm3, %v2235_v19 }
0x1367   :  { %v4988_v53 = vpop.eup %4987 }
0x1368   :  { %v2339_v56 = vpop.permute.xlu1 %2338  ;;  %v2237_v58 = vmul.f32 %v4988_v53, %v4980_v38  ;;  %v2345_v38 = vpop.permute.xlu0 %2344 }
0x136a   :  { %4341 = vmatmul.mubr.msk.f32.gmra.mrb[34].mxu0 %vm497_vm3, %v2237_v58 }
0x136b   :  { %4353 = vmatprep.mubr.msk.f32.mxu0 %vm385_vm1, %v2339_v56 }
0x136c   :  { %4578 = vmatpush3.bf16.xpose.msk.msra.mxu0 %vm5382_vm2, %v4573_v18  ;;  %v2343_v1 = vpop.permute.xlu1 %2342 }
0x136d   :  { %4351 = vmatprep.subr.msk.mxu0 %vm385_vm1, %v2355_v47 }
0x1370   :  { %v4765_v25 = vpop.permute.xlu1 %4764 }
0x1371   :  { %v4767_v61 = vunpack.i.h.bf16 %v4765_v25  ;;  %v4766_v59 = vunpack.i.l.bf16 %v4765_v25 }
0x1373   :  { %v4579_v62 = vpack.c.bf16 %v4767_v61, %v4766_v59 }
0x1374   :  { %4352 = vmatpush3.xpose.msk.msra.mxu0 %vm385_vm1, %v2355_v47 }
0x1375   :  { %4580 = vmatprep.subr.bf16.mxu1 %v4579_v62 }
0x1376   :  { %4582 = vmatpush3.bf16.msra.mxu1 %v4579_v62 }
0x1377   :  { %4354 = vmatmul.mubr.msk.f32.vlgmr.msra.gmra.mrb[36].mxu0 %vm385_vm1, %v2341_v0 }
0x1378   :  { %4356 = vmatprep.mubr.msk.f32.mxu0 %vm385_vm1, %v2343_v1 }
0x137b   :  { %4357 = vmatmul.mubr.msk.f32.gmra.mrb[38].mxu0 %vm385_vm1, %v2345_v38 }
0x1436   :  { %v6074_v13 = vpop.f32.mrb[32].mxu0 }
0x1437   :  { %v6076_v14 = vpop.f32.mrb[33].mxu0 }
0x143d   :  { %v6078_v3 = vpop.f32.mrb[34].mxu0 }
0x143e   :  { %v6080_v23 = vpop.f32.mrb[35].mxu0 }
0x144a   :  { %v4355_v4 = vpop.f32.mrb[36].mxu0 }
0x144b   :  { %v2460_v40 = vmul.f32 0.25, %v4355_v4  ;;  %v2440_v29 = vpop.f32.mrb[37].mxu0 }
0x144c   :  { %v2459_v8 = vmul.f32 0.25, %v2440_v29 }
0x144d   :  { %v2464_v15 = vadd.f32 %v6002_v39, %v2460_v40 }
0x144e   :  { %v2463_v16 = vadd.f32 %v6008_v63, %v2459_v8  ;;  %v4358_v30 = vpop.f32.mrb[38].mxu0 }
0x144f   :  { %v2462_v21 = vmul.f32 0.25, %v4358_v30  ;;  %v2450_v35 = vpop.f32.mrb[39].mxu0  ;;  %v2470_v55 = vsel %vm497_vm3, %v2464_v15, -inf }
0x1450   :  { %v2461_v44 = vmul.f32 0.25, %v2450_v35  ;;  %2471 = vmax.xlane.f32.xlu0 %v2470_v55  ;;  %v2467_v12 = vsel %vm497_vm3, %v2463_v16, -inf }
0x1451   :  { %v2466_v18 = vadd.f32 %v6022_v41, %v2462_v21  ;;  %2468 = vmax.xlane.f32.xlu1 %v2467_v12 }
0x1452   :  { %v2465_v47 = vadd.f32 %v6016_v37, %v2461_v44 }
0x1453   :  { %v2476_v19 = vsel %vm497_vm3, %v2466_v18, -inf }
0x1454   :  { %2477 = vmax.xlane.f32.xlu0 %v2476_v19  ;;  %v2473_v53 = vsel %vm497_vm3, %v2465_v47, -inf }
0x1458   :  { %2474 = vmax.xlane.f32.xlu0 %v2473_v53 }
0x1462   :  { %2523 = vrot.lane.b32.xlu1 %v6034_v27, %s5134_s29 }
0x1466   :  { %4779 = vrot.lane.b32.xlu1 %v5979_v24, %s5135_s30 }
0x146e   :  { %4769 = vrot.lane.b32.xlu0 %v5904_v20, %s5134_s29 }
0x14dd   :  { %v2472_v56 = vpop.xlane.xlu0 %2471 }
0x14de   :  { %v2480_v58 = vsub.f32 %v2464_v15, %v2472_v56  ;;  %v2469_v1 = vpop.xlane.xlu1 %2468 }
0x14df   :  { %v2479_v25 = vsub.f32 %v2463_v16, %v2469_v1 }
0x14e0   :  { %v2485_v61 = vmul.f32 1.442695, %v2480_v58 }
0x14e1   :  { %v2483_v59 = vmul.f32 1.442695, %v2479_v25  ;;  %v2478_v62 = vpop.xlane.xlu0 %2477 }
0x14e2   :  { %4989 = vpow2.f32 %v2485_v61  ;;  %v2524_v35 = vpop.permute.xlu1 %2523  ;;  %v2482_v16 = vsub.f32 %v2466_v18, %v2478_v62 }
0x14e3   :  { %4991 = vpow2.f32 %v2483_v59 }
0x14e4   :  { %v2489_v44 = vmul.f32 1.442695, %v2482_v16 }
0x14e5   :  { %v2475_v0 = vpop.xlane.xlu0 %2474 }
0x14e6   :  { %v2481_v55 = vsub.f32 %v2465_v47, %v2475_v0  ;;  %4993 = vpow2.f32 %v2489_v44  ;;  %v4780_v18 = vpop.permute.xlu1 %4779 }
0x14e8   :  { %v2487_v12 = vmul.f32 1.442695, %v2481_v55 }
0x14e9   :  { %v4770_v38 = vpop.permute.xlu0 %4769 }
0x14ea   :  { %v4772_v4 = vunpack.i.h.bf16 %v4770_v38  ;;  %v4771_v40 = vunpack.i.l.bf16 %v4770_v38  ;;  %4995 = vpow2.f32 %v2487_v12 }
0x14ec   :  { %v4990_v29 = vpop.eup %4989  ;;  %v4583_v8 = vpack.c.bf16 %v4772_v4, %v4771_v40  ;;  %v4782_v4 = vunpack.i.h.bf16 %v4780_v18  ;;  %v4781_v40 = vunpack.i.l.bf16 %v4780_v18 }
0x14ed   :  { %v4992_v30 = vpop.eup %4991  ;;  %v2494_v21 = vsel %vm497_vm3, %v4990_v29, 0.0 }
0x14ee   :  { %2495 = vadd.xlane.f32.xlu0 %v2494_v21  ;;  %4584 = vmatprep.subr.bf16.mxu1 %v4583_v8  ;;  %v2491_v15 = vsel %vm497_vm3, %v4992_v30, 0.0 }
0x14ef   :  { %2492 = vadd.xlane.f32.xlu1 %v2491_v15  ;;  %4586 = vmatpush3.bf16.msra.mxu1 %v4583_v8  ;;  %v4593_v15 = vpack.c.bf16 %v4782_v4, %v4781_v40 }
0x14f0   :  { %4367 = vmatprep.subr.msk.mxu1 %vm554_vm4, %v2524_v35  ;;  %v4994_v19 = vpop.eup %4993 }
0x14f1   :  { %v2500_v56 = vsel %vm497_vm3, %v4994_v19, 0.0 }
0x14f3   :  { %4368 = vmatpush3.msk.msra.mxu1 %vm554_vm4, %v2524_v35 }
0x14f4   :  { %v4996_v53 = vpop.eup %4995 }
0x14f5   :  { %v2497_v58 = vsel %vm497_vm3, %v4996_v53, 0.0 }
0x1500   :  { %2644 = vrot.lane.b32.xlu1 %v5966_v26, %s5135_s30 }
0x1504   :  { %4774 = vrot.lane.b32.xlu0 %v5953_v36, %s5135_s30 }
0x1523   :  { %2501 = vadd.xlane.f32.xlu0 %v2500_v56 }
0x1524   :  { %2498 = vadd.xlane.f32.xlu1 %v2497_v58 }
0x1535   :  { %2628 = vrot.lane.b32.xlu1 %v5930_v57, %s5136_s8 }
0x1539   :  { %2630 = vrot.lane.b32.xlu0 %v5943_v2, %s5136_s8  ;;  %2632 = vrot.lane.b32.xlu1 %v5971_v52, %s5136_s8 }
0x153d   :  { %2634 = vrot.lane.b32.xlu0 %v5973_v31, %s5136_s8  ;;  %4784 = vrot.lane.b32.xlu1 %v5882_v43, %s5136_s8 }
0x157b   :  { %v2496_v47 = vpop.xlane.xlu0 %2495 }
0x157c   :  { %4997 = vrcp.f32 %v2496_v47  ;;  %v2493_v1 = vpop.xlane.xlu1 %2492 }
0x157d   :  { %4999 = vrcp.f32 %v2493_v1 }
0x157f   :  { %v4775_v25 = vpop.permute.xlu0 %4774 }
0x1580   :  { %v4777_v61 = vunpack.i.h.bf16 %v4775_v25  ;;  %v4776_v59 = vunpack.i.l.bf16 %v4775_v25  ;;  %v2645_v35 = vpop.permute.xlu1 %2644 }
0x1582   :  { %v4587_v62 = vpack.c.bf16 %v4777_v61, %v4776_v59 }
0x1584   :  { %4589 = vmatprep.subr.msk.bf16.mxu1 %vm5382_vm2, %v4587_v62 }
0x1586   :  { %v4998_v0 = vpop.eup %4997 }
0x1587   :  { %v5000_v38 = vpop.eup %4999  ;;  %v2506_v21 = vmul.f32 %v4998_v0, %v4990_v29 }
0x1588   :  { %v2504_v8 = vmul.f32 %v5000_v38, %v4992_v30 }
0x158a   :  { %4369 = vmatprep.mubr.msk.f32.mxu1 %vm497_vm3, %v2504_v8 }
0x158b   :  { %4370 = vmatmul.mubr.msk.f32.vlgmr.msra.gmra.mrb[32].mxu1 %vm497_vm3, %v2506_v21 }
0x158c   :  { %4592 = vmatpush3.bf16.xpose.msk.msra.mxu1 %vm5382_vm2, %v4587_v62 }
0x158d   :  { %4595 = vmatprep.subr.msk.bf16.mxu1 %vm5382_vm2, %v4593_v15 }
0x1594   :  { %4598 = vmatpush3.bf16.xpose.msk.msra.mxu1 %vm5382_vm2, %v4593_v15 }
0x1595   :  { %4383 = vmatprep.subr.msk.mxu1 %vm385_vm1, %v2645_v35 }
0x159c   :  { %4384 = vmatpush3.xpose.msk.msra.mxu1 %vm385_vm1, %v2645_v35 }
0x15b0   :  { %v2502_v29 = vpop.xlane.xlu0 %2501 }
0x15b1   :  { %5001 = vrcp.f32 %v2502_v29  ;;  %v2499_v30 = vpop.xlane.xlu1 %2498 }
0x15b2   :  { %5003 = vrcp.f32 %v2499_v30 }
0x15b4   :  { %v2631_v61 = vpop.permute.xlu0 %2630 }
0x15b5   :  { %v2629_v16 = vpop.permute.xlu1 %2628 }
0x15b8   :  { %v2635_v59 = vpop.permute.xlu0 %2634 }
0x15b9   :  { %v2633_v55 = vpop.permute.xlu1 %2632 }
0x15bb   :  { %v5002_v44 = vpop.eup %5001 }
0x15bc   :  { %v5004_v12 = vpop.eup %5003  ;;  %v2510_v1 = vmul.f32 %v5002_v44, %v4994_v19 }
0x15bd   :  { %v4785_v56 = vpop.permute.xlu1 %4784  ;;  %v2508_v58 = vmul.f32 %v5004_v12, %v4996_v53 }
0x15be   :  { %v4787_v18 = vunpack.i.h.bf16 %v4785_v56  ;;  %v4786_v47 = vunpack.i.l.bf16 %v4785_v56 }
0x15bf   :  { %4372 = vmatprep.mubr.msk.f32.mxu1 %vm497_vm3, %v2508_v58 }
0x15c0   :  { %v4599_v25 = vpack.c.bf16 %v4787_v18, %v4786_v47  ;;  %4373 = vmatmul.mubr.msk.f32.gmra.mrb[34].mxu1 %vm497_vm3, %v2510_v1 }
0x15c1   :  { %4385 = vmatprep.mubr.msk.f32.mxu1 %vm385_vm1, %v2629_v16 }
0x15c2   :  { %4600 = vmatprep.subr.bf16.mxu0 %v4599_v25 }
0x15c3   :  { %4602 = vmatpush3.bf16.msra.mxu0 %v4599_v25 }
0x15c4   :  { %4386 = vmatmul.mubr.msk.f32.vlgmr.msra.gmra.mrb[36].mxu1 %vm385_vm1, %v2631_v61 }
0x15c5   :  { %4388 = vmatprep.mubr.msk.f32.mxu1 %vm385_vm1, %v2633_v55 }
0x15c8   :  { %4389 = vmatmul.mubr.msk.f32.gmra.mrb[38].mxu1 %vm385_vm1, %v2635_v59 }
0x165e   :  { %v6134_v53 = vpop.f32.mrb[32].mxu1 }
0x165f   :  { %v6136_v19 = vpop.f32.mrb[33].mxu1 }
0x1660   :  { %v4813_v62 = vpack.i.bf16 %v6134_v53, %v6136_v19  ;;  %v3859_v53 = vld [vmem:[%s6540_s2 + $0xa0] sm:$0xff] }
0x1693   :  { %v6140_v0 = vpop.f32.mrb[34].mxu1 }
0x1694   :  { %v6142_v38 = vpop.f32.mrb[35].mxu1 }
0x1695   :  { %v4818_v4 = vpack.i.bf16 %v6140_v0, %v6142_v38 }
0x1697   :  { %v4387_v40 = vpop.f32.mrb[36].mxu1 }
0x1698   :  { %v2750_v8 = vmul.f32 0.25, %v4387_v40  ;;  %v2730_v21 = vpop.f32.mrb[37].mxu1 }
0x1699   :  { %v2749_v15 = vmul.f32 0.25, %v2730_v21 }
0x169a   :  { %v2754_v35 = vadd.f32 %v6002_v39, %v2750_v8 }
0x169b   :  { %v2753_v29 = vadd.f32 %v6008_v63, %v2749_v15  ;;  %v4390_v30 = vpop.f32.mrb[38].mxu1 }
0x169c   :  { %v2752_v16 = vmul.f32 0.25, %v4390_v30  ;;  %v2740_v55 = vpop.f32.mrb[39].mxu1  ;;  %v2760_v44 = vsel %vm497_vm3, %v2754_v35, -inf }
0x169d   :  { %v2751_v12 = vmul.f32 0.25, %v2740_v55  ;;  %2761 = vmax.xlane.f32.xlu0 %v2760_v44  ;;  %v2757_v56 = vsel %vm497_vm3, %v2753_v29, -inf }
0x169e   :  { %v2756_v58 = vadd.f32 %v6022_v41, %v2752_v16  ;;  %2758 = vmax.xlane.f32.xlu1 %v2757_v56 }
0x169f   :  { %v2755_v18 = vadd.f32 %v6016_v37, %v2751_v12 }
0x16a0   :  { %v2766_v47 = vsel %vm497_vm3, %v2756_v58, -inf }
0x16a1   :  { %2767 = vmax.xlane.f32.xlu0 %v2766_v47  ;;  %v2763_v1 = vsel %vm497_vm3, %v2755_v18, -inf }
0x16a5   :  { %2764 = vmax.xlane.f32.xlu0 %v2763_v1 }
0x16af   :  { %2809 = vrot.lane.b32.xlu1 %v6034_v27, %s5136_s8 }
0x16b3   :  { %4799 = vrot.lane.b32.xlu1 %v5979_v24, %s5137_s9 }
0x16b7   :  { %2930 = vrot.lane.b32.xlu1 %v5966_v26, %s5137_s9 }
0x16bb   :  { %4789 = vrot.lane.b32.xlu0 %v5904_v20, %s5136_s8 }
0x172a   :  { %v2762_v25 = vpop.xlane.xlu0 %2761 }
0x172b   :  { %v2770_v61 = vsub.f32 %v2754_v35, %v2762_v25  ;;  %v2759_v59 = vpop.xlane.xlu1 %2758 }
0x172c   :  { %v2769_v40 = vsub.f32 %v2753_v29, %v2759_v59 }
0x172d   :  { %v2775_v8 = vmul.f32 1.442695, %v2770_v61 }
0x172e   :  { %v2773_v21 = vmul.f32 1.442695, %v2769_v40  ;;  %v2768_v15 = vpop.xlane.xlu0 %2767 }
0x172f   :  { %5005 = vpow2.f32 %v2775_v8  ;;  %v2810_v47 = vpop.permute.xlu1 %2809  ;;  %v2772_v29 = vsub.f32 %v2756_v58, %v2768_v15 }
0x1730   :  { %5007 = vpow2.f32 %v2773_v21 }
0x1731   :  { %v2779_v25 = vmul.f32 1.442695, %v2772_v29 }
0x1732   :  { %v2765_v30 = vpop.xlane.xlu0 %2764 }
0x1733   :  { %v2771_v1 = vsub.f32 %v2755_v18, %v2765_v30  ;;  %5009 = vpow2.f32 %v2779_v25 }
0x1735   :  { %v2777_v61 = vmul.f32 1.442695, %v2771_v1 }
0x1736   :  { %v4790_v16 = vpop.permute.xlu0 %4789 }
0x1737   :  { %v4792_v55 = vunpack.i.h.bf16 %v4790_v16  ;;  %v4791_v44 = vunpack.i.l.bf16 %v4790_v16  ;;  %5011 = vpow2.f32 %v2777_v61 }
0x1739   :  { %v5006_v24 = vpop.eup %5005  ;;  %v4603_v12 = vpack.c.bf16 %v4792_v55, %v4791_v44 }
0x173a   :  { %v5008_v56 = vpop.eup %5007  ;;  %v2784_v26 = vsel %vm497_vm3, %v5006_v24, 0.0 }
0x173b   :  { %2785 = vadd.xlane.f32.xlu0 %v2784_v26  ;;  %4604 = vmatprep.subr.bf16.mxu0 %v4603_v12  ;;  %v2781_v35 = vsel %vm497_vm3, %v5008_v56, 0.0 }
0x173c   :  { %2782 = vadd.xlane.f32.xlu1 %v2781_v35  ;;  %4606 = vmatpush3.bf16.msra.mxu0 %v4603_v12 }
0x173d   :  { %4399 = vmatprep.subr.msk.mxu0 %vm554_vm4, %v2810_v47  ;;  %v5010_v59 = vpop.eup %5009 }
0x173e   :  { %v2790_v8 = vsel %vm497_vm3, %v5010_v59, 0.0 }
0x1740   :  { %4400 = vmatpush3.msk.msra.mxu0 %vm554_vm4, %v2810_v47 }
0x1741   :  { %v5012_v40 = vpop.eup %5011 }
0x1742   :  { %v2787_v21 = vsel %vm497_vm3, %v5012_v40, 0.0 }
0x174d   :  { %2914 = vrot.lane.b32.xlu1 %v5930_v57, %s5138_s10  ;;  %v4800_v57 = vpop.permute.xlu1 %4799 }
0x174e   :  { %v4802_v12 = vunpack.i.h.bf16 %v4800_v57 }
0x1751   :  { %4794 = vrot.lane.b32.xlu0 %v5953_v36, %s5137_s9  ;;  %v2931_v36 = vpop.permute.xlu1 %2930 }
0x1770   :  { %2791 = vadd.xlane.f32.xlu0 %v2790_v8 }
0x1771   :  { %2788 = vadd.xlane.f32.xlu1 %v2787_v21 }
0x1782   :  { %2918 = vrot.lane.b32.xlu1 %v5971_v52, %s5138_s10 }
0x1786   :  { %2916 = vrot.lane.b32.xlu0 %v5943_v2, %s5138_s10  ;;  %v4801_v2 = vunpack.i.l.bf16 %v4800_v57 }
0x178a   :  { %2920 = vrot.lane.b32.xlu0 %v5973_v31, %s5138_s10  ;;  %v4613_v31 = vpack.c.bf16 %v4802_v12, %v4801_v2 }
0x17c8   :  { %v2786_v58 = vpop.xlane.xlu0 %2785 }
0x17c9   :  { %5013 = vrcp.f32 %v2786_v58  ;;  %v2783_v18 = vpop.xlane.xlu1 %2782 }
0x17ca   :  { %5015 = vrcp.f32 %v2783_v18 }
0x17cc   :  { %v4795_v15 = vpop.permute.xlu0 %4794 }
0x17cd   :  { %v4797_v30 = vunpack.i.h.bf16 %v4795_v15  ;;  %v4796_v16 = vunpack.i.l.bf16 %v4795_v15 }
0x17cf   :  { %v4607_v55 = vpack.c.bf16 %v4797_v30, %v4796_v16 }
0x17d1   :  { %4609 = vmatprep.subr.msk.bf16.mxu0 %vm5382_vm2, %v4607_v55 }
0x17d3   :  { %v5014_v52 = vpop.eup %5013 }
0x17d4   :  { %v5016_v44 = vpop.eup %5015  ;;  %v2796_v35 = vmul.f32 %v5014_v52, %v5006_v24 }
0x17d5   :  { %v2794_v26 = vmul.f32 %v5016_v44, %v5008_v56  ;;  %v2915_v56 = vpop.permute.xlu1 %2914 }
0x17d7   :  { %4401 = vmatprep.mubr.msk.f32.mxu0 %vm497_vm3, %v2794_v26 }
0x17d8   :  { %4402 = vmatmul.mubr.msk.f32.vlgmr.msra.gmra.mrb[40].mxu0 %vm497_vm3, %v2796_v35 }
0x17d9   :  { %4612 = vmatpush3.bf16.xpose.msk.msra.mxu0 %vm5382_vm2, %v4607_v55 }
0x17da   :  { %4615 = vmatprep.subr.msk.bf16.mxu0 %vm5382_vm2, %v4613_v31 }
0x17e1   :  { %4618 = vmatpush3.bf16.xpose.msk.msra.mxu0 %vm5382_vm2, %v4613_v31 }
0x17e2   :  { %4415 = vmatprep.subr.msk.mxu0 %vm385_vm1, %v2931_v36 }
0x17e9   :  { %4416 = vmatpush3.xpose.msk.msra.mxu0 %vm385_vm1, %v2931_v36 }
0x17fd   :  { %v2792_v24 = vpop.xlane.xlu0 %2791 }
0x17fe   :  { %5017 = vrcp.f32 %v2792_v24  ;;  %v2789_v47 = vpop.xlane.xlu1 %2788 }
0x17ff   :  { %5019 = vrcp.f32 %v2789_v47 }
0x1801   :  { %v2917_v8 = vpop.permute.xlu0 %2916 }
0x1802   :  { %v2919_v33 = vpop.permute.xlu1 %2918 }
0x1805   :  { %v2921_v21 = vpop.permute.xlu0 %2920 }
0x1808   :  { %v5018_v29 = vpop.eup %5017 }
0x1809   :  { %v5020_v1 = vpop.eup %5019  ;;  %v2800_v61 = vmul.f32 %v5018_v29, %v5010_v59 }
0x180a   :  { %v2798_v25 = vmul.f32 %v5020_v1, %v5012_v40 }
0x180c   :  { %4404 = vmatprep.mubr.msk.f32.mxu0 %vm497_vm3, %v2798_v25 }
0x180d   :  { %4405 = vmatmul.mubr.msk.f32.gmra.mrb[42].mxu0 %vm497_vm3, %v2800_v61 }
0x180e   :  { %4417 = vmatprep.mubr.msk.f32.mxu0 %vm385_vm1, %v2915_v56 }
0x1811   :  { %4418 = vmatmul.mubr.msk.f32.vlgmr.msra.gmra.mrb[44].mxu0 %vm385_vm1, %v2917_v8 }
0x1812   :  { %4420 = vmatprep.mubr.msk.f32.mxu0 %vm385_vm1, %v2919_v33 }
0x1815   :  { %4421 = vmatmul.mubr.msk.f32.gmra.mrb[46].mxu0 %vm385_vm1, %v2921_v21 }
0x18ab   :  { %v6196_v57 = vpop.f32.mrb[40].mxu0 }
0x18ac   :  { %v6198_v36 = vpop.f32.mrb[41].mxu0 }
0x18ad   :  { %v4823_v59 = vpack.i.bf16 %v6196_v57, %v6198_v36 }
0x18e0   :  { %v6202_v40 = vpop.f32.mrb[42].mxu0 }
0x18e1   :  { %v6204_v58 = vpop.f32.mrb[43].mxu0 }
0x18e2   :  { %v4828_v18 = vpack.i.bf16 %v6202_v40, %v6204_v58 }
0x18e4   :  { %v4419_v15 = vpop.f32.mrb[44].mxu0 }
0x18e5   :  { %v3036_v30 = vmul.f32 0.25, %v4419_v15  ;;  %v3016_v16 = vpop.f32.mrb[45].mxu0 }
0x18e6   :  { %v3035_v55 = vmul.f32 0.25, %v3016_v16 }
0x18e7   :  { %v3040_v52 = vadd.f32 %v6002_v39, %v3036_v30 }
0x18e8   :  { %v3039_v44 = vadd.f32 %v6008_v63, %v3035_v55  ;;  %v4422_v12 = vpop.f32.mrb[46].mxu0 }
0x18e9   :  { %v3026_v2 = vpop.f32.mrb[47].mxu0  ;;  %v3046_v26 = vsel %vm497_vm3, %v3040_v52, -inf  ;;  %v3038_v35 = vmul.f32 0.25, %v4422_v12 }
0x18ea   :  { %v3037_v31 = vmul.f32 0.25, %v3026_v2  ;;  %3047 = vmax.xlane.f32.xlu0 %v3046_v26  ;;  %v3043_v56 = vsel %vm497_vm3, %v3039_v44, -inf }
0x18eb   :  { %3044 = vmax.xlane.f32.xlu1 %v3043_v56  ;;  %v3042_v47 = vadd.f32 %v6022_v41, %v3038_v35 }
0x18ec   :  { %v3041_v24 = vadd.f32 %v6016_v37, %v3037_v31 }
0x18ed   :  { %v3052_v39 = vsel %vm497_vm3, %v3042_v47, -inf }
0x18ee   :  { %v3049_v29 = vsel %vm497_vm3, %v3041_v24, -inf }
0x18ef   :  { %3050 = vmax.xlane.f32.xlu0 %v3049_v29 }
0x18f3   :  { %3053 = vmax.xlane.f32.xlu0 %v3052_v39 }
0x18fc   :  { %4804 = vrot.lane.b32.xlu1 %v5882_v43, %s5138_s10 }
0x1977   :  { %v3048_v63 = vpop.xlane.xlu0 %3047 }
0x1978   :  { %v3056_v1 = vsub.f32 %v3040_v52, %v3048_v63  ;;  %v3045_v25 = vpop.xlane.xlu1 %3044 }
0x1979   :  { %v3055_v61 = vsub.f32 %v3039_v44, %v3045_v25 }
0x197a   :  { %v3061_v8 = vmul.f32 1.442695, %v3056_v1 }
0x197b   :  { %v3059_v33 = vmul.f32 1.442695, %v3055_v61 }
0x197c   :  { %5021 = vpow2.f32 %v3061_v8  ;;  %v4805_v21 = vpop.permute.xlu1 %4804  ;;  %v3051_v37 = vpop.xlane.xlu0 %3050  ;;  %v4867_v8 = vld [vmem:[%s6543_s4 + $0x40] sm:$0xff]  }
0x197d   :  { %5023 = vpow2.f32 %v3059_v33  ;;  %v4807_v41 = vunpack.i.h.bf16 %v4805_v21  ;;  %v4806_v15 = vunpack.i.l.bf16 %v4805_v21  ;;  %v3057_v30 = vsub.f32 %v3041_v24, %v3051_v37  ;;  %v4868_v33 = vld [vmem:[%s6543_s4 + $0x48] sm:$0xff]   ;;  %v4869_v21 = vld [vmem:[%s6543_s4 + $0x50] sm:$0xff]   ;;  %v4870_v37 = vld [vmem:[%s6543_s4 + $0x58] sm:$0xff]  }
0x197f   :  { %v4619_v16 = vpack.c.bf16 %v4807_v41, %v4806_v15  ;;  %v3063_v55 = vmul.f32 1.442695, %v3057_v30  ;;  %v4871_v41 = vld [vmem:[%s6543_s4 + $0x60] sm:$0xff]   ;;  %v4872_v15 = vld [vmem:[%s6543_s4 + $0x68] sm:$0xff]   ;;  %v4873_v30 = vld [vmem:[%s6543_s4 + $0x70] sm:$0xff]  }
0x1980   :  { %v3054_v12 = vpop.xlane.xlu0 %3053 }
0x1981   :  { %5025 = vpow2.f32 %v3063_v55  ;;  %v3058_v2 = vsub.f32 %v3042_v47, %v3054_v12  ;;  %4620 = vmatprep.subr.bf16.mxu1 %v4619_v16  ;;  %v3853_v47 = vld [vmem:[%s6540_s2 + $0x70] sm:$0xff] }
0x1982   :  { %4622 = vmatpush3.bf16.msra.mxu1 %v4619_v16  ;;  %v6238_v39 = vadd.f32 %v3853_v47, %v5912_v9  ;;  %v6262_v9 = vadd.f32 %v5907_v32, %v3859_v53  ;;  %v4874_v16 = vld [vmem:[%s6543_s4 + $0x78] sm:$0xff]  }
0x1983   :  { %v3065_v43 = vmul.f32 1.442695, %v3058_v2 }
0x1985   :  { %5027 = vpow2.f32 %v3065_v43  ;;  %v3862_v43 = vld [vmem:[%s6540_s2 + $0xb8] sm:$0xff] }
0x1986   :  { %v5022_v52 = vpop.eup %5021 }
0x1987   :  { %v5024_v44 = vpop.eup %5023  ;;  %v3070_v26 = vsel %vm497_vm3, %v5022_v52, 0.0 }
0x1988   :  { %3071 = vadd.xlane.f32.xlu0 %v3070_v26  ;;  %v3067_v35 = vsel %vm497_vm3, %v5024_v44, 0.0  ;;  %v6301_v26 = vadd.f32 %v5915_v48, %v3862_v43 }
0x1989   :  { %3068 = vadd.xlane.f32.xlu1 %v3067_v35 }
0x198b   :  { %v5026_v31 = vpop.eup %5025 }
0x198c   :  { %v3073_v56 = vsel %vm497_vm3, %v5026_v31, 0.0 }
0x198d   :  { %3074 = vadd.xlane.f32.xlu1 %v3073_v56  ;;  %v3261_v56 = vsub.f32 0.0, %v5873_v5 }
0x198f   :  { %v5028_v24 = vpop.eup %5027  ;;  %v3266_v47 = vmul.f32 1.442695, %v3261_v56 }
0x1990   :  { %v3076_v29 = vsel %vm497_vm3, %v5028_v24, 0.0 }
0x1991   :  { %3077 = vadd.xlane.f32.xlu0 %v3076_v29  ;;  %v3262_v29 = vsub.f32 0.0, %v5892_v17 }
0x1993   :  { %v3268_v53 = vmul.f32 1.442695, %v3262_v29 }
0x199e   :  { %3095 = vrot.lane.b32.xlu1 %v6034_v27, %s5138_s10  ;;  %v3856_v27 = vld [vmem:[%s6540_s2 + $0x88] sm:$0xff] }
0x19a2   :  { %4814 = vrot.lane.b32.xlu1 %v4813_v62, %s5137_s9 }
0x19a6   :  { %4819 = vrot.lane.b32.xlu1 %v4818_v4, %s5137_s9  ;;  %s5140_s9 = smov 72  }
0x19a7   :  { %4809 = vrot.lane.b32.xlu0 %v5904_v20, %s5138_s10  ;;  %v6253_v20 = vadd.f32 %v3856_v27, %v5917_v49  ;;  %v3263_v27 = vsub.f32 0.0, %v5897_v6 }
0x19a9   :  { %v3270_v48 = vmul.f32 1.442695, %v3263_v27 }
0x19aa   :  { %3292 = vrot.lane.b32.xlu1 %v6238_v39, %s5132_s11 }
0x19ab   :  { %4824 = vrot.lane.b32.xlu0 %v4823_v59, %s5135_s30 }
0x19ae   :  { %4829 = vrot.lane.b32.xlu1 %v4828_v18, %s5135_s30 }
0x19af   :  { %3294 = vrot.lane.b32.xlu0 %v6253_v20, %s5132_s11 }
0x19b2   :  { %3296 = vrot.lane.b32.xlu1 %v6262_v9, %s5132_s11 }
0x1a15   :  { %v3072_v62 = vpop.xlane.xlu0 %3071 }
0x1a16   :  { %v3069_v19 = vpop.xlane.xlu1 %3068 }
0x1a17   :  { %5029 = vrcp.f32 %v3069_v19 }
0x1a18   :  { %5031 = vrcp.f32 %v3072_v62 }
0x1a1a   :  { %v3075_v0 = vpop.xlane.xlu1 %3074 }
0x1a1b   :  { %5033 = vrcp.f32 %v3075_v0 }
0x1a1e   :  { %v3078_v49 = vpop.xlane.xlu0 %3077  ;;  %v3096_v58 = vpop.permute.xlu1 %3095 }
0x1a1f   :  { %5035 = vrcp.f32 %v3078_v49 }
0x1a21   :  { %v5030_v38 = vpop.eup %5029 }
0x1a22   :  { %v4810_v4 = vpop.permute.xlu0 %4809  ;;  %v3080_v57 = vmul.f32 %v5030_v38, %v5024_v44  ;;  %v5032_v40 = vpop.eup %5031 }
0x1a23   :  { %v4812_v36 = vunpack.i.h.bf16 %v4810_v4  ;;  %v4811_v59 = vunpack.i.l.bf16 %v4810_v4  ;;  %v3082_v63 = vmul.f32 %v5032_v40, %v5022_v52  ;;  %v4815_v19 = vpop.permute.xlu1 %4814 }
0x1a24   :  { %4433 = vmatprep.mubr.msk.f32.mxu1 %vm497_vm3, %v3080_v57 }
0x1a25   :  { %v4623_v32 = vpack.c.bf16 %v4812_v36, %v4811_v59  ;;  %v5034_v18 = vpop.eup %5033 }
0x1a26   :  { %v3084_v25 = vmul.f32 %v5034_v18, %v5026_v31  ;;  %v3260_v31 = vsub.f32 0.0, %v5871_v28 }
0x1a27   :  { %4624 = vmatprep.subr.bf16.mxu1 %v4623_v32  ;;  %v4820_v4 = vpop.permute.xlu1 %4819 }
0x1a28   :  { %4626 = vmatpush3.bf16.msra.mxu1 %v4623_v32 }
0x1a29   :  { %4431 = vmatprep.subr.msk.mxu1 %vm554_vm4, %v3096_v58  ;;  %v5036_v1 = vpop.eup %5035 }
0x1a2a   :  { %v3086_v61 = vmul.f32 %v5036_v1, %v5028_v24  ;;  %v3264_v24 = vmul.f32 1.442695, %v3260_v31 }
0x1a2b   :  { %v3293_v40 = vpop.permute.xlu1 %3292 }
0x1a2c   :  { %4432 = vmatpush3.msk.msra.mxu1 %vm554_vm4, %v3096_v58  ;;  %5037 = vpow2.f32 %v3264_v24  ;;  %v4825_v58 = vpop.permute.xlu0 %4824 }
0x1a2d   :  { %4434 = vmatmul.mubr.msk.f32.vlgmr.msra.gmra.mrb[40].mxu1 %vm497_vm3, %v3082_v63  ;;  %4439 = vmatprep.subr.bf16.mxu1 %v4867_v8  ;;  %5039 = vpow2.f32 %v3266_v47 }
0x1a2e   :  { %4436 = vmatprep.mubr.msk.f32.mxu1 %vm497_vm3, %v3084_v25  ;;  %4440 = vmatpush3.bf16.msra.mxu1 %v4867_v8  ;;  %5041 = vpow2.f32 %v3268_v53  ;;  %v4817_v25 = vunpack.i.h.bf16 %v4815_v19 }
0x1a2f   :  { %4441 = vmatprep.subr.bf16.mxu1 %v4868_v33  ;;  %5043 = vpow2.f32 %v3270_v48  ;;  %v4830_v18 = vpop.permute.xlu1 %4829 }
0x1a30   :  { %v3295_v8 = vpop.permute.xlu0 %3294  ;;  %v4831_v29 = vunpack.i.l.bf16 %v4830_v18 }
0x1a31   :  { %4437 = vmatmul.mubr.msk.f32.gmra.mrb[42].mxu1 %vm497_vm3, %v3086_v61  ;;  %v4816_v61 = vunpack.i.l.bf16 %v4815_v19 }
0x1a32   :  { %4442 = vmatpush3.bf16.msra.mxu1 %v4868_v33  ;;  %v4827_v33 = vunpack.i.h.bf16 %v4825_v58 }
0x1a33   :  { %4443 = vmatprep.subr.bf16.mxu1 %v4869_v21  ;;  %v3297_v43 = vpop.permute.xlu1 %3296 }
0x1a36   :  { %4444 = vmatpush3.bf16.msra.mxu1 %v4869_v21  ;;  %v5038_v62 = vpop.eup %5037  ;;  %v4826_v21 = vunpack.i.l.bf16 %v4825_v58 }
0x1a37   :  { %4445 = vmatprep.subr.bf16.mxu1 %v4870_v37  ;;  %v5040_v0 = vpop.eup %5039  ;;  %v3272_v49 = vadd.f32 1.0, %v5038_v62 }
0x1a38   :  { %v5042_v38 = vpop.eup %5041  ;;  %v3273_v57 = vadd.f32 1.0, %v5040_v0 }
0x1a39   :  { %v5044_v36 = vpop.eup %5043  ;;  %5045 = vrcp.f32 %v3272_v49  ;;  %v3274_v59 = vadd.f32 1.0, %v5042_v38 }
0x1a3a   :  { %4446 = vmatpush3.bf16.msra.mxu1 %v4870_v37  ;;  %5047 = vrcp.f32 %v3273_v57  ;;  %v3275_v32 = vadd.f32 1.0, %v5044_v36 }
0x1a3b   :  { %4447 = vmatprep.subr.bf16.mxu1 %v4871_v41  ;;  %5049 = vrcp.f32 %v3274_v59 }
0x1a3c   :  { %5051 = vrcp.f32 %v3275_v32 }
0x1a3e   :  { %4448 = vmatpush3.bf16.msra.mxu1 %v4871_v41 }
0x1a3f   :  { %4449 = vmatprep.subr.bf16.mxu1 %v4872_v15 }
0x1a42   :  { %4450 = vmatpush3.bf16.msra.mxu1 %v4872_v15 }
0x1a43   :  { %4451 = vmatprep.subr.bf16.mxu1 %v4873_v30  ;;  %v5046_v63 = vpop.eup %5045 }
0x1a44   :  { %v5048_v1 = vpop.eup %5047  ;;  %v3284_v41 = vmul.f32 %v5046_v63, %v5871_v28  ;;  %v3947_v63 = vld [vmem:[%s6538_s0 + $0x40] sm:$0xff] }
0x1a45   :  { %v5050_v37 = vpop.eup %5049  ;;  %v3285_v15 = vmul.f32 %v5048_v1, %v5873_v5  ;;  %v4832_v5 = vunpack.i.h.bf16 %v4830_v18  ;;  %v3949_v18 = vld [vmem:[%s6538_s0 + $0x50] sm:$0xff] }
0x1a46   :  { %4452 = vmatpush3.bf16.msra.mxu1 %v4873_v30  ;;  %v5052_v30 = vpop.eup %5051  ;;  %v3304_v28 = vmul.f32 %v3293_v40, %v3284_v41  ;;  %v3286_v47 = vmul.f32 %v5050_v37, %v5892_v17  ;;  %v3841_v1 = vld [vmem:[%s6538_s0 + $0x110] sm:$0xff]  ;;  %v3948_v37 = vld [vmem:[%s6538_s0 + $0x48] sm:$0xff] }
0x1a47   :  { %4453 = vmatprep.subr.bf16.mxu1 %v4874_v16  ;;  %v3305_v24 = vmul.f32 %v3295_v8, %v3285_v15  ;;  %v3287_v27 = vmul.f32 %v5052_v30, %v5897_v6  ;;  %v3839_v8 = vld [vmem:[%s6538_s0 + $0x100] sm:$0xff]  ;;  %v3840_v30 = vld [vmem:[%s6538_s0 + $0x108] sm:$0xff] }
0x1a48   :  { %v3306_v59 = vmul.f32 %v3297_v43, %v3286_v47 }
0x1a4a   :  { %4454 = vmatpush3.bf16.msra.mxu1 %v4874_v16  ;;  %v3249_v16 = vsel %vm385_vm1, %v6074_v13, %v4817_v25 }
0x1b00   :  { %v4435_v55 = vpop.f32.mrb[40].mxu1 }
0x1b01   :  { %v3181_v12 = vpop.f32.mrb[41].mxu1 }
0x1b02   :  { %v4833_v2 = vpack.i.bf16 %v4435_v55, %v3181_v12  ;;  %v3248_v55 = vsel %vm385_vm1, %v6076_v14, %v4816_v61  ;;  %v4822_v12 = vunpack.i.h.bf16 %v4820_v4 }
0x1b04   :  { %4834 = vrot.lane.b32.xlu0 %v4833_v2, %s5133_s28  ;;  %v4438_v52 = vpop.f32.mrb[42].mxu1  ;;  %v4821_v2 = vunpack.i.l.bf16 %v4820_v4  ;;  %v3251_v53 = vsel %vm385_vm1, %v6078_v3, %v4822_v12 }
0x1b05   :  { %v3191_v44 = vpop.f32.mrb[43].mxu1  ;;  %v3255_v6 = vsel %vm65_vm0, %v3251_v53, %v4832_v5 }
0x1b06   :  { %v4838_v35 = vpack.i.bf16 %v4438_v52, %v3191_v44  ;;  %v3253_v44 = vsel %vm65_vm0, %v3249_v16, %v4827_v33  ;;  %v3250_v48 = vsel %vm385_vm1, %v6080_v23, %v4821_v2 }
0x1b07   :  { %v3254_v36 = vsel %vm65_vm0, %v3250_v48, %v4831_v29 }
0x1b08   :  { %3298 = vrot.lane.b32.xlu0 %v6301_v26, %s5132_s11  ;;  %4839 = vrot.lane.b32.xlu1 %v4838_v35, %s5133_s28  ;;  %v3252_v35 = vsel %vm65_vm0, %v3248_v55, %v4826_v21  ;;  %v3950_v21 = vld [vmem:[%s6538_s0 + $0x58] sm:$0xff] }
0x1b76   :  { %v4835_v52 = vpop.permute.xlu0 %4834 }
0x1b77   :  { %v4837_v31 = vunpack.i.h.bf16 %v4835_v52  ;;  %v4836_v56 = vunpack.i.l.bf16 %v4835_v52  ;;  %v3842_v52 = vld [vmem:[%s6538_s0 + $0x118] sm:$0xff] }
0x1b79   :  { %v3257_v13 = vsel %vm1561_vm5, %v3253_v44, %v4837_v31  ;;  %v3256_v14 = vsel %vm1561_vm5, %v3252_v35, %v4836_v56 }
0x1b7a   :  { %v3299_v19 = vpop.permute.xlu0 %3298  ;;  %v4840_v62 = vpop.permute.xlu1 %4839  ;;  %v3308_v0 = vsel %vm1614_vm6, %v3256_v14, %v3304_v28  ;;  %v3309_v49 = vsel %vm1614_vm6, %v3257_v13, %v3305_v24 }
0x1b7b   :  { %v3307_v38 = vmul.f32 %v3299_v19, %v3287_v27  ;;  %v4842_v17 = vunpack.i.h.bf16 %v4840_v62  ;;  %v4841_v4 = vunpack.i.l.bf16 %v4840_v62  ;;  %v3329_v57 = vpack.c.bf16 %v3309_v49, %v3308_v0 }
0x1b7d   :  { %v3259_v3 = vsel %vm1561_vm5, %v3255_v6, %v4842_v17  ;;  %v3258_v32 = vsel %vm1561_vm5, %v3254_v36, %v4841_v4  ;;  %4455 = vmatprep.mubr.bf16.mxu1 %v3329_v57 }
0x1b7e   :  { %v3311_v23 = vsel %vm1614_vm6, %v3259_v3, %v3307_v38  ;;  %v3310_v40 = vsel %vm1614_vm6, %v3258_v32, %v3306_v59  ;;  %v4875_v32 = vld [vmem:[%s6544_s6] sm:$0xff]  }
0x1b7f   :  { %v3330_v58 = vpack.c.bf16 %v3311_v23, %v3310_v40  ;;  %v4876_v23 = vld [vmem:[%s6544_s6 + $0x8] sm:$0xff]   ;;  %4459 = vmatprep.subr.bf16.mxu0 %v4875_v32 }
0x1b80   :  { %4460 = vmatpush3.bf16.msra.mxu0 %v4875_v32  ;;  %v6426_v32 = vadd.f32 0.54132485, %v6253_v20 }
0x1b81   :  { %4456 = vmatmul.mubr.bf16.vlgmr.msra.gmra.mrb[44].mxu1 %v3330_v58  ;;  %4461 = vmatprep.subr.bf16.mxu0 %v4876_v23 }
0x1b84   :  { %4462 = vmatpush3.bf16.msra.mxu0 %v4876_v23 }
0x1c54   :  { %v4457_v25 = vpop.f32.mrb[44].mxu1 }
0x1c55   :  { %v3427_v61 = vadd.f32 %v4457_v25, %v3949_v18  ;;  %v3418_v33 = vpop.f32.mrb[45].mxu1 }
0x1c56   :  { %v3419_v41 = vadd.f32 %v3947_v63, %v3418_v33  ;;  %v4458_v15 = vpop.f32.mrb[46].mxu1 }
0x1c57   :  { %v3421_v16 = vpop.f32.mrb[47].mxu1  ;;  %v3435_v55 = vmul.f32 %v3841_v1, %v3427_v61  ;;  %v3430_v2 = vadd.f32 %v4458_v15, %v3950_v21 }
0x1c58   :  { %v3433_v12 = vmul.f32 %v3839_v8, %v3419_v41  ;;  %v3422_v43 = vadd.f32 %v3948_v37, %v3421_v16 }
0x1c59   :  { %v3436_v31 = vmul.f32 %v3842_v52, %v3430_v2  ;;  %v3439_v24 = vadd.f32 %v3435_v55, %v5783_v46 }
0x1c5a   :  { %v3434_v44 = vmul.f32 %v3840_v30, %v3422_v43  ;;  %v3437_v35 = vadd.f32 %v3433_v12, %v5778_v34  ;;  %v3959_v30 = vld [vmem:[%s6538_s0 + $0x120] sm:$0xff]  ;;  %v3960_v12 = vld [vmem:[%s6538_s0 + $0x128] sm:$0xff] }
0x1c5b   :  { %v3457_v29 = vsel %vm65_vm0, %v3439_v24, 0.0  ;;  %v3440_v47 = vadd.f32 %v3436_v31, %v5797_v11 }
0x1c5c   :  { %v3451_v56 = vsel %vm65_vm0, %v3437_v35, 0.0  ;;  %v3438_v28 = vadd.f32 %v3434_v44, %v5788_v50  ;;  %v3963_v44 = vld [vmem:[%s6538_s0 + $0x140] sm:$0xff] }
0x1c5d   :  { %3452 = vadd.xlane.f32.xlu0 %v3451_v56  ;;  %v3460_v13 = vsel %vm65_vm0, %v3440_v47, 0.0 }
0x1c5e   :  { %v3454_v5 = vsel %vm65_vm0, %v3438_v28, 0.0 }
0x1c5f   :  { %3455 = vadd.xlane.f32.xlu1 %v3454_v5 }
0x1c61   :  { %3458 = vadd.xlane.f32.xlu0 %v3457_v29 }
0x1c65   :  { %3461 = vadd.xlane.f32.xlu0 %v3460_v13 }
0x1cea   :  { %v3453_v34 = vpop.xlane.xlu0 %3452 }
0x1ceb   :  { %v3463_v14 = vmul.f32 0.03125, %v3453_v34 }
0x1cec   :  { %v3456_v27 = vpop.xlane.xlu1 %3455 }
0x1ced   :  { %v3467_v53 = vsub.f32 %v3437_v35, %v3463_v14  ;;  %v3464_v48 = vmul.f32 0.03125, %v3456_v27  ;;  %v3964_v35 = vld [vmem:[%s6538_s0 + $0x148] sm:$0xff]  ;;  %v3965_v27 = vld [vmem:[%s6538_s0 + $0x150] sm:$0xff] }
0x1cee   :  { %v3459_v50 = vpop.xlane.xlu0 %3458 }
0x1cef   :  { %v3468_v19 = vsub.f32 %v3438_v28, %v3464_v48  ;;  %v3465_v46 = vmul.f32 0.03125, %v3459_v50  ;;  %v3471_v62 = vmul.f32 %v3467_v53, %v3467_v53  ;;  %v3961_v28 = vld [vmem:[%s6538_s0 + $0x130] sm:$0xff] }
0x1cf1   :  { %v3469_v0 = vsub.f32 %v3439_v24, %v3465_v46  ;;  %v3475_v49 = vsel %vm65_vm0, %v3471_v62, 0.0  ;;  %v3472_v38 = vmul.f32 %v3468_v19, %v3468_v19  ;;  %v6403_v62 = vadd.f32 0.54132485, %v5642_v45 }
0x1cf2   :  { %3476 = vadd.xlane.f32.xlu0 %v3475_v49  ;;  %v3462_v17 = vpop.xlane.xlu0 %3461  ;;  %v6409_v49 = vadd.f32 0.54132485, %v5657_v42  ;;  %v6422_v42 = vadd.f32 0.54132485, %v6262_v9 }
0x1cf3   :  { %v3466_v11 = vmul.f32 0.03125, %v3462_v17  ;;  %v3478_v4 = vsel %vm65_vm0, %v3472_v38, 0.0  ;;  %v3473_v57 = vmul.f32 %v3469_v0, %v3469_v0  ;;  %v297_v38 = vand.u32 2147483647, %v6403_v62 }
0x1cf4   :  { %3479 = vadd.xlane.f32.xlu1 %v3478_v4  ;;  %v298_v4 = vand.u32 2147483647, %v6409_v49 }
0x1cf5   :  { %v3470_v36 = vsub.f32 %v3440_v47, %v3466_v11  ;;  %v3481_v6 = vsel %vm65_vm0, %v3473_v57, 0.0  ;;  %v3962_v47 = vld [vmem:[%s6538_s0 + $0x138] sm:$0xff]  ;;  %v6414_v11 = vadd.f32 0.54132485, %v5705_v60  ;;  %v301_v57 = vsub.f32 0.0, %v297_v38 }
0x1cf6   :  { %3482 = vadd.xlane.f32.xlu0 %v3481_v6  ;;  %v302_v6 = vsub.f32 0.0, %v298_v4 }
0x1cf7   :  { %v3474_v59 = vmul.f32 %v3470_v36, %v3470_v36 }
0x1cf9   :  { %v3484_v3 = vsel %vm65_vm0, %v3474_v59, 0.0  ;;  %v305_v59 = vmul.f32 1.442695, %v301_v57 }
0x1cfa   :  { %3485 = vadd.xlane.f32.xlu1 %v3484_v3 }
0x1d7f   :  { %v3477_v40 = vpop.xlane.xlu0 %3476 }
0x1d80   :  { %v3487_v58 = vmul.f32 0.03125, %v3477_v40  ;;  %v307_v40 = vmul.f32 1.442695, %v302_v6 }
0x1d81   :  { %v3480_v18 = vpop.xlane.xlu1 %3479 }
0x1d82   :  { %v3491_v63 = vadd.f32 1e-05, %v3487_v58  ;;  %v3488_v1 = vmul.f32 0.03125, %v3480_v18  ;;  %v1996_v58 = vand.u32 2147483647, %v6422_v42 }
0x1d83   :  { %v3483_v25 = vpop.xlane.xlu0 %3482 }
0x1d84   :  { %5053 = vrsqrt.f32 %v3491_v63  ;;  %v3492_v61 = vadd.f32 1e-05, %v3488_v1  ;;  %v3489_v8 = vmul.f32 0.03125, %v3483_v25  ;;  %v6430_v63 = vadd.f32 0.54132485, %v6301_v26 }
0x1d85   :  { %v1995_v1 = vand.u32 2147483647, %v6426_v32 }
0x1d86   :  { %5055 = vrsqrt.f32 %v3492_v61  ;;  %v3493_v33 = vadd.f32 1e-05, %v3489_v8  ;;  %v2000_v61 = vsub.f32 0.0, %v1996_v58 }
0x1d87   :  { %v3486_v21 = vpop.xlane.xlu1 %3485 }
0x1d88   :  { %5057 = vrsqrt.f32 %v3493_v33  ;;  %v3490_v37 = vmul.f32 0.03125, %v3486_v21  ;;  %v1997_v21 = vand.u32 2147483647, %v6430_v63 }
0x1d8a   :  { %v3494_v41 = vadd.f32 1e-05, %v3490_v37  ;;  %v1999_v37 = vsub.f32 0.0, %v1995_v1  ;;  %v296_v1 = vmax.f32 %v6414_v11, 0.0 }
0x1d8c   :  { %5059 = vrsqrt.f32 %v3494_v41 }
0x1d8d   :  { %5061 = vpow2.f32 %v305_v59 }
0x1d8e   :  { %v5054_v15 = vpop.eup %5053 }
0x1d8f   :  { %v3499_v16 = vmul.f32 %v5054_v15, %v3467_v53  ;;  %v3966_v53 = vld [vmem:[%s6538_s0 + $0x158] sm:$0xff]  ;;  %s5139_s0 = smov 68  }
0x1d90   :  { %v5056_v55 = vpop.eup %5055 }
0x1d91   :  { %v3500_v2 = vmul.f32 %v5056_v55, %v3468_v19  ;;  %v3503_v43 = vmul.f32 %v3959_v30, %v3499_v16 }
0x1d92   :  { %v5058_v52 = vpop.eup %5057 }
0x1d93   :  { %v3501_v31 = vmul.f32 %v5058_v52, %v3469_v0  ;;  %v3504_v56 = vmul.f32 %v3960_v12, %v3500_v2  ;;  %v3507_v24 = vadd.f32 %v3963_v44, %v3503_v43  ;;  %v6406_v0 = vadd.f32 0.54132485, %v5666_v22 }
0x1d94   :  { %v300_v22 = vand.u32 2147483647, %v6414_v11  ;;  %v2006_v12 = vmul.f32 1.442695, %v2000_v61  ;;  %v2001_v2 = vsub.f32 0.0, %v1997_v21 }
0x1d95   :  { %v3508_v5 = vadd.f32 %v3964_v35, %v3504_v56  ;;  %v3505_v13 = vmul.f32 %v3961_v28, %v3501_v31  ;;  %v299_v17 = vand.u32 2147483647, %v6406_v0  ;;  %v2004_v43 = vmul.f32 1.442695, %v1999_v37 }
0x1d96   :  { %v5060_v29 = vpop.eup %5059  ;;  %v304_v23 = vsub.f32 0.0, %v300_v22  ;;  %v2008_v31 = vmul.f32 1.442695, %v2001_v2  ;;  %v1991_v37 = vmax.f32 %v6426_v32, 0.0 }
0x1d97   :  { %v3502_v34 = vmul.f32 %v5060_v29, %v3470_v36  ;;  %v3515_v14 = vpack.c.bf16 %v3508_v5, %v3507_v24  ;;  %v3509_v50 = vadd.f32 %v3965_v27, %v3505_v13  ;;  %v6418_v36 = vadd.f32 0.54132485, %v6238_v39  ;;  %v5062_v44 = vpop.eup %5061 }
0x1d98   :  { %v303_v45 = vsub.f32 0.0, %v299_v17  ;;  %v311_v25 = vmul.f32 1.442695, %v304_v23  ;;  %v313_v28 = vadd.f32 1.0, %v5062_v44  ;;  %v294_v23 = vmax.f32 %v6409_v49, 0.0 }
0x1d99   :  { %v3506_v48 = vmul.f32 %v3962_v47, %v3502_v34  ;;  %4463 = vmatprep.mubr.msk.bf16.mxu0 %vm65_vm0, %v3515_v14  ;;  %v1994_v3 = vand.u32 2147483647, %v6418_v36 }
0x1d9a   :  { %v309_v60 = vmul.f32 1.442695, %v303_v45  ;;  %v293_v45 = vmax.f32 %v6403_v62, 0.0 }
0x1d9b   :  { %v3510_v19 = vadd.f32 %v3966_v53, %v3506_v48  ;;  %v1998_v18 = vsub.f32 0.0, %v1994_v3 }
0x1d9c   :  { %5063 = vpow2.f32 %v309_v60 }
0x1d9d   :  { %v3516_v46 = vpack.c.bf16 %v3510_v19, %v3509_v50  ;;  %5065 = vpow2.f32 %v307_v40  ;;  %v2002_v33 = vmul.f32 1.442695, %v1998_v18 }
0x1d9e   :  { %5067 = vpow2.f32 %v311_v25  ;;  %v1990_v25 = vmax.f32 %v6418_v36, 0.0 }
0x1d9f   :  { %4464 = vmatmul.mubr.msk.bf16.vlgmr.msra.gmra.mrb[48].mxu0 %vm65_vm0, %v3516_v46  ;;  %5069 = vpow2.f32 %v2002_v33 }
0x1da0   :  { %5071 = vpow2.f32 %v2006_v12 }
0x1da1   :  { %5073 = vpow2.f32 %v2004_v43 }
0x1da2   :  { %5075 = vpow2.f32 %v2008_v31 }
0x1da3   :  { %5077 = vlog2.f32 %v313_v28 }
0x1da6   :  { %v5064_v56 = vpop.eup %5063 }
0x1da7   :  { %v5066_v24 = vpop.eup %5065  ;;  %v315_v5 = vadd.f32 1.0, %v5064_v56 }
0x1da8   :  { %v5068_v29 = vpop.eup %5067  ;;  %v314_v47 = vadd.f32 1.0, %v5066_v24 }
0x1da9   :  { %v5070_v13 = vpop.eup %5069  ;;  %5079 = vlog2.f32 %v315_v5  ;;  %v316_v34 = vadd.f32 1.0, %v5068_v29 }
0x1daa   :  { %v5072_v14 = vpop.eup %5071  ;;  %5081 = vlog2.f32 %v314_v47  ;;  %v2010_v27 = vadd.f32 1.0, %v5070_v13 }
0x1dab   :  { %v5074_v53 = vpop.eup %5073  ;;  %5083 = vlog2.f32 %v316_v34  ;;  %v2012_v48 = vadd.f32 1.0, %v5072_v14 }
0x1dac   :  { %5085 = vlog2.f32 %v2010_v27  ;;  %v2011_v50 = vadd.f32 1.0, %v5074_v53  ;;  %v5076_v19 = vpop.eup %5075 }
0x1dad   :  { %v5078_v46 = vpop.eup %5077  ;;  %5087 = vlog2.f32 %v2012_v48  ;;  %v2013_v38 = vadd.f32 1.0, %v5076_v19 }
0x1dae   :  { %5089 = vlog2.f32 %v2011_v50  ;;  %v318_v4 = vmul.f32 0.6931472, %v5078_v46 }
0x1daf   :  { %5091 = vlog2.f32 %v2013_v38 }
0x1db0   :  { %v325_v59 = vadd.f32 %v318_v4, %v293_v45 }
0x1db3   :  { %v5080_v17 = vpop.eup %5079 }
0x1db4   :  { %v5082_v57 = vpop.eup %5081  ;;  %v322_v6 = vmul.f32 0.6931472, %v5080_v17 }
0x1db5   :  { %v5084_v22 = vpop.eup %5083  ;;  %v320_v3 = vmul.f32 0.6931472, %v5082_v57 }
0x1db6   :  { %v5086_v60 = vpop.eup %5085  ;;  %v324_v40 = vmul.f32 0.6931472, %v5084_v22 }
0x1db7   :  { %v5088_v62 = vpop.eup %5087  ;;  %v326_v58 = vadd.f32 %v320_v3, %v294_v23 }
0x1db8   :  { %v5090_v18 = vpop.eup %5089  ;;  %v2019_v61 = vmul.f32 0.6931472, %v5088_v62 }
0x1db9   :  { %v2017_v33 = vmul.f32 0.6931472, %v5090_v18  ;;  %v5092_v21 = vpop.eup %5091 }
0x1dba   :  { %v2021_v36 = vmul.f32 0.6931472, %v5092_v21 }
0x1e72   :  { %v6433_v8 = vpop.f32.mrb[48].mxu0 }
0x1e73   :  { %v6436_v41 = vpop.f32.mrb[49].mxu0  ;;  %v3590_v52 = vsel %vm1614_vm6, %v6433_v8, -inf }
0x1e74   :  { %v6438_v15 = vpop.f32.mrb[50].mxu0  ;;  %v3584_v30 = vsel %vm1614_vm6, %v6436_v41, -inf }
0x1e75   :  { %3585 = vmax.xlane.f32.xlu0 %v3584_v30  ;;  %v6442_v16 = vpop.f32.mrb[51].mxu0  ;;  %v3593_v55 = vsel %vm1614_vm6, %v6438_v15, -inf  ;;  %v2023_v30 = vadd.f32 %v2017_v33, %v1991_v37 }
0x1e76   :  { %3594 = vmax.xlane.f32.xlu1 %v3593_v55  ;;  %v3587_v35 = vsel %vm1614_vm6, %v6442_v16, -inf  ;;  %v1993_v55 = vmax.f32 %v6430_v63, 0.0 }
0x1e78   :  { %v2025_v12 = vadd.f32 %v2021_v36, %v1993_v55 }
0x1e79   :  { %3591 = vmax.xlane.f32.xlu0 %v3590_v52 }
0x1e7a   :  { %3588 = vmax.xlane.f32.xlu1 %v3587_v35 }
0x1e8b   :  { %3638 = vrot.lane.b32.xlu1 %v6253_v20, %s5139_s0  ;;  %v295_v20 = vmax.f32 %v6406_v0, 0.0  ;;  %v328_v0 = vadd.f32 %v324_v40, %v296_v1 }
0x1e8f   :  { %3636 = vrot.lane.b32.xlu0 %v6238_v39, %s5139_s0  ;;  %3640 = vrot.lane.b32.xlu1 %v6262_v9, %s5139_s0  ;;  %v327_v39 = vadd.f32 %v322_v6, %v295_v20  ;;  %v2015_v9 = vmul.f32 0.6931472, %v5086_v60 }
0x1e91   :  { %v2022_v49 = vadd.f32 %v2015_v9, %v1990_v25 }
0x1e93   :  { %3652 = vrot.lane.b32.xlu0 %v325_v59, %s5139_s0  ;;  %3642 = vrot.lane.b32.xlu1 %v6301_v26, %s5139_s0  ;;  %v1992_v26 = vmax.f32 %v6422_v42, 0.0 }
0x1e95   :  { %v2024_v11 = vadd.f32 %v2019_v61, %v1992_v26 }
0x1e97   :  { %3656 = vrot.lane.b32.xlu0 %v327_v39, %s5139_s0  ;;  %3654 = vrot.lane.b32.xlu1 %v326_v58, %s5139_s0 }
0x1e9b   :  { %3668 = vrot.lane.b32.xlu0 %v2022_v49, %s5140_s9  ;;  %3658 = vrot.lane.b32.xlu1 %v328_v0, %s5139_s0 }
0x1e9f   :  { %3672 = vrot.lane.b32.xlu0 %v2024_v11, %s5140_s9  ;;  %3670 = vrot.lane.b32.xlu1 %v2023_v30, %s5140_s9 }
0x1ea3   :  { %3674 = vrot.lane.b32.xlu1 %v2025_v12, %s5140_s9 }
0x1f02   :  { %v6470_v2 = vpop.xlane.xlu0 %3585 }
0x1f03   :  { %v6472_v43 = vpop.xlane.xlu1 %3594  ;;  %v3596_v42 = vsub.f32 %v6436_v41, %v6470_v2 }
0x1f04   :  { %v3599_v63 = vsub.f32 %v6438_v15, %v6472_v43 }
0x1f05   :  { %v3600_v35 = vmul.f32 1.442695, %v3596_v42 }
0x1f06   :  { %v6476_v32 = vpop.xlane.xlu0 %3591  ;;  %v3606_v24 = vmul.f32 1.442695, %v3599_v63 }
0x1f07   :  { %v3598_v52 = vsub.f32 %v6433_v8, %v6476_v32  ;;  %v6480_v44 = vpop.xlane.xlu1 %3588 }
0x1f08   :  { %v3597_v60 = vsub.f32 %v6442_v16, %v6480_v44 }
0x1f09   :  { %v3604_v31 = vmul.f32 1.442695, %v3598_v52 }
0x1f0a   :  { %v3637_v56 = vpop.permute.xlu0 %3636  ;;  %v3602_v62 = vmul.f32 1.442695, %v3597_v60 }
0x1f0b   :  { %5093 = vpow2.f32 %v3604_v31  ;;  %v3639_v28 = vpop.permute.xlu1 %3638  ;;  %v3681_v3 = vsel %vm3680_vm7, %v5714_v10, %v3637_v56 }
0x1f0c   :  { %5095 = vpow2.f32 %v3600_v35  ;;  %v3682_v38 = vsel %vm3680_vm7, %v5716_v7, %v3639_v28 }
0x1f0d   :  { %5097 = vpow2.f32 %v3606_v24 }
0x1f0e   :  { %v3653_v5 = vpop.permute.xlu0 %3652  ;;  %5099 = vpow2.f32 %v3602_v62 }
0x1f0f   :  { %v3641_v29 = vpop.permute.xlu1 %3640  ;;  %v3686_v20 = vsel %vm3685_vm8, %v3681_v3, %v3653_v5 }
0x1f10   :  { %v3683_v6 = vsel %vm3680_vm7, %v5725_v51, %v3641_v29 }
0x1f12   :  { %v3657_v34 = vpop.permute.xlu0 %3656 }
0x1f13   :  { %v3643_v47 = vpop.permute.xlu1 %3642  ;;  %v3688_v59 = vsel %vm3685_vm8, %v3683_v6, %v3657_v34 }
0x1f14   :  { %v3684_v58 = vsel %vm3680_vm7, %v5738_v54, %v3643_v47 }
0x1f15   :  { %v5094_v13 = vpop.eup %5093 }
0x1f16   :  { %v3614_v14 = vsel %vm1614_vm6, %v5094_v13, 0.0  ;;  %v5096_v27 = vpop.eup %5095  ;;  %v3669_v19 = vpop.permute.xlu0 %3668 }
0x1f17   :  { %3615 = vadd.xlane.f32.xlu0 %v3614_v14  ;;  %v3655_v53 = vpop.permute.xlu1 %3654  ;;  %v3608_v48 = vsel %vm1614_vm6, %v5096_v27, 0.0  ;;  %v5098_v50 = vpop.eup %5097  ;;  %v3691_v23 = vsel %vm3690_vm9, %v3686_v20, %v3669_v19 }
0x1f18   :  { %v3617_v17 = vsel %vm1614_vm6, %v5098_v50, 0.0  ;;  %v3687_v4 = vsel %vm3685_vm8, %v3682_v38, %v3655_v53  ;;  %v5100_v51 = vpop.eup %5099 }
0x1f19   :  { %v3611_v39 = vsel %vm1614_vm6, %v5100_v51, 0.0 }
0x1f1a   :  { %v3673_v22 = vpop.permute.xlu0 %3672 }
0x1f1b   :  { %3609 = vadd.xlane.f32.xlu0 %v3608_v48  ;;  %v3659_v46 = vpop.permute.xlu1 %3658  ;;  %v3693_v7 = vsel %vm3690_vm9, %v3688_v59, %v3673_v22 }
0x1f1c   :  { %v3689_v10 = vsel %vm3685_vm8, %v3684_v58, %v3659_v46 }
0x1f1f   :  { %3618 = vadd.xlane.f32.xlu0 %v3617_v17  ;;  %v3671_v57 = vpop.permute.xlu1 %3670 }
0x1f20   :  { %v3692_v45 = vsel %vm3690_vm9, %v3687_v4, %v3671_v57 }
0x1f21   :  { %3701 = vrot.lane.b32.xlu1 %v3692_v45, %s5132_s11 }
0x1f23   :  { %v3675_v40 = vpop.permute.xlu1 %3674 }
0x1f24   :  { %v3694_v9 = vsel %vm3690_vm9, %v3689_v10, %v3675_v40 }
0x1f25   :  { %3703 = vrot.lane.b32.xlu1 %v3693_v7, %s5132_s11 }
0x1f35   :  { %3699 = vrot.lane.b32.xlu0 %v3691_v23, %s5132_s11 }
0x1f49   :  { %3612 = vadd.xlane.f32.xlu1 %v3611_v39 }
0x1f5a   :  { %3705 = vrot.lane.b32.xlu1 %v3694_v9, %s5132_s11 }
0x1f93   :  { %v3702_v0 = vpop.permute.xlu1 %3701 }
0x1f97   :  { %v3704_v37 = vpop.permute.xlu1 %3703 }
0x1fa4   :  { %v3616_v18 = vpop.xlane.xlu0 %3615 }
0x1fa5   :  { %5101 = vlog2.f32 %v3616_v18 }
0x1fa8   :  { %v3610_v1 = vpop.xlane.xlu0 %3609 }
0x1fa9   :  { %5103 = vlog2.f32 %v3610_v1 }
0x1fac   :  { %v3619_v21 = vpop.xlane.xlu0 %3618 }
0x1fad   :  { %5105 = vlog2.f32 %v3619_v21 }
0x1faf   :  { %v5102_v25 = vpop.eup %5101 }
0x1fb0   :  { %v3625_v49 = vmul.f32 0.6931472, %v5102_v25  ;;  %v3700_v12 = vpop.permute.xlu0 %3699 }
0x1fb2   :  { %v3630_v61 = vadd.f32 %v3625_v49, %v6476_v32 }
0x1fb3   :  { %v5104_v33 = vpop.eup %5103 }
0x1fb4   :  { %v3634_v26 = vsub.f32 %v6433_v8, %v3630_v61  ;;  %v3621_v54 = vmul.f32 0.6931472, %v5104_v33 }
0x1fb6   :  { %v3628_v11 = vadd.f32 %v3621_v54, %v6470_v2  ;;  %v3713_v30 = vsel %vm1614_vm6, %v3634_v26, %v3704_v37 }
0x1fb7   :  { %v3718_v36 = vsel %vm3715_vm10, %v3713_v30, 0.0  ;;  %v5106_v2 = vpop.eup %5105 }
0x1fb8   :  { %v3632_v55 = vsub.f32 %v6436_v41, %v3628_v11  ;;  %3722 = vst [vmem:[%s6545_s7 + $0x10] sm:$0xff] %v3718_v36  ;;  %v3627_v32 = vmul.f32 0.6931472, %v5106_v2 }
0x1fba   :  { %v3711_v42 = vsel %vm1614_vm6, %v3632_v55, %v3700_v12  ;;  %v3631_v52 = vadd.f32 %v3627_v32, %v6472_v43 }
0x1fbb   :  { %v3716_v8 = vsel %vm3715_vm10, %v3711_v42, 0.0 }
0x1fbc   :  { %3720 = vst [vmem:[%s6545_s7] sm:$0xff] %v3716_v8  ;;  %v3635_v41 = vsub.f32 %v6438_v15, %v3631_v52 }
0x1fd6   :  { %v3613_v35 = vpop.xlane.xlu1 %3612 }
0x1fd7   :  { %5107 = vlog2.f32 %v3613_v35 }
0x1fda   :  { %v3706_v63 = vpop.permute.xlu1 %3705 }
0x1fdb   :  { %v3714_v31 = vsel %vm1614_vm6, %v3635_v41, %v3706_v63 }
0x1fdc   :  { %v3719_v56 = vsel %vm3715_vm10, %v3714_v31, 0.0 }
0x1fdd   :  { %3723 = vst [vmem:[%s6545_s7 + $0x18] sm:$0xff] %v3719_v56 }
0x1fe1   :  { %v5108_v28 = vpop.eup %5107 }
0x1fe2   :  { %v3623_v24 = vmul.f32 0.6931472, %v5108_v28 }
0x1fe4   :  { %v3629_v5 = vadd.f32 %v3623_v24, %v6480_v44 }
0x1fe6   :  { %v3633_v29 = vsub.f32 %v6442_v16, %v3629_v5 }
0x1fe8   :  { %v3712_v43 = vsel %vm1614_vm6, %v3633_v29, %v3702_v0 }
0x1fe9   :  { %v3717_v47 = vsel %vm3715_vm10, %v3712_v43, 0.0 }
0x1fea   :  { %3721 = vst [vmem:[%s6545_s7 + $0x8] sm:$0xff] %v3717_v47 }

</bundles_post_ra>
